<compile_context>
chip_gen: v7x
topology: tpu7x:2x2x1
jax: 0.10.0
libtpu: 0.0.40
codegen_flags: <defaults>
</compile_context>

<pallas_src>
import functools
import math

import jax
import jax.numpy as jnp
from jax.experimental import pallas as pl
from jax.experimental.pallas import tpu as pltpu


# -----------------------------------------------------------------------------
# Pallas kernel: fused (multi-operand) matmul + bias + activation.
#   refs = (x_0, w_0, x_1, w_1, ..., b, o)
#   o = act( sum_t x_t @ w_t + b )
# x/w tiles are bf16 (MXU fast path), accumulation and epilogue are fp32.
# K is a single full block per operand -> no accumulator scratch, no K grid.
# -----------------------------------------------------------------------------
def _mm_kernel(*refs, activation, n_terms):
    o_ref = refs[-1]
    b_ref = refs[-2]
    acc = jnp.dot(refs[0][...], refs[1][...], preferred_element_type=jnp.float32)
    for t in range(1, n_terms):
        acc = acc + jnp.dot(refs[2 * t][...], refs[2 * t + 1][...],
                            preferred_element_type=jnp.float32)
    y = acc + b_ref[...]                       # (tm, tn) + (1, tn), fp32
    if activation == "relu":
        y = jnp.maximum(y, 0.0)
    elif activation == "sigmoid":
        # exp + approximate reciprocal both live on the EUP slot; clamp keeps
        # the approx result strictly inside [0, 1].
        y = jnp.minimum(pl.reciprocal(1.0 + jnp.exp(-y), approx=True), 1.0)
    o_ref[...] = y.astype(o_ref.dtype)


def _round_up(x, m):
    return (x + m - 1) // m * m


def _pick_tm(M, k_total):
    """M tile: big (amortize per-step overhead) but >=2 grid steps when M>=512."""
    M8 = _round_up(M, 8)
    if M8 < 512:
        return M8                              # single full-M block
    tm = 512 if M8 >= 1024 else 256
    # keep double-buffered bf16 x tiles comfortably inside scoped VMEM
    while tm > 64 and tm * k_total * 2 * 2 > (8 << 20):
        tm //= 2
    return tm


def _pick_tn(N):
    """N tile: full-dim (lane exemption) when small, 128/256-aligned otherwise."""
    if N <= 128:
        return N, N
    if N % 256 == 0:
        return 256, N
    if N % 128 == 0:
        return 128, N
    Np = _round_up(N, 128)
    return 128, Np


def fused_matmul(operands, b, *, activation=None, out_dtype=jnp.float32):
    """operands: list of (x_i:(M,K_i), w_i:(K_i,N)). Returns act(sum x_i@w_i + b)."""
    M = operands[0][0].shape[0]
    N = operands[0][1].shape[1]
    k_total = 0
    for x_i, w_i in operands:
        assert x_i.shape[0] == M and w_i.shape[1] == N
        assert x_i.shape[1] == w_i.shape[0]
        k_total += x_i.shape[1]

    tm = _pick_tm(M, k_total)
    Mp = _round_up(M, tm)
    tn, Np = _pick_tn(N)

    args, in_specs = [], []
    for x_i, w_i in operands:
        K_i = x_i.shape[1]
        x_i = x_i.astype(jnp.bfloat16)
        w_i = w_i.astype(jnp.bfloat16)
        if Mp != M:
            x_i = jnp.pad(x_i, ((0, Mp - M), (0, 0)))
        if Np != N:
            w_i = jnp.pad(w_i, ((0, 0), (0, Np - N)))
        args.append(x_i)
        args.append(w_i)
        in_specs.append(pl.BlockSpec((tm, K_i), lambda i, j: (i, 0)))
        in_specs.append(pl.BlockSpec((K_i, tn), lambda i, j: (0, j)))

    bb = b.astype(jnp.float32).reshape(1, N)
    if Np != N:
        bb = jnp.pad(bb, ((0, 0), (0, Np - N)))
    args.append(bb)
    in_specs.append(pl.BlockSpec((1, tn), lambda i, j: (0, j)))

    grid = (Mp // tm, Np // tn)
    out = pl.pallas_call(
        functools.partial(_mm_kernel, activation=activation,
                          n_terms=len(operands)),
        out_shape=jax.ShapeDtypeStruct((Mp, Np), out_dtype),
        grid_spec=pltpu.PrefetchScalarGridSpec(
            num_scalar_prefetch=0,
            grid=grid,
            in_specs=in_specs,
            out_specs=pl.BlockSpec((tm, tn), lambda i, j: (i, j)),
        ),
        compiler_params=pltpu.CompilerParams(
            dimension_semantics=("parallel", "parallel"),
            vmem_limit_bytes=32 * 1024 * 1024,
        ),
    )(*args)

    if Mp != M or Np != N:
        out = out[:M, :N]
    return out


# -----------------------------------------------------------------------------
# Conv building blocks (layout glue in JAX, all FLOPs in the Pallas kernel)
# -----------------------------------------------------------------------------
def _im2col(x, k, pad):
    """x: (N,H,W,C) bf16 -> patches (N*Ho*Wo, k*k*C), column order (kh, kw, cin)."""
    if pad:
        x = jnp.pad(x, ((0, 0), (pad, pad), (pad, pad), (0, 0)))
    N, H, W, C = x.shape
    Ho, Wo = H - k + 1, W - k + 1
    cols = [x[:, di:di + Ho, dj:dj + Wo, :] for di in range(k) for dj in range(k)]
    patches = jnp.concatenate(cols, axis=-1)
    return patches.reshape(N * Ho * Wo, k * k * C), (N, Ho, Wo)


def conv2d(x, w_mat, b, pad, activation, out_dtype=jnp.bfloat16):
    """3x3 conv: w_mat is (9*Cin, Cout) in (kh,kw,cin) row order, bf16."""
    patches, (n, ho, wo) = _im2col(x, 3, pad)
    y = fused_matmul([(patches, w_mat)], b, activation=activation,
                     out_dtype=out_dtype)
    return y.reshape(n, ho, wo, -1)


def conv_transpose2x2(x, w_mat, b4):
    """ConvTranspose2d(k=2, s=2). w_mat: (Cin, 4*Cout) ordered (di,dj,co)."""
    n, h, wd, cin = x.shape
    cout = w_mat.shape[1] // 4
    y = fused_matmul([(x.reshape(n * h * wd, cin), w_mat)], b4,
                     activation=None, out_dtype=jnp.bfloat16)
    y = y.reshape(n, h, wd, 2, 2, cout)
    y = jnp.transpose(y, (0, 1, 3, 2, 4, 5)).reshape(n, 2 * h, 2 * wd, cout)
    return y


def avg_pool2(x):
    # Reference forward uses F.avg_pool2d(x, 2) (not max pool).
    n, h, w, c = x.shape
    x4 = x.reshape(n, h // 2, 2, w // 2, 2, c).astype(jnp.float32)
    return x4.mean(axis=(2, 4)).astype(x.dtype)


def batchnorm_train(x, eps=1e-5):
    # nn.BatchNorm2d in (default) training mode with weight=1, bias=0:
    # normalize with batch statistics over (N, H, W), fp32.
    mean = jnp.mean(x, axis=(0, 1, 2), keepdims=True)
    var = jnp.mean((x - mean) ** 2, axis=(0, 1, 2), keepdims=True)
    return (x - mean) / jnp.sqrt(var + eps)


def center_crop(layer, th, tw):
    h, w = layer.shape[1], layer.shape[2]
    dy, dx = (h - th) // 2, (w - tw) // 2
    return layer[:, dy:dy + th, dx:dx + tw, :]


def unet_conv_block(x, p, pad):
    x = conv2d(x, p["w1"], p["b1"], pad, "relu")
    x = conv2d(x, p["w2"], p["b2"], pad, "relu")
    return x


def unet_up_block(x, bridge, p, pad):
    up = conv_transpose2x2(x, p["up_w"], p["up_b"])
    crop = center_crop(bridge, up.shape[1], up.shape[2])
    # First conv of the block: split-K over (up, crop) inside one kernel call,
    # so torch.cat([up, crop], dim=1) is never materialized in HBM.
    pu, (n, ho, wo) = _im2col(up, 3, pad)
    pc, _ = _im2col(crop, 3, pad)
    x = fused_matmul([(pu, p["w1u"]), (pc, p["w1c"])], p["b1"],
                     activation="relu", out_dtype=jnp.bfloat16)
    x = x.reshape(n, ho, wo, -1)
    x = conv2d(x, p["w2"], p["b2"], pad, "relu")
    return x


# -----------------------------------------------------------------------------
# Parameter init (mirrors _init_weights: kaiming_normal fan_out / relu; bias is
# Normal(mean=-1/sqrt(fan_out), std=1/sqrt(fan_out)), exactly as in the module).
# Weights are stored pre-transposed to matmul layout and pre-cast to bf16.
# -----------------------------------------------------------------------------
def _conv3_params(key, cin, cout):
    kw_, kb_ = jax.random.split(key)
    fan_out = cout * 9
    std = math.sqrt(2.0 / fan_out)
    w = std * jax.random.normal(kw_, (cout, cin, 3, 3), jnp.float32)
    bound = 1.0 / math.sqrt(fan_out)
    b = -bound + bound * jax.random.normal(kb_, (cout,), jnp.float32)
    w_mat = jnp.transpose(w, (2, 3, 1, 0)).reshape(9 * cin, cout)
    return w_mat.astype(jnp.bfloat16), b.reshape(1, cout)


def _conv3_split_params(key, cin_half, cout):
    """First conv of an up block (in-channels = 2*cin_half), split for fused concat."""
    kw_, kb_ = jax.random.split(key)
    cin = 2 * cin_half
    fan_out = cout * 9
    std = math.sqrt(2.0 / fan_out)
    w = std * jax.random.normal(kw_, (cout, cin, 3, 3), jnp.float32)
    bound = 1.0 / math.sqrt(fan_out)
    b = -bound + bound * jax.random.normal(kb_, (cout,), jnp.float32)
    wt = jnp.transpose(w, (2, 3, 1, 0))                   # (3,3,cin,cout)
    w_up = wt[:, :, :cin_half, :].reshape(9 * cin_half, cout)
    w_br = wt[:, :, cin_half:, :].reshape(9 * cin_half, cout)
    return (w_up.astype(jnp.bfloat16), w_br.astype(jnp.bfloat16),
            b.reshape(1, cout))


def _convT2_params(key, cin, cout):
    kw_, kb_ = jax.random.split(key)
    fan_out = cin * 4            # torch fan_out for ConvTranspose2d weight
    std = math.sqrt(2.0 / fan_out)
    w = std * jax.random.normal(kw_, (cin, cout, 2, 2), jnp.float32)
    bound = 1.0 / math.sqrt(fan_out)
    b = -bound + bound * jax.random.normal(kb_, (cout,), jnp.float32)
    w_mat = jnp.transpose(w, (0, 2, 3, 1)).reshape(cin, 4 * cout)
    b_mat = jnp.tile(b, 4).reshape(1, 4 * cout)           # bias per (di,dj,co)
    return w_mat.astype(jnp.bfloat16), b_mat


def _conv1_params(key, cin, cout):
    kw_, kb_ = jax.random.split(key)
    fan_out = cout * 1
    std = math.sqrt(2.0 / fan_out)
    w = std * jax.random.normal(kw_, (cout, cin, 1, 1), jnp.float32)
    bound = 1.0 / math.sqrt(fan_out)
    b = -bound + bound * jax.random.normal(kb_, (cout,), jnp.float32)
    w_mat = jnp.transpose(w, (2, 3, 1, 0)).reshape(cin, cout)
    return w_mat.astype(jnp.bfloat16), b.reshape(1, cout)


def init_params(key, in_channels, n_classes, depth, wf):
    params = {"down": [], "up": []}
    n_keys = 2 * depth + 3 * (depth - 1) + 1
    keys = iter(jax.random.split(key, n_keys))

    prev = in_channels
    for i in range(depth):
        cout = 2 ** (wf + i)
        w1, b1 = _conv3_params(next(keys), prev, cout)
        w2, b2 = _conv3_params(next(keys), cout, cout)
        params["down"].append({"w1": w1, "b1": b1, "w2": w2, "b2": b2})
        prev = cout

    for i in reversed(range(depth - 1)):
        cout = 2 ** (wf + i)
        up_w, up_b = _convT2_params(next(keys), prev, cout)
        w1u, w1c, b1 = _conv3_split_params(next(keys), cout, cout)
        w2, b2 = _conv3_params(next(keys), cout, cout)
        params["up"].append({"up_w": up_w, "up_b": up_b,
                             "w1u": w1u, "w1c": w1c, "b1": b1,
                             "w2": w2, "b2": b2})
        prev = cout

    lw, lb = _conv1_params(next(keys), prev, n_classes)
    params["last"] = {"w": lw, "b": lb}
    return params


# -----------------------------------------------------------------------------
# UNet forward (padding bool, batch_norm=False, up_mode='upconv')
# -----------------------------------------------------------------------------
def unet_forward(x_nchw, params, depth, padding):
    pad = 1 if padding else 0
    x = jnp.transpose(x_nchw, (0, 2, 3, 1)).astype(jnp.float32)   # NCHW -> NHWC
    x = batchnorm_train(x).astype(jnp.bfloat16)                   # input_batchnorm

    blocks = []
    for i in range(depth):
        x = unet_conv_block(x, params["down"][i], pad)
        if i != depth - 1:
            blocks.append(x)
            x = avg_pool2(x)

    for i in range(depth - 1):
        x = unet_up_block(x, blocks[-i - 1], params["up"][i], pad)

    # last: 1x1 conv + sigmoid fused in the Pallas kernel (fp32 output)
    n, h, w, c = x.shape
    y = fused_matmul([(x.reshape(n * h * w, c), params["last"]["w"])],
                     params["last"]["b"], activation="sigmoid",
                     out_dtype=jnp.float32)
    y = y.reshape(n, h, w, -1)
    return jnp.transpose(y, (0, 3, 1, 2))                         # back to NCHW


if __name__ == "__main__":
    # Small UNet: in_channels=3, n_classes=1, depth=3, wf=4, padding=True,
    # batch_norm=False, up_mode='upconv'
    depth, wf, in_ch, n_classes, padding = 3, 4, 3, 1, True

    key = jax.random.PRNGKey(0)
    pkey, xkey = jax.random.split(key)
    params = init_params(pkey, in_ch, n_classes, depth, wf)

    x = jax.random.normal(xkey, (2, in_ch, 16, 16), jnp.float32)

    fwd = jax.jit(unet_forward, static_argnums=(2, 3))
    out = jax.block_until_ready(fwd(x, params, depth, padding))

    assert out.shape == (2, n_classes, 16, 16), out.shape
    assert bool(jnp.all(jnp.isfinite(out)))
    assert bool(jnp.all((out >= 0.0) & (out <= 1.0)))
    print("KERNEL_OK")
</pallas_src>

<mosaic_0001>
module attributes {stable_mosaic.version = 11 : i64} {
  func.func @_mm_kernel(%arg0: i32, %arg1: i32, %arg2: memref<256x27xbf16, #tpu.memory_space<vmem>>, %arg3: memref<27x16xbf16, #tpu.memory_space<vmem>>, %arg4: memref<1x16xf32, #tpu.memory_space<vmem>>, %arg5: memref<256x16xbf16, #tpu.memory_space<vmem>>) attributes {dimension_semantics = [#tpu.dimension_semantics<parallel>, #tpu.dimension_semantics<parallel>], iteration_bounds = array<i64: 2, 1>, scalar_prefetch = 0 : i64, scratch_operands = 0 : i64, tpu.core_type = #tpu.core_type<tc>, window_params = [{transform_indices = @transform_0, window_bounds = array<i64: 256, 27>}, {transform_indices = @transform_1, window_bounds = array<i64: 27, 16>}, {transform_indices = @transform_2, window_bounds = array<i64: 1, 16>}, {transform_indices = @transform_3, window_bounds = array<i64: 256, 16>}]} {
    %c0 = arith.constant 0 : index
    %c0_0 = arith.constant 0 : index
    %0 = vector.load %arg2[%c0, %c0_0] : memref<256x27xbf16, #tpu.memory_space<vmem>>, vector<256x27xbf16>
    %c0_1 = arith.constant 0 : index
    %c0_2 = arith.constant 0 : index
    %1 = vector.load %arg3[%c0_1, %c0_2] : memref<27x16xbf16, #tpu.memory_space<vmem>>, vector<27x16xbf16>
    %cst = arith.constant dense<0.000000e+00> : vector<256x16xf32>
    %2 = tpu.matmul %0, %1, %cst {dimension_numbers = #tpu.dot_dimension_numbers<[1], [0], [0], [1], [0, 0, 1, 1], [], []>} : vector<256x27xbf16>, vector<27x16xbf16>, vector<256x16xf32> -> vector<256x16xf32>
    %c0_3 = arith.constant 0 : index
    %c0_4 = arith.constant 0 : index
    %3 = vector.load %arg4[%c0_3, %c0_4] : memref<1x16xf32, #tpu.memory_space<vmem>>, vector<1x16xf32>
    %4 = vector.broadcast %3 : vector<1x16xf32> to vector<256x16xf32>
    %5 = arith.addf %2, %4 : vector<256x16xf32>
    %cst_5 = arith.constant 0.000000e+00 : f32
    %6 = vector.broadcast %cst_5 : f32 to vector<256x16xf32>
    %7 = arith.maximumf %5, %6 : vector<256x16xf32>
    %8 = arith.truncf %7 : vector<256x16xf32> to vector<256x16xbf16>
    %c0_6 = arith.constant 0 : index
    %c0_7 = arith.constant 0 : index
    %9 = vector.load %arg5[%c0_6, %c0_7] : memref<256x16xbf16, #tpu.memory_space<vmem>>, vector<256x16xbf16>
    tpu.vector_store %arg5[%c0_6, %c0_7], %8 {strides = array<i32>} : memref<256x16xbf16, #tpu.memory_space<vmem>>, vector<256x16xbf16>,
    return
  }
  func.func @transform_0(%arg0: i32, %arg1: i32) -> (i32, i32) {
    %c0_i32 = arith.constant 0 : i32
    %c0_i32_0 = arith.constant 0 : i32
    return %arg0, %c0_i32 : i32, i32
  }
  func.func @transform_1(%arg0: i32, %arg1: i32) -> (i32, i32) {
    %c0_i32 = arith.constant 0 : i32
    %c0_i32_0 = arith.constant 0 : i32
    return %c0_i32, %arg1 : i32, i32
  }
  func.func @transform_2(%arg0: i32, %arg1: i32) -> (i32, i32) {
    %c0_i32 = arith.constant 0 : i32
    %c0_i32_0 = arith.constant 0 : i32
    return %c0_i32, %arg1 : i32, i32
  }
  func.func @transform_3(%arg0: i32, %arg1: i32) -> (i32, i32) {
    %c0_i32 = arith.constant 0 : i32
    return %arg0, %arg1 : i32, i32
  }
}

module attributes {stable_mosaic.version = 11 : i64} {
  func.func @_mm_kernel(%arg0: i32, %arg1: i32, %arg2: memref<256x144xbf16, #tpu.memory_space<vmem>>, %arg3: memref<144x16xbf16, #tpu.memory_space<vmem>>, %arg4: memref<1x16xf32, #tpu.memory_space<vmem>>, %arg5: memref<256x16xbf16, #tpu.memory_space<vmem>>) attributes {dimension_semantics = [#tpu.dimension_semantics<parallel>, #tpu.dimension_semantics<parallel>], iteration_bounds = array<i64: 2, 1>, scalar_prefetch = 0 : i64, scratch_operands = 0 : i64, tpu.core_type = #tpu.core_type<tc>, window_params = [{transform_indices = @transform_0, window_bounds = array<i64: 256, 144>}, {transform_indices = @transform_1, window_bounds = array<i64: 144, 16>}, {transform_indices = @transform_2, window_bounds = array<i64: 1, 16>}, {transform_indices = @transform_3, window_bounds = array<i64: 256, 16>}]} {
    %c0 = arith.constant 0 : index
    %c0_0 = arith.constant 0 : index
    %0 = vector.load %arg2[%c0, %c0_0] : memref<256x144xbf16, #tpu.memory_space<vmem>>, vector<256x144xbf16>
    %c0_1 = arith.constant 0 : index
    %c0_2 = arith.constant 0 : index
    %1 = vector.load %arg3[%c0_1, %c0_2] : memref<144x16xbf16, #tpu.memory_space<vmem>>, vector<144x16xbf16>
    %cst = arith.constant dense<0.000000e+00> : vector<256x16xf32>
    %2 = tpu.matmul %0, %1, %cst {dimension_numbers = #tpu.dot_dimension_numbers<[1], [0], [0], [1], [0, 0, 1, 1], [], []>} : vector<256x144xbf16>, vector<144x16xbf16>, vector<256x16xf32> -> vector<256x16xf32>
    %c0_3 = arith.constant 0 : index
    %c0_4 = arith.constant 0 : index
    %3 = vector.load %arg4[%c0_3, %c0_4] : memref<1x16xf32, #tpu.memory_space<vmem>>, vector<1x16xf32>
    %4 = vector.broadcast %3 : vector<1x16xf32> to vector<256x16xf32>
    %5 = arith.addf %2, %4 : vector<256x16xf32>
    %cst_5 = arith.constant 0.000000e+00 : f32
    %6 = vector.broadcast %cst_5 : f32 to vector<256x16xf32>
    %7 = arith.maximumf %5, %6 : vector<256x16xf32>
    %8 = arith.truncf %7 : vector<256x16xf32> to vector<256x16xbf16>
    %c0_6 = arith.constant 0 : index
    %c0_7 = arith.constant 0 : index
    %9 = vector.load %arg5[%c0_6, %c0_7] : memref<256x16xbf16, #tpu.memory_space<vmem>>, vector<256x16xbf16>
    tpu.vector_store %arg5[%c0_6, %c0_7], %8 {strides = array<i32>} : memref<256x16xbf16, #tpu.memory_space<vmem>>, vector<256x16xbf16>,
    return
  }
  func.func @transform_0(%arg0: i32, %arg1: i32) -> (i32, i32) {
    %c0_i32 = arith.constant 0 : i32
    %c0_i32_0 = arith.constant 0 : i32
    return %arg0, %c0_i32 : i32, i32
  }
  func.func @transform_1(%arg0: i32, %arg1: i32) -> (i32, i32) {
    %c0_i32 = arith.constant 0 : i32
    %c0_i32_0 = arith.constant 0 : i32
    return %c0_i32, %arg1 : i32, i32
  }
  func.func @transform_2(%arg0: i32, %arg1: i32) -> (i32, i32) {
    %c0_i32 = arith.constant 0 : i32
    %c0_i32_0 = arith.constant 0 : i32
    return %c0_i32, %arg1 : i32, i32
  }
  func.func @transform_3(%arg0: i32, %arg1: i32) -> (i32, i32) {
    %c0_i32 = arith.constant 0 : i32
    return %arg0, %arg1 : i32, i32
  }
}

module attributes {stable_mosaic.version = 11 : i64} {
  func.func @_mm_kernel(%arg0: i32, %arg1: i32, %arg2: memref<128x144xbf16, #tpu.memory_space<vmem>>, %arg3: memref<144x32xbf16, #tpu.memory_space<vmem>>, %arg4: memref<1x32xf32, #tpu.memory_space<vmem>>, %arg5: memref<128x32xbf16, #tpu.memory_space<vmem>>) attributes {dimension_semantics = [#tpu.dimension_semantics<parallel>, #tpu.dimension_semantics<parallel>], iteration_bounds = array<i64: 1, 1>, scalar_prefetch = 0 : i64, scratch_operands = 0 : i64, tpu.core_type = #tpu.core_type<tc>, window_params = [{transform_indices = @transform_0, window_bounds = array<i64: 128, 144>}, {transform_indices = @transform_1, window_bounds = array<i64: 144, 32>}, {transform_indices = @transform_2, window_bounds = array<i64: 1, 32>}, {transform_indices = @transform_3, window_bounds = array<i64: 128, 32>}]} {
    %c0 = arith.constant 0 : index
    %c0_0 = arith.constant 0 : index
    %0 = vector.load %arg2[%c0, %c0_0] : memref<128x144xbf16, #tpu.memory_space<vmem>>, vector<128x144xbf16>
    %c0_1 = arith.constant 0 : index
    %c0_2 = arith.constant 0 : index
    %1 = vector.load %arg3[%c0_1, %c0_2] : memref<144x32xbf16, #tpu.memory_space<vmem>>, vector<144x32xbf16>
    %cst = arith.constant dense<0.000000e+00> : vector<128x32xf32>
    %2 = tpu.matmul %0, %1, %cst {dimension_numbers = #tpu.dot_dimension_numbers<[1], [0], [0], [1], [0, 0, 1, 1], [], []>} : vector<128x144xbf16>, vector<144x32xbf16>, vector<128x32xf32> -> vector<128x32xf32>
    %c0_3 = arith.constant 0 : index
    %c0_4 = arith.constant 0 : index
    %3 = vector.load %arg4[%c0_3, %c0_4] : memref<1x32xf32, #tpu.memory_space<vmem>>, vector<1x32xf32>
    %4 = vector.broadcast %3 : vector<1x32xf32> to vector<128x32xf32>
    %5 = arith.addf %2, %4 : vector<128x32xf32>
    %cst_5 = arith.constant 0.000000e+00 : f32
    %6 = vector.broadcast %cst_5 : f32 to vector<128x32xf32>
    %7 = arith.maximumf %5, %6 : vector<128x32xf32>
    %8 = arith.truncf %7 : vector<128x32xf32> to vector<128x32xbf16>
    %c0_6 = arith.constant 0 : index
    %c0_7 = arith.constant 0 : index
    %9 = vector.load %arg5[%c0_6, %c0_7] : memref<128x32xbf16, #tpu.memory_space<vmem>>, vector<128x32xbf16>
    tpu.vector_store %arg5[%c0_6, %c0_7], %8 {strides = array<i32>} : memref<128x32xbf16, #tpu.memory_space<vmem>>, vector<128x32xbf16>,
    return
  }
  func.func @transform_0(%arg0: i32, %arg1: i32) -> (i32, i32) {
    %c0_i32 = arith.constant 0 : i32
    %c0_i32_0 = arith.constant 0 : i32
    return %arg0, %c0_i32 : i32, i32
  }
  func.func @transform_1(%arg0: i32, %arg1: i32) -> (i32, i32) {
    %c0_i32 = arith.constant 0 : i32
    %c0_i32_0 = arith.constant 0 : i32
    return %c0_i32, %arg1 : i32, i32
  }
  func.func @transform_2(%arg0: i32, %arg1: i32) -> (i32, i32) {
    %c0_i32 = arith.constant 0 : i32
    %c0_i32_0 = arith.constant 0 : i32
    return %c0_i32, %arg1 : i32, i32
  }
  func.func @transform_3(%arg0: i32, %arg1: i32) -> (i32, i32) {
    %c0_i32 = arith.constant 0 : i32
    return %arg0, %arg1 : i32, i32
  }
}

module attributes {stable_mosaic.version = 11 : i64} {
  func.func @_mm_kernel(%arg0: i32, %arg1: i32, %arg2: memref<128x288xbf16, #tpu.memory_space<vmem>>, %arg3: memref<288x32xbf16, #tpu.memory_space<vmem>>, %arg4: memref<1x32xf32, #tpu.memory_space<vmem>>, %arg5: memref<128x32xbf16, #tpu.memory_space<vmem>>) attributes {dimension_semantics = [#tpu.dimension_semantics<parallel>, #tpu.dimension_semantics<parallel>], iteration_bounds = array<i64: 1, 1>, scalar_prefetch = 0 : i64, scratch_operands = 0 : i64, tpu.core_type = #tpu.core_type<tc>, window_params = [{transform_indices = @transform_0, window_bounds = array<i64: 128, 288>}, {transform_indices = @transform_1, window_bounds = array<i64: 288, 32>}, {transform_indices = @transform_2, window_bounds = array<i64: 1, 32>}, {transform_indices = @transform_3, window_bounds = array<i64: 128, 32>}]} {
    %c0 = arith.constant 0 : index
    %c0_0 = arith.constant 0 : index
    %0 = vector.load %arg2[%c0, %c0_0] : memref<128x288xbf16, #tpu.memory_space<vmem>>, vector<128x288xbf16>
    %c0_1 = arith.constant 0 : index
    %c0_2 = arith.constant 0 : index
    %1 = vector.load %arg3[%c0_1, %c0_2] : memref<288x32xbf16, #tpu.memory_space<vmem>>, vector<288x32xbf16>
    %cst = arith.constant dense<0.000000e+00> : vector<128x32xf32>
    %2 = tpu.matmul %0, %1, %cst {dimension_numbers = #tpu.dot_dimension_numbers<[1], [0], [0], [1], [0, 0, 1, 1], [], []>} : vector<128x288xbf16>, vector<288x32xbf16>, vector<128x32xf32> -> vector<128x32xf32>
    %c0_3 = arith.constant 0 : index
    %c0_4 = arith.constant 0 : index
    %3 = vector.load %arg4[%c0_3, %c0_4] : memref<1x32xf32, #tpu.memory_space<vmem>>, vector<1x32xf32>
    %4 = vector.broadcast %3 : vector<1x32xf32> to vector<128x32xf32>
    %5 = arith.addf %2, %4 : vector<128x32xf32>
    %cst_5 = arith.constant 0.000000e+00 : f32
    %6 = vector.broadcast %cst_5 : f32 to vector<128x32xf32>
    %7 = arith.maximumf %5, %6 : vector<128x32xf32>
    %8 = arith.truncf %7 : vector<128x32xf32> to vector<128x32xbf16>
    %c0_6 = arith.constant 0 : index
    %c0_7 = arith.constant 0 : index
    %9 = vector.load %arg5[%c0_6, %c0_7] : memref<128x32xbf16, #tpu.memory_space<vmem>>, vector<128x32xbf16>
    tpu.vector_store %arg5[%c0_6, %c0_7], %8 {strides = array<i32>} : memref<128x32xbf16, #tpu.memory_space<vmem>>, vector<128x32xbf16>,
    return
  }
  func.func @transform_0(%arg0: i32, %arg1: i32) -> (i32, i32) {
    %c0_i32 = arith.constant 0 : i32
    %c0_i32_0 = arith.constant 0 : i32
    return %arg0, %c0_i32 : i32, i32
  }
  func.func @transform_1(%arg0: i32, %arg1: i32) -> (i32, i32) {
    %c0_i32 = arith.constant 0 : i32
    %c0_i32_0 = arith.constant 0 : i32
    return %c0_i32, %arg1 : i32, i32
  }
  func.func @transform_2(%arg0: i32, %arg1: i32) -> (i32, i32) {
    %c0_i32 = arith.constant 0 : i32
    %c0_i32_0 = arith.constant 0 : i32
    return %c0_i32, %arg1 : i32, i32
  }
  func.func @transform_3(%arg0: i32, %arg1: i32) -> (i32, i32) {
    %c0_i32 = arith.constant 0 : i32
    return %arg0, %arg1 : i32, i32
  }
}

module attributes {stable_mosaic.version = 11 : i64} {
  func.func @_mm_kernel(%arg0: i32, %arg1: i32, %arg2: memref<32x288xbf16, #tpu.memory_space<vmem>>, %arg3: memref<288x64xbf16, #tpu.memory_space<vmem>>, %arg4: memref<1x64xf32, #tpu.memory_space<vmem>>, %arg5: memref<32x64xbf16, #tpu.memory_space<vmem>>) attributes {dimension_semantics = [#tpu.dimension_semantics<parallel>, #tpu.dimension_semantics<parallel>], iteration_bounds = array<i64: 1, 1>, scalar_prefetch = 0 : i64, scratch_operands = 0 : i64, tpu.core_type = #tpu.core_type<tc>, window_params = [{transform_indices = @transform_0, window_bounds = array<i64: 32, 288>}, {transform_indices = @transform_1, window_bounds = array<i64: 288, 64>}, {transform_indices = @transform_2, window_bounds = array<i64: 1, 64>}, {transform_indices = @transform_3, window_bounds = array<i64: 32, 64>}]} {
    %c0 = arith.constant 0 : index
    %c0_0 = arith.constant 0 : index
    %0 = vector.load %arg2[%c0, %c0_0] : memref<32x288xbf16, #tpu.memory_space<vmem>>, vector<32x288xbf16>
    %c0_1 = arith.constant 0 : index
    %c0_2 = arith.constant 0 : index
    %1 = vector.load %arg3[%c0_1, %c0_2] : memref<288x64xbf16, #tpu.memory_space<vmem>>, vector<288x64xbf16>
    %cst = arith.constant dense<0.000000e+00> : vector<32x64xf32>
    %2 = tpu.matmul %0, %1, %cst {dimension_numbers = #tpu.dot_dimension_numbers<[1], [0], [0], [1], [0, 0, 1, 1], [], []>} : vector<32x288xbf16>, vector<288x64xbf16>, vector<32x64xf32> -> vector<32x64xf32>
    %c0_3 = arith.constant 0 : index
    %c0_4 = arith.constant 0 : index
    %3 = vector.load %arg4[%c0_3, %c0_4] : memref<1x64xf32, #tpu.memory_space<vmem>>, vector<1x64xf32>
    %4 = vector.broadcast %3 : vector<1x64xf32> to vector<32x64xf32>
    %5 = arith.addf %2, %4 : vector<32x64xf32>
    %cst_5 = arith.constant 0.000000e+00 : f32
    %6 = vector.broadcast %cst_5 : f32 to vector<32x64xf32>
    %7 = arith.maximumf %5, %6 : vector<32x64xf32>
    %8 = arith.truncf %7 : vector<32x64xf32> to vector<32x64xbf16>
    %c0_6 = arith.constant 0 : index
    %c0_7 = arith.constant 0 : index
    %9 = vector.load %arg5[%c0_6, %c0_7] : memref<32x64xbf16, #tpu.memory_space<vmem>>, vector<32x64xbf16>
    tpu.vector_store %arg5[%c0_6, %c0_7], %8 {strides = array<i32>} : memref<32x64xbf16, #tpu.memory_space<vmem>>, vector<32x64xbf16>,
    return
  }
  func.func @transform_0(%arg0: i32, %arg1: i32) -> (i32, i32) {
    %c0_i32 = arith.constant 0 : i32
    %c0_i32_0 = arith.constant 0 : i32
    return %arg0, %c0_i32 : i32, i32
  }
  func.func @transform_1(%arg0: i32, %arg1: i32) -> (i32, i32) {
    %c0_i32 = arith.constant 0 : i32
    %c0_i32_0 = arith.constant 0 : i32
    return %c0_i32, %arg1 : i32, i32
  }
  func.func @transform_2(%arg0: i32, %arg1: i32) -> (i32, i32) {
    %c0_i32 = arith.constant 0 : i32
    %c0_i32_0 = arith.constant 0 : i32
    return %c0_i32, %arg1 : i32, i32
  }
  func.func @transform_3(%arg0: i32, %arg1: i32) -> (i32, i32) {
    %c0_i32 = arith.constant 0 : i32
    return %arg0, %arg1 : i32, i32
  }
}

module attributes {stable_mosaic.version = 11 : i64} {
  func.func @_mm_kernel(%arg0: i32, %arg1: i32, %arg2: memref<32x576xbf16, #tpu.memory_space<vmem>>, %arg3: memref<576x64xbf16, #tpu.memory_space<vmem>>, %arg4: memref<1x64xf32, #tpu.memory_space<vmem>>, %arg5: memref<32x64xbf16, #tpu.memory_space<vmem>>) attributes {dimension_semantics = [#tpu.dimension_semantics<parallel>, #tpu.dimension_semantics<parallel>], iteration_bounds = array<i64: 1, 1>, scalar_prefetch = 0 : i64, scratch_operands = 0 : i64, tpu.core_type = #tpu.core_type<tc>, window_params = [{transform_indices = @transform_0, window_bounds = array<i64: 32, 576>}, {transform_indices = @transform_1, window_bounds = array<i64: 576, 64>}, {transform_indices = @transform_2, window_bounds = array<i64: 1, 64>}, {transform_indices = @transform_3, window_bounds = array<i64: 32, 64>}]} {
    %c0 = arith.constant 0 : index
    %c0_0 = arith.constant 0 : index
    %0 = vector.load %arg2[%c0, %c0_0] : memref<32x576xbf16, #tpu.memory_space<vmem>>, vector<32x576xbf16>
    %c0_1 = arith.constant 0 : index
    %c0_2 = arith.constant 0 : index
    %1 = vector.load %arg3[%c0_1, %c0_2] : memref<576x64xbf16, #tpu.memory_space<vmem>>, vector<576x64xbf16>
    %cst = arith.constant dense<0.000000e+00> : vector<32x64xf32>
    %2 = tpu.matmul %0, %1, %cst {dimension_numbers = #tpu.dot_dimension_numbers<[1], [0], [0], [1], [0, 0, 1, 1], [], []>} : vector<32x576xbf16>, vector<576x64xbf16>, vector<32x64xf32> -> vector<32x64xf32>
    %c0_3 = arith.constant 0 : index
    %c0_4 = arith.constant 0 : index
    %3 = vector.load %arg4[%c0_3, %c0_4] : memref<1x64xf32, #tpu.memory_space<vmem>>, vector<1x64xf32>
    %4 = vector.broadcast %3 : vector<1x64xf32> to vector<32x64xf32>
    %5 = arith.addf %2, %4 : vector<32x64xf32>
    %cst_5 = arith.constant 0.000000e+00 : f32
    %6 = vector.broadcast %cst_5 : f32 to vector<32x64xf32>
    %7 = arith.maximumf %5, %6 : vector<32x64xf32>
    %8 = arith.truncf %7 : vector<32x64xf32> to vector<32x64xbf16>
    %c0_6 = arith.constant 0 : index
    %c0_7 = arith.constant 0 : index
    %9 = vector.load %arg5[%c0_6, %c0_7] : memref<32x64xbf16, #tpu.memory_space<vmem>>, vector<32x64xbf16>
    tpu.vector_store %arg5[%c0_6, %c0_7], %8 {strides = array<i32>} : memref<32x64xbf16, #tpu.memory_space<vmem>>, vector<32x64xbf16>,
    return
  }
  func.func @transform_0(%arg0: i32, %arg1: i32) -> (i32, i32) {
    %c0_i32 = arith.constant 0 : i32
    %c0_i32_0 = arith.constant 0 : i32
    return %arg0, %c0_i32 : i32, i32
  }
  func.func @transform_1(%arg0: i32, %arg1: i32) -> (i32, i32) {
    %c0_i32 = arith.constant 0 : i32
    %c0_i32_0 = arith.constant 0 : i32
    return %c0_i32, %arg1 : i32, i32
  }
  func.func @transform_2(%arg0: i32, %arg1: i32) -> (i32, i32) {
    %c0_i32 = arith.constant 0 : i32
    %c0_i32_0 = arith.constant 0 : i32
    return %c0_i32, %arg1 : i32, i32
  }
  func.func @transform_3(%arg0: i32, %arg1: i32) -> (i32, i32) {
    %c0_i32 = arith.constant 0 : i32
    return %arg0, %arg1 : i32, i32
  }
}

module attributes {stable_mosaic.version = 11 : i64} {
  func.func @_mm_kernel(%arg0: i32, %arg1: i32, %arg2: memref<32x64xbf16, #tpu.memory_space<vmem>>, %arg3: memref<64x128xbf16, #tpu.memory_space<vmem>>, %arg4: memref<1x128xf32, #tpu.memory_space<vmem>>, %arg5: memref<32x128xbf16, #tpu.memory_space<vmem>>) attributes {dimension_semantics = [#tpu.dimension_semantics<parallel>, #tpu.dimension_semantics<parallel>], iteration_bounds = array<i64: 1, 1>, scalar_prefetch = 0 : i64, scratch_operands = 0 : i64, tpu.core_type = #tpu.core_type<tc>, window_params = [{transform_indices = @transform_0, window_bounds = array<i64: 32, 64>}, {transform_indices = @transform_1, window_bounds = array<i64: 64, 128>}, {transform_indices = @transform_2, window_bounds = array<i64: 1, 128>}, {transform_indices = @transform_3, window_bounds = array<i64: 32, 128>}]} {
    %c0 = arith.constant 0 : index
    %c0_0 = arith.constant 0 : index
    %0 = vector.load %arg2[%c0, %c0_0] : memref<32x64xbf16, #tpu.memory_space<vmem>>, vector<32x64xbf16>
    %c0_1 = arith.constant 0 : index
    %c0_2 = arith.constant 0 : index
    %1 = vector.load %arg3[%c0_1, %c0_2] : memref<64x128xbf16, #tpu.memory_space<vmem>>, vector<64x128xbf16>
    %cst = arith.constant dense<0.000000e+00> : vector<32x128xf32>
    %2 = tpu.matmul %0, %1, %cst {dimension_numbers = #tpu.dot_dimension_numbers<[1], [0], [0], [1], [0, 0, 1, 1], [], []>} : vector<32x64xbf16>, vector<64x128xbf16>, vector<32x128xf32> -> vector<32x128xf32>
    %c0_3 = arith.constant 0 : index
    %c0_4 = arith.constant 0 : index
    %3 = vector.load %arg4[%c0_3, %c0_4] : memref<1x128xf32, #tpu.memory_space<vmem>>, vector<1x128xf32>
    %4 = vector.broadcast %3 : vector<1x128xf32> to vector<32x128xf32>
    %5 = arith.addf %2, %4 : vector<32x128xf32>
    %6 = arith.truncf %5 : vector<32x128xf32> to vector<32x128xbf16>
    %c0_5 = arith.constant 0 : index
    %c0_6 = arith.constant 0 : index
    %7 = vector.load %arg5[%c0_5, %c0_6] : memref<32x128xbf16, #tpu.memory_space<vmem>>, vector<32x128xbf16>
    tpu.vector_store %arg5[%c0_5, %c0_6], %6 {strides = array<i32>} : memref<32x128xbf16, #tpu.memory_space<vmem>>, vector<32x128xbf16>,
    return
  }
  func.func @transform_0(%arg0: i32, %arg1: i32) -> (i32, i32) {
    %c0_i32 = arith.constant 0 : i32
    %c0_i32_0 = arith.constant 0 : i32
    return %arg0, %c0_i32 : i32, i32
  }
  func.func @transform_1(%arg0: i32, %arg1: i32) -> (i32, i32) {
    %c0_i32 = arith.constant 0 : i32
    %c0_i32_0 = arith.constant 0 : i32
    return %c0_i32, %arg1 : i32, i32
  }
  func.func @transform_2(%arg0: i32, %arg1: i32) -> (i32, i32) {
    %c0_i32 = arith.constant 0 : i32
    %c0_i32_0 = arith.constant 0 : i32
    return %c0_i32, %arg1 : i32, i32
  }
  func.func @transform_3(%arg0: i32, %arg1: i32) -> (i32, i32) {
    %c0_i32 = arith.constant 0 : i32
    return %arg0, %arg1 : i32, i32
  }
}

module attributes {stable_mosaic.version = 11 : i64} {
  func.func @_mm_kernel(%arg0: i32, %arg1: i32, %arg2: memref<128x288xbf16, #tpu.memory_space<vmem>>, %arg3: memref<288x32xbf16, #tpu.memory_space<vmem>>, %arg4: memref<128x288xbf16, #tpu.memory_space<vmem>>, %arg5: memref<288x32xbf16, #tpu.memory_space<vmem>>, %arg6: memref<1x32xf32, #tpu.memory_space<vmem>>, %arg7: memref<128x32xbf16, #tpu.memory_space<vmem>>) attributes {dimension_semantics = [#tpu.dimension_semantics<parallel>, #tpu.dimension_semantics<parallel>], iteration_bounds = array<i64: 1, 1>, scalar_prefetch = 0 : i64, scratch_operands = 0 : i64, tpu.core_type = #tpu.core_type<tc>, window_params = [{transform_indices = @transform_0, window_bounds = array<i64: 128, 288>}, {transform_indices = @transform_1, window_bounds = array<i64: 288, 32>}, {transform_indices = @transform_2, window_bounds = array<i64: 128, 288>}, {transform_indices = @transform_3, window_bounds = array<i64: 288, 32>}, {transform_indices = @transform_4, window_bounds = array<i64: 1, 32>}, {transform_indices = @transform_5, window_bounds = array<i64: 128, 32>}]} {
    %c0 = arith.constant 0 : index
    %c0_0 = arith.constant 0 : index
    %0 = vector.load %arg2[%c0, %c0_0] : memref<128x288xbf16, #tpu.memory_space<vmem>>, vector<128x288xbf16>
    %c0_1 = arith.constant 0 : index
    %c0_2 = arith.constant 0 : index
    %1 = vector.load %arg3[%c0_1, %c0_2] : memref<288x32xbf16, #tpu.memory_space<vmem>>, vector<288x32xbf16>
    %cst = arith.constant dense<0.000000e+00> : vector<128x32xf32>
    %2 = tpu.matmul %0, %1, %cst {dimension_numbers = #tpu.dot_dimension_numbers<[1], [0], [0], [1], [0, 0, 1, 1], [], []>} : vector<128x288xbf16>, vector<288x32xbf16>, vector<128x32xf32> -> vector<128x32xf32>
    %c0_3 = arith.constant 0 : index
    %c0_4 = arith.constant 0 : index
    %3 = vector.load %arg4[%c0_3, %c0_4] : memref<128x288xbf16, #tpu.memory_space<vmem>>, vector<128x288xbf16>
    %c0_5 = arith.constant 0 : index
    %c0_6 = arith.constant 0 : index
    %4 = vector.load %arg5[%c0_5, %c0_6] : memref<288x32xbf16, #tpu.memory_space<vmem>>, vector<288x32xbf16>
    %cst_7 = arith.constant dense<0.000000e+00> : vector<128x32xf32>
    %5 = tpu.matmul %3, %4, %cst_7 {dimension_numbers = #tpu.dot_dimension_numbers<[1], [0], [0], [1], [0, 0, 1, 1], [], []>} : vector<128x288xbf16>, vector<288x32xbf16>, vector<128x32xf32> -> vector<128x32xf32>
    %6 = arith.addf %2, %5 : vector<128x32xf32>
    %c0_8 = arith.constant 0 : index
    %c0_9 = arith.constant 0 : index
    %7 = vector.load %arg6[%c0_8, %c0_9] : memref<1x32xf32, #tpu.memory_space<vmem>>, vector<1x32xf32>
    %8 = vector.broadcast %7 : vector<1x32xf32> to vector<128x32xf32>
    %9 = arith.addf %6, %8 : vector<128x32xf32>
    %cst_10 = arith.constant 0.000000e+00 : f32
    %10 = vector.broadcast %cst_10 : f32 to vector<128x32xf32>
    %11 = arith.maximumf %9, %10 : vector<128x32xf32>
    %12 = arith.truncf %11 : vector<128x32xf32> to vector<128x32xbf16>
    %c0_11 = arith.constant 0 : index
    %c0_12 = arith.constant 0 : index
    %13 = vector.load %arg7[%c0_11, %c0_12] : memref<128x32xbf16, #tpu.memory_space<vmem>>, vector<128x32xbf16>
    tpu.vector_store %arg7[%c0_11, %c0_12], %12 {strides = array<i32>} : memref<128x32xbf16, #tpu.memory_space<vmem>>, vector<128x32xbf16>,
    return
  }
  func.func @transform_0(%arg0: i32, %arg1: i32) -> (i32, i32) {
    %c0_i32 = arith.constant 0 : i32
    %c0_i32_0 = arith.constant 0 : i32
    return %arg0, %c0_i32 : i32, i32
  }
  func.func @transform_1(%arg0: i32, %arg1: i32) -> (i32, i32) {
    %c0_i32 = arith.constant 0 : i32
    %c0_i32_0 = arith.constant 0 : i32
    return %c0_i32, %arg1 : i32, i32
  }
  func.func @transform_2(%arg0: i32, %arg1: i32) -> (i32, i32) {
    %c0_i32 = arith.constant 0 : i32
    %c0_i32_0 = arith.constant 0 : i32
    return %arg0, %c0_i32 : i32, i32
  }
  func.func @transform_3(%arg0: i32, %arg1: i32) -> (i32, i32) {
    %c0_i32 = arith.constant 0 : i32
    %c0_i32_0 = arith.constant 0 : i32
    return %c0_i32, %arg1 : i32, i32
  }
  func.func @transform_4(%arg0: i32, %arg1: i32) -> (i32, i32) {
    %c0_i32 = arith.constant 0 : i32
    %c0_i32_0 = arith.constant 0 : i32
    return %c0_i32, %arg1 : i32, i32
  }
  func.func @transform_5(%arg0: i32, %arg1: i32) -> (i32, i32) {
    %c0_i32 = arith.constant 0 : i32
    return %arg0, %arg1 : i32, i32
  }
}

module attributes {stable_mosaic.version = 11 : i64} {
  func.func @_mm_kernel(%arg0: i32, %arg1: i32, %arg2: memref<128x32xbf16, #tpu.memory_space<vmem>>, %arg3: memref<32x64xbf16, #tpu.memory_space<vmem>>, %arg4: memref<1x64xf32, #tpu.memory_space<vmem>>, %arg5: memref<128x64xbf16, #tpu.memory_space<vmem>>) attributes {dimension_semantics = [#tpu.dimension_semantics<parallel>, #tpu.dimension_semantics<parallel>], iteration_bounds = array<i64: 1, 1>, scalar_prefetch = 0 : i64, scratch_operands = 0 : i64, tpu.core_type = #tpu.core_type<tc>, window_params = [{transform_indices = @transform_0, window_bounds = array<i64: 128, 32>}, {transform_indices = @transform_1, window_bounds = array<i64: 32, 64>}, {transform_indices = @transform_2, window_bounds = array<i64: 1, 64>}, {transform_indices = @transform_3, window_bounds = array<i64: 128, 64>}]} {
    %c0 = arith.constant 0 : index
    %c0_0 = arith.constant 0 : index
    %0 = vector.load %arg2[%c0, %c0_0] : memref<128x32xbf16, #tpu.memory_space<vmem>>, vector<128x32xbf16>
    %c0_1 = arith.constant 0 : index
    %c0_2 = arith.constant 0 : index
    %1 = vector.load %arg3[%c0_1, %c0_2] : memref<32x64xbf16, #tpu.memory_space<vmem>>, vector<32x64xbf16>
    %cst = arith.constant dense<0.000000e+00> : vector<128x64xf32>
    %2 = tpu.matmul %0, %1, %cst {dimension_numbers = #tpu.dot_dimension_numbers<[1], [0], [0], [1], [0, 0, 1, 1], [], []>} : vector<128x32xbf16>, vector<32x64xbf16>, vector<128x64xf32> -> vector<128x64xf32>
    %c0_3 = arith.constant 0 : index
    %c0_4 = arith.constant 0 : index
    %3 = vector.load %arg4[%c0_3, %c0_4] : memref<1x64xf32, #tpu.memory_space<vmem>>, vector<1x64xf32>
    %4 = vector.broadcast %3 : vector<1x64xf32> to vector<128x64xf32>
    %5 = arith.addf %2, %4 : vector<128x64xf32>
    %6 = arith.truncf %5 : vector<128x64xf32> to vector<128x64xbf16>
    %c0_5 = arith.constant 0 : index
    %c0_6 = arith.constant 0 : index
    %7 = vector.load %arg5[%c0_5, %c0_6] : memref<128x64xbf16, #tpu.memory_space<vmem>>, vector<128x64xbf16>
    tpu.vector_store %arg5[%c0_5, %c0_6], %6 {strides = array<i32>} : memref<128x64xbf16, #tpu.memory_space<vmem>>, vector<128x64xbf16>,
    return
  }
  func.func @transform_0(%arg0: i32, %arg1: i32) -> (i32, i32) {
    %c0_i32 = arith.constant 0 : i32
    %c0_i32_0 = arith.constant 0 : i32
    return %arg0, %c0_i32 : i32, i32
  }
  func.func @transform_1(%arg0: i32, %arg1: i32) -> (i32, i32) {
    %c0_i32 = arith.constant 0 : i32
    %c0_i32_0 = arith.constant 0 : i32
    return %c0_i32, %arg1 : i32, i32
  }
  func.func @transform_2(%arg0: i32, %arg1: i32) -> (i32, i32) {
    %c0_i32 = arith.constant 0 : i32
    %c0_i32_0 = arith.constant 0 : i32
    return %c0_i32, %arg1 : i32, i32
  }
  func.func @transform_3(%arg0: i32, %arg1: i32) -> (i32, i32) {
    %c0_i32 = arith.constant 0 : i32
    return %arg0, %arg1 : i32, i32
  }
}

module attributes {stable_mosaic.version = 11 : i64} {
  func.func @_mm_kernel(%arg0: i32, %arg1: i32, %arg2: memref<256x144xbf16, #tpu.memory_space<vmem>>, %arg3: memref<144x16xbf16, #tpu.memory_space<vmem>>, %arg4: memref<256x144xbf16, #tpu.memory_space<vmem>>, %arg5: memref<144x16xbf16, #tpu.memory_space<vmem>>, %arg6: memref<1x16xf32, #tpu.memory_space<vmem>>, %arg7: memref<256x16xbf16, #tpu.memory_space<vmem>>) attributes {dimension_semantics = [#tpu.dimension_semantics<parallel>, #tpu.dimension_semantics<parallel>], iteration_bounds = array<i64: 2, 1>, scalar_prefetch = 0 : i64, scratch_operands = 0 : i64, tpu.core_type = #tpu.core_type<tc>, window_params = [{transform_indices = @transform_0, window_bounds = array<i64: 256, 144>}, {transform_indices = @transform_1, window_bounds = array<i64: 144, 16>}, {transform_indices = @transform_2, window_bounds = array<i64: 256, 144>}, {transform_indices = @transform_3, window_bounds = array<i64: 144, 16>}, {transform_indices = @transform_4, window_bounds = array<i64: 1, 16>}, {transform_indices = @transform_5, window_bounds = array<i64: 256, 16>}]} {
    %c0 = arith.constant 0 : index
    %c0_0 = arith.constant 0 : index
    %0 = vector.load %arg2[%c0, %c0_0] : memref<256x144xbf16, #tpu.memory_space<vmem>>, vector<256x144xbf16>
    %c0_1 = arith.constant 0 : index
    %c0_2 = arith.constant 0 : index
    %1 = vector.load %arg3[%c0_1, %c0_2] : memref<144x16xbf16, #tpu.memory_space<vmem>>, vector<144x16xbf16>
    %cst = arith.constant dense<0.000000e+00> : vector<256x16xf32>
    %2 = tpu.matmul %0, %1, %cst {dimension_numbers = #tpu.dot_dimension_numbers<[1], [0], [0], [1], [0, 0, 1, 1], [], []>} : vector<256x144xbf16>, vector<144x16xbf16>, vector<256x16xf32> -> vector<256x16xf32>
    %c0_3 = arith.constant 0 : index
    %c0_4 = arith.constant 0 : index
    %3 = vector.load %arg4[%c0_3, %c0_4] : memref<256x144xbf16, #tpu.memory_space<vmem>>, vector<256x144xbf16>
    %c0_5 = arith.constant 0 : index
    %c0_6 = arith.constant 0 : index
    %4 = vector.load %arg5[%c0_5, %c0_6] : memref<144x16xbf16, #tpu.memory_space<vmem>>, vector<144x16xbf16>
    %cst_7 = arith.constant dense<0.000000e+00> : vector<256x16xf32>
    %5 = tpu.matmul %3, %4, %cst_7 {dimension_numbers = #tpu.dot_dimension_numbers<[1], [0], [0], [1], [0, 0, 1, 1], [], []>} : vector<256x144xbf16>, vector<144x16xbf16>, vector<256x16xf32> -> vector<256x16xf32>
    %6 = arith.addf %2, %5 : vector<256x16xf32>
    %c0_8 = arith.constant 0 : index
    %c0_9 = arith.constant 0 : index
    %7 = vector.load %arg6[%c0_8, %c0_9] : memref<1x16xf32, #tpu.memory_space<vmem>>, vector<1x16xf32>
    %8 = vector.broadcast %7 : vector<1x16xf32> to vector<256x16xf32>
    %9 = arith.addf %6, %8 : vector<256x16xf32>
    %cst_10 = arith.constant 0.000000e+00 : f32
    %10 = vector.broadcast %cst_10 : f32 to vector<256x16xf32>
    %11 = arith.maximumf %9, %10 : vector<256x16xf32>
    %12 = arith.truncf %11 : vector<256x16xf32> to vector<256x16xbf16>
    %c0_11 = arith.constant 0 : index
    %c0_12 = arith.constant 0 : index
    %13 = vector.load %arg7[%c0_11, %c0_12] : memref<256x16xbf16, #tpu.memory_space<vmem>>, vector<256x16xbf16>
    tpu.vector_store %arg7[%c0_11, %c0_12], %12 {strides = array<i32>} : memref<256x16xbf16, #tpu.memory_space<vmem>>, vector<256x16xbf16>,
    return
  }
  func.func @transform_0(%arg0: i32, %arg1: i32) -> (i32, i32) {
    %c0_i32 = arith.constant 0 : i32
    %c0_i32_0 = arith.constant 0 : i32
    return %arg0, %c0_i32 : i32, i32
  }
  func.func @transform_1(%arg0: i32, %arg1: i32) -> (i32, i32) {
    %c0_i32 = arith.constant 0 : i32
    %c0_i32_0 = arith.constant 0 : i32
    return %c0_i32, %arg1 : i32, i32
  }
  func.func @transform_2(%arg0: i32, %arg1: i32) -> (i32, i32) {
    %c0_i32 = arith.constant 0 : i32
    %c0_i32_0 = arith.constant 0 : i32
    return %arg0, %c0_i32 : i32, i32
  }
  func.func @transform_3(%arg0: i32, %arg1: i32) -> (i32, i32) {
    %c0_i32 = arith.constant 0 : i32
    %c0_i32_0 = arith.constant 0 : i32
    return %c0_i32, %arg1 : i32, i32
  }
  func.func @transform_4(%arg0: i32, %arg1: i32) -> (i32, i32) {
    %c0_i32 = arith.constant 0 : i32
    %c0_i32_0 = arith.constant 0 : i32
    return %c0_i32, %arg1 : i32, i32
  }
  func.func @transform_5(%arg0: i32, %arg1: i32) -> (i32, i32) {
    %c0_i32 = arith.constant 0 : i32
    return %arg0, %arg1 : i32, i32
  }
}

module attributes {stable_mosaic.version = 11 : i64} {
  func.func @_mm_kernel(%arg0: i32, %arg1: i32, %arg2: memref<256x16xbf16, #tpu.memory_space<vmem>>, %arg3: memref<16x1xbf16, #tpu.memory_space<vmem>>, %arg4: memref<1x1xf32, #tpu.memory_space<vmem>>, %arg5: memref<256x1xf32, #tpu.memory_space<vmem>>) attributes {dimension_semantics = [#tpu.dimension_semantics<parallel>, #tpu.dimension_semantics<parallel>], iteration_bounds = array<i64: 2, 1>, scalar_prefetch = 0 : i64, scratch_operands = 0 : i64, tpu.core_type = #tpu.core_type<tc>, window_params = [{transform_indices = @transform_0, window_bounds = array<i64: 256, 16>}, {transform_indices = @transform_1, window_bounds = array<i64: 16, 1>}, {transform_indices = @transform_2, window_bounds = array<i64: 1, 1>}, {transform_indices = @transform_3, window_bounds = array<i64: 256, 1>}]} {
    %c0 = arith.constant 0 : index
    %c0_0 = arith.constant 0 : index
    %0 = vector.load %arg2[%c0, %c0_0] : memref<256x16xbf16, #tpu.memory_space<vmem>>, vector<256x16xbf16>
    %c0_1 = arith.constant 0 : index
    %c0_2 = arith.constant 0 : index
    %1 = vector.load %arg3[%c0_1, %c0_2] : memref<16x1xbf16, #tpu.memory_space<vmem>>, vector<16x1xbf16>
    %cst = arith.constant dense<0.000000e+00> : vector<256x1xf32>
    %2 = tpu.matmul %0, %1, %cst {dimension_numbers = #tpu.dot_dimension_numbers<[1], [0], [0], [1], [0, 0, 1, 1], [], []>} : vector<256x16xbf16>, vector<16x1xbf16>, vector<256x1xf32> -> vector<256x1xf32>
    %c0_3 = arith.constant 0 : index
    %c0_4 = arith.constant 0 : index
    %3 = vector.load %arg4[%c0_3, %c0_4] : memref<1x1xf32, #tpu.memory_space<vmem>>, vector<1x1xf32>
    %4 = vector.broadcast %3 : vector<1x1xf32> to vector<256x1xf32>
    %5 = arith.addf %2, %4 : vector<256x1xf32>
    %cst_5 = arith.constant 0.000000e+00 : f32
    %6 = vector.broadcast %cst_5 : f32 to vector<256x1xf32>
    %7 = arith.subf %6, %5 : vector<256x1xf32>
    %8 = math.exp %7 : vector<256x1xf32>
    %cst_6 = arith.constant 1.000000e+00 : f32
    %9 = vector.broadcast %cst_6 : f32 to vector<256x1xf32>
    %10 = arith.addf %9, %8 : vector<256x1xf32>
    %11 = tpu.reciprocal %10 {approx = true} : vector<256x1xf32> -> vector<256x1xf32>
    %cst_7 = arith.constant 1.000000e+00 : f32
    %12 = vector.broadcast %cst_7 : f32 to vector<256x1xf32>
    %13 = arith.minimumf %11, %12 : vector<256x1xf32>
    %c0_8 = arith.constant 0 : index
    %c0_9 = arith.constant 0 : index
    %14 = vector.load %arg5[%c0_8, %c0_9] : memref<256x1xf32, #tpu.memory_space<vmem>>, vector<256x1xf32>
    tpu.vector_store %arg5[%c0_8, %c0_9], %13 {strides = array<i32>} : memref<256x1xf32, #tpu.memory_space<vmem>>, vector<256x1xf32>,
    return
  }
  func.func @transform_0(%arg0: i32, %arg1: i32) -> (i32, i32) {
    %c0_i32 = arith.constant 0 : i32
    %c0_i32_0 = arith.constant 0 : i32
    return %arg0, %c0_i32 : i32, i32
  }
  func.func @transform_1(%arg0: i32, %arg1: i32) -> (i32, i32) {
    %c0_i32 = arith.constant 0 : i32
    %c0_i32_0 = arith.constant 0 : i32
    return %c0_i32, %arg1 : i32, i32
  }
  func.func @transform_2(%arg0: i32, %arg1: i32) -> (i32, i32) {
    %c0_i32 = arith.constant 0 : i32
    %c0_i32_0 = arith.constant 0 : i32
    return %c0_i32, %arg1 : i32, i32
  }
  func.func @transform_3(%arg0: i32, %arg1: i32) -> (i32, i32) {
    %c0_i32 = arith.constant 0 : i32
    return %arg0, %arg1 : i32, i32
  }
}

</mosaic_0001>

<bundles_post_ra>
// kernel: unet_forward.13
= control target key start
LH: loop header
LB: loop body
LE: loop exit
PB: predicated region body
PF: predicated region fallthrough
CT: control target
= control target key end

     0   :  { %s1130_s12 = smov 0   ;;  %s1132_s13 = smov 0   ;;  %s1313_s0 = inlined_call_operand.vmem [shape: bf16[512,27], index: 0, kind: input, shape index: {}]   ;;  %s1314_s1 = inlined_call_operand.vmem [shape: bf16[27,16], index: 1, kind: input, shape index: {}]   ;;  %s1315_s2 = inlined_call_operand.vmem [shape: f32[1,16], index: 2, kind: input, shape index: {}]   ;;  %s1316_s3 = inlined_call_operand.vmem [shape: bf16[512,16], index: 3, kind: output, shape index: {}]  }
   0x1   :  { %s1134_s14 = smov 0  }
   0x2 LB: > { %s25_s15 = sadd.s32 1, %s1103_s13  ;;  %p878_p0 = scmp.ge.s32.totalorder %s1107_s14, 1  ;;  %s1107_s14 = sphi %s1134_s14, %s13_s14   ;;  %s1103_s13 = sphi %s1132_s13, %s1318_s13   ;;  %s1099_s12 = sphi %s1130_s12, %s1317_s12  }
   0x3   : > { %p27_p1 = scmp.ge.s32.totalorder %s25_s15, 2  ;;  %p169_p2 = scmp.lt.s32.totalorder %s1107_s14, 3 }
   0x5   : > { %s1320_s15 = smov (%p27_p1, %s25_s15), 0  ;;  %p170_p3 = pnand %p878_p0, %p169_p2 }
   0x6   : > { %v1067_v0 = vld [vmem:[%s1314_s1] sm:$0xff] (!%p170_p3)   ;;  %vm409_vm0 = vcmask (!%p170_p3), 1044480   ;;  %v1068_v1 = vld [vmem:[%s1314_s1 + $0x8] sm:$0x3f] (!%p170_p3)   ;;  %vm410_vm1 = vcmask (!%p170_p3), 1045504   ;;  %s879_s20 = sshll.u32 (!%p170_p3), %s1099_s12, 5 }
   0x7   : > { %173 = sbr.rel (%p170_p3) target bundleno = 266 (0x10a), region = 32  ;;  %1002 = vmatprep.subr.bf16.mxu0 (!%p170_p3), %v1067_v0  ;;  %1038 = vmatprep.subr.bf16.mxu1 (!%p170_p3), %v1067_v0  ;;  %v1109_v2 = vmov (!%p170_p3), 65535   ;;  %p204_p4 = scmp.lt.s32.totalorder (!%p170_p3), %s879_s20, 63  ;;  %vm360_vm2 = vcmask (!%p170_p3), 220160   ;;  %v1199_v22 = vld [vmem:[%s1315_s2] ss:$0 sm:$0xff] (!%p170_p3) }
   0x8   : > { %1003 = vmatpush3.bf16.msra.mxu0 (!%p170_p3), %v1067_v0  ;;  %1040 = vmatpush3.bf16.msra.mxu1 (!%p170_p3), %v1067_v0  ;;  %v411_v3 = vsel (!%p170_p3), %vm409_vm0, 4294967295, %v1109_v2  ;;  %vm737_vm3 = vcmask (!%p170_p3), 125952  }
   0x9   : > { %v412_v4 = vsel (!%p170_p3), %vm410_vm1, %v411_v3, 0 }
   0xa   : > { %v414_v5 = vand.u32 (!%p170_p3), %v1068_v1, %v412_v4 }
   0xc   : > { %1004 = vmatprep.subr.bf16.mxu0 (!%p170_p3), %v414_v5  ;;  %1039 = vmatprep.subr.bf16.mxu1 (!%p170_p3), %v414_v5 }
   0xd   : > { %1005 = vmatpush3.bf16.msra.mxu0 (!%p170_p3), %v414_v5  ;;  %1041 = vmatpush3.bf16.msra.mxu1 (!%p170_p3), %v414_v5 }
   0xe   : > { %s1322_s20 = smov (!%p204_p4, %s879_s20), 63 }
   0xf   : > { %s880_s21 = sshll.u32 %s1322_s20, 2 }
  0x10   : > { %s1162_s24 = scalar_lea.vmem %s1313_s0, %s880_s21  ;;  %s1211_s29 = scalar_lea.vmem %s1316_s3, %s880_s21 }
  0x11   : > { %v1069_v6 = vld [vmem:[%s1162_s24] sm:$0xff]   ;;  %v1071_v8 = vld [vmem:[%s1162_s24 + $0x8] sm:$0xff]   ;;  %v1073_v10 = vld [vmem:[%s1162_s24 + $0x10] sm:$0xff]  }
  0x12   : > { %v1070_v7 = vld [vmem:[%s1162_s24 + $0x40] sm:$0xff]   ;;  %1006 = vmatprep.mubr.msk.bf16.mxu0 %vm360_vm2, %v1069_v6  ;;  %v1072_v9 = vld [vmem:[%s1162_s24 + $0x48] sm:$0xff]   ;;  %v1074_v11 = vld [vmem:[%s1162_s24 + $0x50] sm:$0xff]  }
  0x13   : > { %1022 = vmatprep.mubr.msk.bf16.mxu1 %vm360_vm2, %v1070_v7  ;;  %1007 = vmatmul.mubr.msk.bf16.vlgmr.msra.gmra.mrb[0].mxu0 %vm360_vm2, %v1071_v8  ;;  %v1075_v12 = vld [vmem:[%s1162_s24 + $0x18] sm:$0xff]   ;;  %v1077_v14 = vld [vmem:[%s1162_s24 + $0x20] sm:$0xff]   ;;  %v1079_v16 = vld [vmem:[%s1162_s24 + $0x28] sm:$0xff]  }
  0x14   : > { %1023 = vmatmul.mubr.msk.bf16.vlgmr.msra.gmra.mrb[0].mxu1 %vm360_vm2, %v1072_v9  ;;  %1010 = vmatprep.mubr.msk.bf16.mxu0 %vm360_vm2, %v1073_v10  ;;  %v1076_v13 = vld [vmem:[%s1162_s24 + $0x58] sm:$0xff]   ;;  %v1078_v15 = vld [vmem:[%s1162_s24 + $0x60] sm:$0xff]   ;;  %v1080_v17 = vld [vmem:[%s1162_s24 + $0x68] sm:$0xff]  }
  0x15   : > { %1026 = vmatprep.mubr.msk.bf16.mxu1 %vm360_vm2, %v1074_v11  ;;  %v1081_v18 = vld [vmem:[%s1162_s24 + $0x30] sm:$0xff]   ;;  %v1083_v20 = vld [vmem:[%s1162_s24 + $0x38] sm:$0xff]  }
  0x16   : > { %v1082_v19 = vld [vmem:[%s1162_s24 + $0x70] sm:$0xff]   ;;  %v1084_v21 = vld [vmem:[%s1162_s24 + $0x78] sm:$0xff]  }
  0x1b   : > { %1011 = vmatmul.mubr.msk.bf16.gmra.mrb[4].mxu0 %vm360_vm2, %v1075_v12 }
  0x1c   : > { %1027 = vmatmul.mubr.msk.bf16.gmra.mrb[4].mxu1 %vm360_vm2, %v1076_v13  ;;  %1014 = vmatprep.mubr.msk.bf16.mxu0 %vm360_vm2, %v1077_v14 }
  0x1d   : > { %1030 = vmatprep.mubr.msk.bf16.mxu1 %vm360_vm2, %v1078_v15 }
  0x23   : > { %1015 = vmatmul.mubr.msk.bf16.gmra.mrb[8].mxu0 %vm360_vm2, %v1079_v16 }
  0x24   : > { %1031 = vmatmul.mubr.msk.bf16.gmra.mrb[8].mxu1 %vm360_vm2, %v1080_v17  ;;  %1018 = vmatprep.mubr.msk.bf16.mxu0 %vm360_vm2, %v1081_v18 }
  0x25   : > { %1034 = vmatprep.mubr.msk.bf16.mxu1 %vm360_vm2, %v1082_v19 }
  0x2b   : > { %1019 = vmatmul.mubr.msk.bf16.gmra.mrb[12].mxu0 %vm360_vm2, %v1083_v20 }
  0x2c   : > { %1035 = vmatmul.mubr.msk.bf16.gmra.mrb[12].mxu1 %vm360_vm2, %v1084_v21 }
  0xe6   : > { %v1008_v23 = vpop.f32.mrb[0].mxu0 }
  0xe7   : > { %v459_v24 = vadd.f32 %v1008_v23, %v1199_v22  ;;  %v1024_v25 = vpop.f32.mrb[0].mxu1  ;;  %v450_v26 = vpop.f32.mrb[1].mxu0 }
  0xe8   : > { %v523_v27 = vadd.f32 %v1024_v25, %v1199_v22  ;;  %v451_v28 = vadd.f32 %v1199_v22, %v450_v26  ;;  %v514_v29 = vpop.f32.mrb[1].mxu1  ;;  %v1009_v30 = vpop.f32.mrb[2].mxu0 }
  0xe9   : > { %v579_v31 = vmax.f32 %v459_v24, 0.0  ;;  %v515_v32 = vadd.f32 %v1199_v22, %v514_v29  ;;  %v462_v33 = vadd.f32 %v1009_v30, %v1199_v22  ;;  %v1025_v34 = vpop.f32.mrb[2].mxu1  ;;  %v453_v35 = vpop.f32.mrb[3].mxu0 }
  0xea   : > { %v595_v36 = vmax.f32 %v523_v27, 0.0  ;;  %v577_v37 = vmax.f32 %v451_v28, 0.0  ;;  %v526_v38 = vadd.f32 %v1025_v34, %v1199_v22  ;;  %v454_v39 = vadd.f32 %v1199_v22, %v453_v35  ;;  %v517_v40 = vpop.f32.mrb[3].mxu1 }
  0xeb   : > { %v954_v41 = vpack.c.bf16 %v579_v31, %v579_v31  ;;  %v593_v42 = vmax.f32 %v515_v32, 0.0  ;;  %v580_v43 = vmax.f32 %v462_v33, 0.0  ;;  %v518_v44 = vadd.f32 %v1199_v22, %v517_v40 }
  0xec   : > { %v970_v45 = vpack.c.bf16 %v595_v36, %v595_v36  ;;  %v952_v46 = vpack.c.bf16 %v577_v37, %v577_v37  ;;  %v596_v47 = vmax.f32 %v526_v38, 0.0  ;;  %v578_v48 = vmax.f32 %v454_v39, 0.0 }
  0xed   : > { %740 = vst.msk [vmem:[%s1211_s29 + $0x8] sm:$0xf] %vm737_vm3, %v954_v41  ;;  %v968_v49 = vpack.c.bf16 %v593_v42, %v593_v42  ;;  %v955_v50 = vpack.c.bf16 %v580_v43, %v580_v43  ;;  %v594_v51 = vmax.f32 %v518_v44, 0.0 }
  0xee   : > { %756 = vst.msk [vmem:[%s1211_s29 + $0x48] sm:$0xf] %vm737_vm3, %v970_v45  ;;  %738 = vst.msk [vmem:[%s1211_s29] sm:$0xf] %vm737_vm3, %v952_v46  ;;  %v971_v52 = vpack.c.bf16 %v596_v47, %v596_v47  ;;  %v953_v53 = vpack.c.bf16 %v578_v48, %v578_v48  ;;  %v1012_v54 = vpop.f32.mrb[4].mxu0 }
  0xef   : > { %754 = vst.msk [vmem:[%s1211_s29 + $0x40] sm:$0xf] %vm737_vm3, %v968_v49  ;;  %741 = vst.msk [vmem:[%s1211_s29 + $0xc] sm:$0xf] %vm737_vm3, %v955_v50  ;;  %v969_v55 = vpack.c.bf16 %v594_v51, %v594_v51  ;;  %v475_v56 = vadd.f32 %v1012_v54, %v1199_v22  ;;  %v1028_v57 = vpop.f32.mrb[4].mxu1  ;;  %v466_v58 = vpop.f32.mrb[5].mxu0 }
  0xf0   : > { %757 = vst.msk [vmem:[%s1211_s29 + $0x4c] sm:$0xf] %vm737_vm3, %v971_v52  ;;  %739 = vst.msk [vmem:[%s1211_s29 + $0x4] sm:$0xf] %vm737_vm3, %v953_v53  ;;  %v539_v59 = vadd.f32 %v1028_v57, %v1199_v22  ;;  %v467_v60 = vadd.f32 %v1199_v22, %v466_v58  ;;  %v530_v61 = vpop.f32.mrb[5].mxu1  ;;  %v1013_v62 = vpop.f32.mrb[6].mxu0 }
  0xf1   : > { %755 = vst.msk [vmem:[%s1211_s29 + $0x44] sm:$0xf] %vm737_vm3, %v969_v55  ;;  %v583_v63 = vmax.f32 %v475_v56, 0.0  ;;  %v531_v0 = vadd.f32 %v1199_v22, %v530_v61  ;;  %v478_v1 = vadd.f32 %v1013_v62, %v1199_v22  ;;  %v1029_v2 = vpop.f32.mrb[6].mxu1  ;;  %v469_v3 = vpop.f32.mrb[7].mxu0 }
  0xf2   : > { %v599_v4 = vmax.f32 %v539_v59, 0.0  ;;  %v581_v5 = vmax.f32 %v467_v60, 0.0  ;;  %v542_v6 = vadd.f32 %v1029_v2, %v1199_v22  ;;  %v470_v7 = vadd.f32 %v1199_v22, %v469_v3  ;;  %v533_v8 = vpop.f32.mrb[7].mxu1 }
  0xf3   : > { %v958_v9 = vpack.c.bf16 %v583_v63, %v583_v63  ;;  %v597_v10 = vmax.f32 %v531_v0, 0.0  ;;  %v584_v11 = vmax.f32 %v478_v1, 0.0  ;;  %v534_v12 = vadd.f32 %v1199_v22, %v533_v8 }
  0xf4   : > { %v974_v13 = vpack.c.bf16 %v599_v4, %v599_v4  ;;  %v956_v14 = vpack.c.bf16 %v581_v5, %v581_v5  ;;  %v600_v15 = vmax.f32 %v542_v6, 0.0  ;;  %v582_v16 = vmax.f32 %v470_v7, 0.0 }
  0xf5   : > { %744 = vst.msk [vmem:[%s1211_s29 + $0x18] sm:$0xf] %vm737_vm3, %v958_v9  ;;  %v972_v17 = vpack.c.bf16 %v597_v10, %v597_v10  ;;  %v959_v18 = vpack.c.bf16 %v584_v11, %v584_v11  ;;  %v598_v19 = vmax.f32 %v534_v12, 0.0 }
  0xf6   : > { %760 = vst.msk [vmem:[%s1211_s29 + $0x58] sm:$0xf] %vm737_vm3, %v974_v13  ;;  %742 = vst.msk [vmem:[%s1211_s29 + $0x10] sm:$0xf] %vm737_vm3, %v956_v14  ;;  %v975_v20 = vpack.c.bf16 %v600_v15, %v600_v15  ;;  %v957_v21 = vpack.c.bf16 %v582_v16, %v582_v16  ;;  %v1016_v23 = vpop.f32.mrb[8].mxu0 }
  0xf7   : > { %758 = vst.msk [vmem:[%s1211_s29 + $0x50] sm:$0xf] %vm737_vm3, %v972_v17  ;;  %745 = vst.msk [vmem:[%s1211_s29 + $0x1c] sm:$0xf] %vm737_vm3, %v959_v18  ;;  %v973_v24 = vpack.c.bf16 %v598_v19, %v598_v19  ;;  %v491_v25 = vadd.f32 %v1016_v23, %v1199_v22  ;;  %v1032_v26 = vpop.f32.mrb[8].mxu1  ;;  %v482_v27 = vpop.f32.mrb[9].mxu0 }
  0xf8   : > { %761 = vst.msk [vmem:[%s1211_s29 + $0x5c] sm:$0xf] %vm737_vm3, %v975_v20  ;;  %743 = vst.msk [vmem:[%s1211_s29 + $0x14] sm:$0xf] %vm737_vm3, %v957_v21  ;;  %v555_v28 = vadd.f32 %v1032_v26, %v1199_v22  ;;  %v483_v29 = vadd.f32 %v1199_v22, %v482_v27  ;;  %v546_v30 = vpop.f32.mrb[9].mxu1  ;;  %v1017_v31 = vpop.f32.mrb[10].mxu0 }
  0xf9   : > { %759 = vst.msk [vmem:[%s1211_s29 + $0x54] sm:$0xf] %vm737_vm3, %v973_v24  ;;  %v587_v32 = vmax.f32 %v491_v25, 0.0  ;;  %v547_v33 = vadd.f32 %v1199_v22, %v546_v30  ;;  %v494_v34 = vadd.f32 %v1017_v31, %v1199_v22  ;;  %v1033_v35 = vpop.f32.mrb[10].mxu1  ;;  %v485_v36 = vpop.f32.mrb[11].mxu0 }
  0xfa   : > { %v603_v37 = vmax.f32 %v555_v28, 0.0  ;;  %v585_v38 = vmax.f32 %v483_v29, 0.0  ;;  %v558_v39 = vadd.f32 %v1033_v35, %v1199_v22  ;;  %v486_v40 = vadd.f32 %v1199_v22, %v485_v36  ;;  %v549_v41 = vpop.f32.mrb[11].mxu1 }
  0xfb   : > { %v962_v42 = vpack.c.bf16 %v587_v32, %v587_v32  ;;  %v601_v43 = vmax.f32 %v547_v33, 0.0  ;;  %v588_v44 = vmax.f32 %v494_v34, 0.0  ;;  %v550_v45 = vadd.f32 %v1199_v22, %v549_v41 }
  0xfc   : > { %v978_v46 = vpack.c.bf16 %v603_v37, %v603_v37  ;;  %v960_v47 = vpack.c.bf16 %v585_v38, %v585_v38  ;;  %v604_v48 = vmax.f32 %v558_v39, 0.0  ;;  %v586_v49 = vmax.f32 %v486_v40, 0.0 }
  0xfd   : > { %748 = vst.msk [vmem:[%s1211_s29 + $0x28] sm:$0xf] %vm737_vm3, %v962_v42  ;;  %v976_v50 = vpack.c.bf16 %v601_v43, %v601_v43  ;;  %v963_v51 = vpack.c.bf16 %v588_v44, %v588_v44  ;;  %v602_v52 = vmax.f32 %v550_v45, 0.0 }
  0xfe   : > { %764 = vst.msk [vmem:[%s1211_s29 + $0x68] sm:$0xf] %vm737_vm3, %v978_v46  ;;  %746 = vst.msk [vmem:[%s1211_s29 + $0x20] sm:$0xf] %vm737_vm3, %v960_v47  ;;  %v979_v53 = vpack.c.bf16 %v604_v48, %v604_v48  ;;  %v961_v54 = vpack.c.bf16 %v586_v49, %v586_v49  ;;  %v1020_v55 = vpop.f32.mrb[12].mxu0 }
  0xff   : > { %762 = vst.msk [vmem:[%s1211_s29 + $0x60] sm:$0xf] %vm737_vm3, %v976_v50  ;;  %749 = vst.msk [vmem:[%s1211_s29 + $0x2c] sm:$0xf] %vm737_vm3, %v963_v51  ;;  %v977_v56 = vpack.c.bf16 %v602_v52, %v602_v52  ;;  %v507_v57 = vadd.f32 %v1020_v55, %v1199_v22  ;;  %v1036_v58 = vpop.f32.mrb[12].mxu1  ;;  %v498_v59 = vpop.f32.mrb[13].mxu0 }
 0x100   : > { %765 = vst.msk [vmem:[%s1211_s29 + $0x6c] sm:$0xf] %vm737_vm3, %v979_v53  ;;  %747 = vst.msk [vmem:[%s1211_s29 + $0x24] sm:$0xf] %vm737_vm3, %v961_v54  ;;  %v571_v60 = vadd.f32 %v1036_v58, %v1199_v22  ;;  %v499_v61 = vadd.f32 %v1199_v22, %v498_v59  ;;  %v562_v62 = vpop.f32.mrb[13].mxu1  ;;  %v1021_v63 = vpop.f32.mrb[14].mxu0 }
 0x101   : > { %763 = vst.msk [vmem:[%s1211_s29 + $0x64] sm:$0xf] %vm737_vm3, %v977_v56  ;;  %v591_v0 = vmax.f32 %v507_v57, 0.0  ;;  %v563_v1 = vadd.f32 %v1199_v22, %v562_v62  ;;  %v510_v2 = vadd.f32 %v1021_v63, %v1199_v22  ;;  %v1037_v3 = vpop.f32.mrb[14].mxu1  ;;  %v501_v4 = vpop.f32.mrb[15].mxu0 }
 0x102   : > { %v607_v5 = vmax.f32 %v571_v60, 0.0  ;;  %v589_v6 = vmax.f32 %v499_v61, 0.0  ;;  %v574_v7 = vadd.f32 %v1037_v3, %v1199_v22  ;;  %v502_v8 = vadd.f32 %v1199_v22, %v501_v4  ;;  %v565_v9 = vpop.f32.mrb[15].mxu1 }
 0x103   : > { %v966_v10 = vpack.c.bf16 %v591_v0, %v591_v0  ;;  %v605_v11 = vmax.f32 %v563_v1, 0.0  ;;  %v592_v12 = vmax.f32 %v510_v2, 0.0  ;;  %v566_v13 = vadd.f32 %v1199_v22, %v565_v9 }
 0x104   : > { %v982_v14 = vpack.c.bf16 %v607_v5, %v607_v5  ;;  %v964_v15 = vpack.c.bf16 %v589_v6, %v589_v6  ;;  %v608_v16 = vmax.f32 %v574_v7, 0.0  ;;  %v590_v17 = vmax.f32 %v502_v8, 0.0 }
 0x105   : > { %752 = vst.msk [vmem:[%s1211_s29 + $0x38] sm:$0xf] %vm737_vm3, %v966_v10  ;;  %v980_v18 = vpack.c.bf16 %v605_v11, %v605_v11  ;;  %v967_v19 = vpack.c.bf16 %v592_v12, %v592_v12  ;;  %v606_v20 = vmax.f32 %v566_v13, 0.0 }
 0x106   : > { %768 = vst.msk [vmem:[%s1211_s29 + $0x78] sm:$0xf] %vm737_vm3, %v982_v14  ;;  %750 = vst.msk [vmem:[%s1211_s29 + $0x30] sm:$0xf] %vm737_vm3, %v964_v15  ;;  %v983_v21 = vpack.c.bf16 %v608_v16, %v608_v16  ;;  %v965_v23 = vpack.c.bf16 %v590_v17, %v590_v17 }
 0x107   : > { %766 = vst.msk [vmem:[%s1211_s29 + $0x70] sm:$0xf] %vm737_vm3, %v980_v18  ;;  %753 = vst.msk [vmem:[%s1211_s29 + $0x3c] sm:$0xf] %vm737_vm3, %v967_v19  ;;  %v981_v22 = vpack.c.bf16 %v606_v20, %v606_v20 }
 0x108   : > { %769 = vst.msk [vmem:[%s1211_s29 + $0x7c] sm:$0xf] %vm737_vm3, %v983_v21  ;;  %751 = vst.msk [vmem:[%s1211_s29 + $0x34] sm:$0xf] %vm737_vm3, %v965_v23 }
 0x109   : > { %767 = vst.msk [vmem:[%s1211_s29 + $0x74] sm:$0xf] %vm737_vm3, %v981_v22 }
 0x10a PF: > { %s13_s14 = sadd.s32 1, %s1107_s14   ;;  %s1317_s12 = smov %s1103_s13 }
 0x10b   : > { %p10_p5 = scmp.ge.s32.totalorder %s13_s14, 4   ;;  %s1318_s13 = smov %s1320_s15 }
 0x10d   :  { %12 = sbr.rel (!%p10_p5) target bundleno = 2 (0x2), region = 68 }

// kernel: unet_forward.14
= control target key start
LH: loop header
LB: loop body
LE: loop exit
PB: predicated region body
PF: predicated region fallthrough
CT: control target
= control target key end

     0   :  { %s1271_s12 = smov 0   ;;  %s1273_s13 = smov 0   ;;  %s1488_s0 = inlined_call_operand.vmem [shape: bf16[512,144], index: 0, kind: input, shape index: {}]   ;;  %s1489_s1 = inlined_call_operand.vmem [shape: bf16[144,16], index: 1, kind: input, shape index: {}]   ;;  %s1490_s2 = inlined_call_operand.vmem [shape: f32[1,16], index: 2, kind: input, shape index: {}]   ;;  %s1491_s3 = inlined_call_operand.vmem [shape: bf16[512,16], index: 3, kind: output, shape index: {}]  }
   0x1   :  { %s1275_s14 = smov 0  }
   0x2 LB: > { %s25_s15 = sadd.s32 1, %s1244_s13  ;;  %p995_p0 = scmp.ge.s32.totalorder %s1248_s14, 1  ;;  %s1248_s14 = sphi %s1275_s14, %s13_s14   ;;  %s1244_s13 = sphi %s1273_s13, %s1493_s13   ;;  %s1240_s12 = sphi %s1271_s12, %s1492_s12  }
   0x3   : > { %p27_p1 = scmp.ge.s32.totalorder %s25_s15, 2  ;;  %p170_p2 = scmp.lt.s32.totalorder %s1248_s14, 3 }
   0x5   : > { %s1495_s15 = smov (%p27_p1, %s25_s15), 0  ;;  %p171_p3 = pnand %p995_p0, %p170_p2 }
   0x6   : > { %v1169_v0 = vld [vmem:[%s1489_s1] sm:$0xff] (!%p171_p3)   ;;  %v1250_v1 = vmov (!%p171_p3), 0   ;;  %s996_s18 = sshll.u32 (!%p171_p3), %s1240_s12, 5  ;;  %v1170_v2 = vld [vmem:[%s1489_s1 + $0x8] sm:$0xff] (!%p171_p3)   ;;  %v1171_v3 = vld [vmem:[%s1489_s1 + $0x10] sm:$0xff] (!%p171_p3)   ;;  %vm484_vm0 = vcmask (!%p171_p3), 130048  }
   0x7   : > { %174 = sbr.rel (%p171_p3) target bundleno = 320 (0x140), region = 32  ;;  %533 = vmatprep.subr.bf16.mxu0 (!%p171_p3), %v1250_v1  ;;  %1126 = vmatprep.subr.bf16.mxu1 (!%p171_p3), %v1250_v1  ;;  %p206_p4 = scmp.lt.s32.totalorder (!%p171_p3), %s996_s18, 63  ;;  %v1172_v4 = vld [vmem:[%s1489_s1 + $0x18] sm:$0xff] (!%p171_p3)   ;;  %v1173_v7 = vld [vmem:[%s1489_s1 + $0x20] sm:$0xff] (!%p171_p3)   ;;  %v1174_v8 = vld [vmem:[%s1489_s1 + $0x28] sm:$0xff] (!%p171_p3)   ;;  %vm854_vm1 = vcmask (!%p171_p3), 125952  }
   0x8   : > { %534 = vmatpush1.bf16.msra.mxu0 (!%p171_p3), %v1169_v0  ;;  %1135 = vmatpush1.bf16.msra.mxu1 (!%p171_p3), %v1169_v0  ;;  %v1175_v9 = vld [vmem:[%s1489_s1 + $0x30] sm:$0xff] (!%p171_p3)   ;;  %v1176_v10 = vld [vmem:[%s1489_s1 + $0x38] sm:$0xff] (!%p171_p3)   ;;  %v1177_v11 = vld [vmem:[%s1489_s1 + $0x40] sm:$0xff] (!%p171_p3)  }
   0x9   : > { %535 = vmatprep.subr.bf16.mxu0 (!%p171_p3), %v1250_v1  ;;  %1127 = vmatprep.subr.bf16.mxu1 (!%p171_p3), %v1250_v1  ;;  %v1375_v42 = vld [vmem:[%s1490_s2] ss:$0 sm:$0xff] (!%p171_p3) }
   0xc   : > { %536 = vmatpush1.bf16.msra.mxu0 (!%p171_p3), %v1170_v2  ;;  %1136 = vmatpush1.bf16.msra.mxu1 (!%p171_p3), %v1170_v2 }
   0xd   : > { %537 = vmatprep.subr.bf16.mxu0 (!%p171_p3), %v1250_v1  ;;  %1128 = vmatprep.subr.bf16.mxu1 (!%p171_p3), %v1250_v1 }
   0xe   : > { %s1497_s18 = smov (!%p206_p4, %s996_s18), 63 }
   0xf   : > { %s1093_s23 = sshll.u32 %s1497_s18, 3  ;;  %s1000_s17 = sshll.u32 %s1497_s18, 2 }
  0x10   : > { %s1304_s26 = scalar_lea.vmem %s1488_s0, %s1093_s23  ;;  %538 = vmatpush1.bf16.msra.mxu0 %v1171_v3  ;;  %1137 = vmatpush1.bf16.msra.mxu1 %v1171_v3  ;;  %s1385_s18 = scalar_lea.vmem %s1491_s3, %s1000_s17 }
  0x11   : > { %v1180_v5 = vld [vmem:[%s1304_s26 + $0x4] ss:$8 sps:$4 sm:$0xff]   ;;  %539 = vmatprep.subr.bf16.mxu0 %v1250_v1  ;;  %1129 = vmatprep.subr.bf16.mxu1 %v1250_v1  ;;  %v1178_v12 = vld [vmem:[%s1304_s26] ss:$8 sps:$4 sm:$0xff]   ;;  %v1184_v14 = vld [vmem:[%s1304_s26 + $0x14] ss:$8 sps:$4 sm:$0xff]  }
  0x12   : > { %v1183_v6 = vld [vmem:[%s1304_s26 + $0x84] ss:$8 sps:$4 sm:$0xff]   ;;  %1043 = vmatprep.mubr.msk.bf16.mxu0 %vm484_vm0, %v1180_v5  ;;  %v1181_v13 = vld [vmem:[%s1304_s26 + $0x80] ss:$8 sps:$4 sm:$0xff]   ;;  %v1186_v15 = vld [vmem:[%s1304_s26 + $0x94] ss:$8 sps:$4 sm:$0xff]  }
  0x13   : > { %1051 = vmatprep.mubr.msk.bf16.mxu1 %vm484_vm0, %v1183_v6  ;;  %v1188_v16 = vld [vmem:[%s1304_s26 + $0x10] ss:$8 sps:$4 sm:$0xff]   ;;  %v1190_v18 = vld [vmem:[%s1304_s26 + $0x24] ss:$8 sps:$4 sm:$0xff]   ;;  %v1194_v20 = vld [vmem:[%s1304_s26 + $0x20] ss:$8 sps:$4 sm:$0xff]  }
  0x14   : > { %540 = vmatpush1.bf16.msra.mxu0 %v1172_v4  ;;  %1138 = vmatpush1.bf16.msra.mxu1 %v1172_v4  ;;  %v1189_v17 = vld [vmem:[%s1304_s26 + $0x90] ss:$8 sps:$4 sm:$0xff]   ;;  %v1192_v19 = vld [vmem:[%s1304_s26 + $0xa4] ss:$8 sps:$4 sm:$0xff]   ;;  %v1195_v21 = vld [vmem:[%s1304_s26 + $0xa0] ss:$8 sps:$4 sm:$0xff]  }
  0x15   : > { %541 = vmatprep.subr.bf16.mxu0 %v1250_v1  ;;  %1130 = vmatprep.subr.bf16.mxu1 %v1250_v1  ;;  %v1196_v22 = vld [vmem:[%s1304_s26 + $0x34] ss:$8 sps:$4 sm:$0xff]   ;;  %v1200_v24 = vld [vmem:[%s1304_s26 + $0x30] ss:$8 sps:$4 sm:$0xff]   ;;  %v1202_v26 = vld [vmem:[%s1304_s26 + $0x44] ss:$8 sps:$4 sm:$0xff]  }
  0x16   : > { %v1198_v23 = vld [vmem:[%s1304_s26 + $0xb4] ss:$8 sps:$4 sm:$0xff]   ;;  %v1201_v25 = vld [vmem:[%s1304_s26 + $0xb0] ss:$8 sps:$4 sm:$0xff]   ;;  %v1204_v27 = vld [vmem:[%s1304_s26 + $0xc4] ss:$8 sps:$4 sm:$0xff]  }
  0x17   : > { %v1206_v28 = vld [vmem:[%s1304_s26 + $0x40] ss:$8 sps:$4 sm:$0xff]   ;;  %v1208_v30 = vld [vmem:[%s1304_s26 + $0x54] ss:$8 sps:$4 sm:$0xff]   ;;  %v1212_v32 = vld [vmem:[%s1304_s26 + $0x50] ss:$8 sps:$4 sm:$0xff]  }
  0x18   : > { %542 = vmatpush1.bf16.msra.mxu0 %v1173_v7  ;;  %1139 = vmatpush1.bf16.msra.mxu1 %v1173_v7  ;;  %v1207_v29 = vld [vmem:[%s1304_s26 + $0xc0] ss:$8 sps:$4 sm:$0xff]   ;;  %v1210_v31 = vld [vmem:[%s1304_s26 + $0xd4] ss:$8 sps:$4 sm:$0xff]   ;;  %v1213_v33 = vld [vmem:[%s1304_s26 + $0xd0] ss:$8 sps:$4 sm:$0xff]  }
  0x19   : > { %543 = vmatprep.subr.bf16.mxu0 %v1250_v1  ;;  %1131 = vmatprep.subr.bf16.mxu1 %v1250_v1  ;;  %v1214_v34 = vld [vmem:[%s1304_s26 + $0x64] ss:$8 sps:$4 sm:$0xff]   ;;  %v1218_v36 = vld [vmem:[%s1304_s26 + $0x60] ss:$8 sps:$4 sm:$0xff]   ;;  %v1220_v38 = vld [vmem:[%s1304_s26 + $0x74] ss:$8 sps:$4 sm:$0xff]  }
  0x1a   : > { %v1216_v35 = vld [vmem:[%s1304_s26 + $0xe4] ss:$8 sps:$4 sm:$0xff]   ;;  %v1219_v37 = vld [vmem:[%s1304_s26 + $0xe0] ss:$8 sps:$4 sm:$0xff]   ;;  %v1222_v39 = vld [vmem:[%s1304_s26 + $0xf4] ss:$8 sps:$4 sm:$0xff]  }
  0x1b   : > { %v1224_v40 = vld [vmem:[%s1304_s26 + $0x70] ss:$8 sps:$4 sm:$0xff]  }
  0x1c   : > { %544 = vmatpush1.bf16.msra.mxu0 %v1174_v8  ;;  %1140 = vmatpush1.bf16.msra.mxu1 %v1174_v8  ;;  %v1225_v41 = vld [vmem:[%s1304_s26 + $0xf0] ss:$8 sps:$4 sm:$0xff]  }
  0x1d   : > { %545 = vmatprep.subr.bf16.mxu0 %v1250_v1  ;;  %1132 = vmatprep.subr.bf16.mxu1 %v1250_v1 }
  0x20   : > { %546 = vmatpush1.bf16.msra.mxu0 %v1175_v9  ;;  %1141 = vmatpush1.bf16.msra.mxu1 %v1175_v9 }
  0x21   : > { %547 = vmatprep.subr.bf16.mxu0 %v1250_v1  ;;  %1133 = vmatprep.subr.bf16.mxu1 %v1250_v1 }
  0x24   : > { %548 = vmatpush1.bf16.msra.mxu0 %v1176_v10  ;;  %1142 = vmatpush1.bf16.msra.mxu1 %v1176_v10 }
  0x25   : > { %549 = vmatprep.subr.bf16.mxu0 %v1250_v1  ;;  %1134 = vmatprep.subr.bf16.mxu1 %v1250_v1 }
  0x28   : > { %550 = vmatpush1.bf16.msra.mxu0 %v1177_v11  ;;  %1143 = vmatpush1.bf16.msra.mxu1 %v1177_v11 }
  0x2b   : > { %566 = vmatmul.mubr.bf16.vlgmr.msra.gmra.mrb[0].mxu0 %v1178_v12  ;;  %630 = vmatmul.mubr.bf16.vlgmr.msra.gmra.mrb[0].mxu1 %v1181_v13 }
  0x2c   : > { %1044 = vmatprep.mubr.msk.bf16.mxu0 %vm484_vm0, %v1184_v14  ;;  %1052 = vmatprep.mubr.msk.bf16.mxu1 %vm484_vm0, %v1186_v15 }
  0x33   : > { %574 = vmatmul.mubr.bf16.gmra.mrb[4].mxu0 %v1188_v16  ;;  %638 = vmatmul.mubr.bf16.gmra.mrb[4].mxu1 %v1189_v17 }
  0x34   : > { %1045 = vmatprep.mubr.msk.bf16.mxu0 %vm484_vm0, %v1190_v18  ;;  %1053 = vmatprep.mubr.msk.bf16.mxu1 %vm484_vm0, %v1192_v19 }
  0x3b   : > { %582 = vmatmul.mubr.bf16.gmra.mrb[8].mxu0 %v1194_v20  ;;  %646 = vmatmul.mubr.bf16.gmra.mrb[8].mxu1 %v1195_v21 }
  0x3c   : > { %1046 = vmatprep.mubr.msk.bf16.mxu0 %vm484_vm0, %v1196_v22  ;;  %1054 = vmatprep.mubr.msk.bf16.mxu1 %vm484_vm0, %v1198_v23 }
  0x43   : > { %590 = vmatmul.mubr.bf16.gmra.mrb[12].mxu0 %v1200_v24  ;;  %654 = vmatmul.mubr.bf16.gmra.mrb[12].mxu1 %v1201_v25 }
  0x44   : > { %1047 = vmatprep.mubr.msk.bf16.mxu0 %vm484_vm0, %v1202_v26  ;;  %1055 = vmatprep.mubr.msk.bf16.mxu1 %vm484_vm0, %v1204_v27 }
  0x4b   : > { %598 = vmatmul.mubr.bf16.gmra.mrb[16].mxu0 %v1206_v28  ;;  %662 = vmatmul.mubr.bf16.gmra.mrb[16].mxu1 %v1207_v29 }
  0x4c   : > { %1048 = vmatprep.mubr.msk.bf16.mxu0 %vm484_vm0, %v1208_v30  ;;  %1056 = vmatprep.mubr.msk.bf16.mxu1 %vm484_vm0, %v1210_v31 }
  0x53   : > { %606 = vmatmul.mubr.bf16.gmra.mrb[20].mxu0 %v1212_v32  ;;  %670 = vmatmul.mubr.bf16.gmra.mrb[20].mxu1 %v1213_v33 }
  0x54   : > { %1049 = vmatprep.mubr.msk.bf16.mxu0 %vm484_vm0, %v1214_v34  ;;  %1057 = vmatprep.mubr.msk.bf16.mxu1 %vm484_vm0, %v1216_v35 }
  0x5b   : > { %614 = vmatmul.mubr.bf16.gmra.mrb[24].mxu0 %v1218_v36  ;;  %678 = vmatmul.mubr.bf16.gmra.mrb[24].mxu1 %v1219_v37 }
  0x5c   : > { %1050 = vmatprep.mubr.msk.bf16.mxu0 %vm484_vm0, %v1220_v38  ;;  %1058 = vmatprep.mubr.msk.bf16.mxu1 %vm484_vm0, %v1222_v39 }
  0x63   : > { %622 = vmatmul.mubr.bf16.gmra.mrb[28].mxu0 %v1224_v40  ;;  %686 = vmatmul.mubr.bf16.gmra.mrb[28].mxu1 %v1225_v41 }
  0xfe   : > { %v567_v43 = vpop.f32.mrb[0].mxu0  ;;  %v631_v44 = vpop.f32.mrb[0].mxu1 }
  0xff   : > { %v568_v45 = vadd.f32 %v1375_v42, %v567_v43  ;;  %v632_v46 = vadd.f32 %v1375_v42, %v631_v44  ;;  %v569_v47 = vpop.f32.mrb[1].mxu0  ;;  %v633_v48 = vpop.f32.mrb[1].mxu1 }
 0x100   : > { %v570_v49 = vpop.f32.mrb[2].mxu0  ;;  %v634_v50 = vpop.f32.mrb[2].mxu1 }
 0x101   : > { %v694_v51 = vmax.f32 %v568_v45, 0.0  ;;  %v710_v52 = vmax.f32 %v632_v46, 0.0  ;;  %v571_v53 = vadd.f32 %v1375_v42, %v570_v49  ;;  %v635_v54 = vadd.f32 %v1375_v42, %v634_v50  ;;  %v572_v55 = vpop.f32.mrb[3].mxu0  ;;  %v636_v56 = vpop.f32.mrb[3].mxu1 }
 0x103   : > { %v1094_v57 = vpack.c.bf16 %v694_v51, %v694_v51  ;;  %v1110_v58 = vpack.c.bf16 %v710_v52, %v710_v52  ;;  %v695_v59 = vmax.f32 %v571_v53, 0.0  ;;  %v711_v60 = vmax.f32 %v635_v54, 0.0 }
 0x105   : > { %855 = vst.msk [vmem:[%s1385_s18] sm:$0xf] %vm854_vm1, %v1094_v57  ;;  %871 = vst.msk [vmem:[%s1385_s18 + $0x40] sm:$0xf] %vm854_vm1, %v1110_v58  ;;  %v1095_v61 = vpack.c.bf16 %v695_v59, %v695_v59  ;;  %v1111_v62 = vpack.c.bf16 %v711_v60, %v711_v60 }
 0x106   : > { %v575_v63 = vpop.f32.mrb[4].mxu0  ;;  %v639_v0 = vpop.f32.mrb[4].mxu1 }
 0x107   : > { %856 = vst.msk [vmem:[%s1385_s18 + $0x4] sm:$0xf] %vm854_vm1, %v1095_v61  ;;  %872 = vst.msk [vmem:[%s1385_s18 + $0x44] sm:$0xf] %vm854_vm1, %v1111_v62  ;;  %v576_v1 = vadd.f32 %v1375_v42, %v575_v63  ;;  %v640_v2 = vadd.f32 %v1375_v42, %v639_v0  ;;  %v577_v3 = vpop.f32.mrb[5].mxu0  ;;  %v641_v4 = vpop.f32.mrb[5].mxu1 }
 0x108   : > { %v578_v5 = vpop.f32.mrb[6].mxu0  ;;  %v642_v6 = vpop.f32.mrb[6].mxu1 }
 0x109   : > { %v696_v7 = vmax.f32 %v576_v1, 0.0  ;;  %v712_v8 = vmax.f32 %v640_v2, 0.0  ;;  %v579_v9 = vadd.f32 %v1375_v42, %v578_v5  ;;  %v643_v10 = vadd.f32 %v1375_v42, %v642_v6  ;;  %v580_v11 = vpop.f32.mrb[7].mxu0  ;;  %v644_v12 = vpop.f32.mrb[7].mxu1 }
 0x10b   : > { %v1096_v13 = vpack.c.bf16 %v696_v7, %v696_v7  ;;  %v1112_v14 = vpack.c.bf16 %v712_v8, %v712_v8  ;;  %v697_v15 = vmax.f32 %v579_v9, 0.0  ;;  %v713_v16 = vmax.f32 %v643_v10, 0.0 }
 0x10d   : > { %857 = vst.msk [vmem:[%s1385_s18 + $0x8] sm:$0xf] %vm854_vm1, %v1096_v13  ;;  %873 = vst.msk [vmem:[%s1385_s18 + $0x48] sm:$0xf] %vm854_vm1, %v1112_v14  ;;  %v1097_v17 = vpack.c.bf16 %v697_v15, %v697_v15  ;;  %v1113_v18 = vpack.c.bf16 %v713_v16, %v713_v16 }
 0x10e   : > { %v583_v19 = vpop.f32.mrb[8].mxu0  ;;  %v647_v20 = vpop.f32.mrb[8].mxu1 }
 0x10f   : > { %858 = vst.msk [vmem:[%s1385_s18 + $0xc] sm:$0xf] %vm854_vm1, %v1097_v17  ;;  %874 = vst.msk [vmem:[%s1385_s18 + $0x4c] sm:$0xf] %vm854_vm1, %v1113_v18  ;;  %v584_v21 = vadd.f32 %v1375_v42, %v583_v19  ;;  %v648_v22 = vadd.f32 %v1375_v42, %v647_v20  ;;  %v585_v23 = vpop.f32.mrb[9].mxu0  ;;  %v649_v24 = vpop.f32.mrb[9].mxu1 }
 0x110   : > { %v586_v25 = vpop.f32.mrb[10].mxu0  ;;  %v650_v26 = vpop.f32.mrb[10].mxu1 }
 0x111   : > { %v698_v27 = vmax.f32 %v584_v21, 0.0  ;;  %v714_v28 = vmax.f32 %v648_v22, 0.0  ;;  %v587_v29 = vadd.f32 %v1375_v42, %v586_v25  ;;  %v651_v30 = vadd.f32 %v1375_v42, %v650_v26  ;;  %v588_v31 = vpop.f32.mrb[11].mxu0  ;;  %v652_v32 = vpop.f32.mrb[11].mxu1 }
 0x113   : > { %v1098_v33 = vpack.c.bf16 %v698_v27, %v698_v27  ;;  %v1114_v34 = vpack.c.bf16 %v714_v28, %v714_v28  ;;  %v699_v35 = vmax.f32 %v587_v29, 0.0  ;;  %v715_v36 = vmax.f32 %v651_v30, 0.0 }
 0x115   : > { %859 = vst.msk [vmem:[%s1385_s18 + $0x10] sm:$0xf] %vm854_vm1, %v1098_v33  ;;  %875 = vst.msk [vmem:[%s1385_s18 + $0x50] sm:$0xf] %vm854_vm1, %v1114_v34  ;;  %v1099_v37 = vpack.c.bf16 %v699_v35, %v699_v35  ;;  %v1115_v38 = vpack.c.bf16 %v715_v36, %v715_v36 }
 0x116   : > { %v591_v39 = vpop.f32.mrb[12].mxu0  ;;  %v655_v40 = vpop.f32.mrb[12].mxu1 }
 0x117   : > { %860 = vst.msk [vmem:[%s1385_s18 + $0x14] sm:$0xf] %vm854_vm1, %v1099_v37  ;;  %876 = vst.msk [vmem:[%s1385_s18 + $0x54] sm:$0xf] %vm854_vm1, %v1115_v38  ;;  %v592_v41 = vadd.f32 %v1375_v42, %v591_v39  ;;  %v656_v43 = vadd.f32 %v1375_v42, %v655_v40  ;;  %v593_v44 = vpop.f32.mrb[13].mxu0  ;;  %v657_v45 = vpop.f32.mrb[13].mxu1 }
 0x118   : > { %v594_v46 = vpop.f32.mrb[14].mxu0  ;;  %v658_v47 = vpop.f32.mrb[14].mxu1 }
 0x119   : > { %v700_v48 = vmax.f32 %v592_v41, 0.0  ;;  %v716_v49 = vmax.f32 %v656_v43, 0.0  ;;  %v595_v50 = vadd.f32 %v1375_v42, %v594_v46  ;;  %v659_v51 = vadd.f32 %v1375_v42, %v658_v47  ;;  %v596_v52 = vpop.f32.mrb[15].mxu0  ;;  %v660_v53 = vpop.f32.mrb[15].mxu1 }
 0x11b   : > { %v1100_v54 = vpack.c.bf16 %v700_v48, %v700_v48  ;;  %v1116_v55 = vpack.c.bf16 %v716_v49, %v716_v49  ;;  %v701_v56 = vmax.f32 %v595_v50, 0.0  ;;  %v717_v57 = vmax.f32 %v659_v51, 0.0 }
 0x11d   : > { %861 = vst.msk [vmem:[%s1385_s18 + $0x18] sm:$0xf] %vm854_vm1, %v1100_v54  ;;  %877 = vst.msk [vmem:[%s1385_s18 + $0x58] sm:$0xf] %vm854_vm1, %v1116_v55  ;;  %v1101_v58 = vpack.c.bf16 %v701_v56, %v701_v56  ;;  %v1117_v59 = vpack.c.bf16 %v717_v57, %v717_v57 }
 0x11e   : > { %v599_v60 = vpop.f32.mrb[16].mxu0  ;;  %v663_v61 = vpop.f32.mrb[16].mxu1 }
 0x11f   : > { %862 = vst.msk [vmem:[%s1385_s18 + $0x1c] sm:$0xf] %vm854_vm1, %v1101_v58  ;;  %878 = vst.msk [vmem:[%s1385_s18 + $0x5c] sm:$0xf] %vm854_vm1, %v1117_v59  ;;  %v600_v62 = vadd.f32 %v1375_v42, %v599_v60  ;;  %v664_v63 = vadd.f32 %v1375_v42, %v663_v61  ;;  %v601_v0 = vpop.f32.mrb[17].mxu0  ;;  %v665_v1 = vpop.f32.mrb[17].mxu1 }
 0x120   : > { %v602_v2 = vpop.f32.mrb[18].mxu0  ;;  %v666_v3 = vpop.f32.mrb[18].mxu1 }
 0x121   : > { %v702_v4 = vmax.f32 %v600_v62, 0.0  ;;  %v718_v5 = vmax.f32 %v664_v63, 0.0  ;;  %v603_v6 = vadd.f32 %v1375_v42, %v602_v2  ;;  %v667_v7 = vadd.f32 %v1375_v42, %v666_v3  ;;  %v604_v8 = vpop.f32.mrb[19].mxu0  ;;  %v668_v9 = vpop.f32.mrb[19].mxu1 }
 0x123   : > { %v1102_v10 = vpack.c.bf16 %v702_v4, %v702_v4  ;;  %v1118_v11 = vpack.c.bf16 %v718_v5, %v718_v5  ;;  %v703_v12 = vmax.f32 %v603_v6, 0.0  ;;  %v719_v13 = vmax.f32 %v667_v7, 0.0 }
 0x125   : > { %863 = vst.msk [vmem:[%s1385_s18 + $0x20] sm:$0xf] %vm854_vm1, %v1102_v10  ;;  %879 = vst.msk [vmem:[%s1385_s18 + $0x60] sm:$0xf] %vm854_vm1, %v1118_v11  ;;  %v1103_v14 = vpack.c.bf16 %v703_v12, %v703_v12  ;;  %v1119_v15 = vpack.c.bf16 %v719_v13, %v719_v13 }
 0x126   : > { %v607_v16 = vpop.f32.mrb[20].mxu0  ;;  %v671_v17 = vpop.f32.mrb[20].mxu1 }
 0x127   : > { %864 = vst.msk [vmem:[%s1385_s18 + $0x24] sm:$0xf] %vm854_vm1, %v1103_v14  ;;  %880 = vst.msk [vmem:[%s1385_s18 + $0x64] sm:$0xf] %vm854_vm1, %v1119_v15  ;;  %v608_v18 = vadd.f32 %v1375_v42, %v607_v16  ;;  %v672_v19 = vadd.f32 %v1375_v42, %v671_v17  ;;  %v609_v20 = vpop.f32.mrb[21].mxu0  ;;  %v673_v21 = vpop.f32.mrb[21].mxu1 }
 0x128   : > { %v610_v22 = vpop.f32.mrb[22].mxu0  ;;  %v674_v23 = vpop.f32.mrb[22].mxu1 }
 0x129   : > { %v704_v24 = vmax.f32 %v608_v18, 0.0  ;;  %v720_v25 = vmax.f32 %v672_v19, 0.0  ;;  %v611_v26 = vadd.f32 %v1375_v42, %v610_v22  ;;  %v675_v27 = vadd.f32 %v1375_v42, %v674_v23  ;;  %v612_v28 = vpop.f32.mrb[23].mxu0  ;;  %v676_v29 = vpop.f32.mrb[23].mxu1 }
 0x12b   : > { %v1104_v30 = vpack.c.bf16 %v704_v24, %v704_v24  ;;  %v1120_v31 = vpack.c.bf16 %v720_v25, %v720_v25  ;;  %v705_v32 = vmax.f32 %v611_v26, 0.0  ;;  %v721_v33 = vmax.f32 %v675_v27, 0.0 }
 0x12d   : > { %865 = vst.msk [vmem:[%s1385_s18 + $0x28] sm:$0xf] %vm854_vm1, %v1104_v30  ;;  %881 = vst.msk [vmem:[%s1385_s18 + $0x68] sm:$0xf] %vm854_vm1, %v1120_v31  ;;  %v1105_v34 = vpack.c.bf16 %v705_v32, %v705_v32  ;;  %v1121_v35 = vpack.c.bf16 %v721_v33, %v721_v33 }
 0x12e   : > { %v615_v36 = vpop.f32.mrb[24].mxu0  ;;  %v679_v37 = vpop.f32.mrb[24].mxu1 }
 0x12f   : > { %866 = vst.msk [vmem:[%s1385_s18 + $0x2c] sm:$0xf] %vm854_vm1, %v1105_v34  ;;  %882 = vst.msk [vmem:[%s1385_s18 + $0x6c] sm:$0xf] %vm854_vm1, %v1121_v35  ;;  %v616_v38 = vadd.f32 %v1375_v42, %v615_v36  ;;  %v680_v39 = vadd.f32 %v1375_v42, %v679_v37  ;;  %v617_v40 = vpop.f32.mrb[25].mxu0  ;;  %v681_v41 = vpop.f32.mrb[25].mxu1 }
 0x130   : > { %v618_v43 = vpop.f32.mrb[26].mxu0  ;;  %v682_v44 = vpop.f32.mrb[26].mxu1 }
 0x131   : > { %v706_v45 = vmax.f32 %v616_v38, 0.0  ;;  %v722_v46 = vmax.f32 %v680_v39, 0.0  ;;  %v619_v47 = vadd.f32 %v1375_v42, %v618_v43  ;;  %v683_v48 = vadd.f32 %v1375_v42, %v682_v44  ;;  %v620_v49 = vpop.f32.mrb[27].mxu0  ;;  %v684_v50 = vpop.f32.mrb[27].mxu1 }
 0x133   : > { %v1106_v51 = vpack.c.bf16 %v706_v45, %v706_v45  ;;  %v1122_v52 = vpack.c.bf16 %v722_v46, %v722_v46  ;;  %v707_v53 = vmax.f32 %v619_v47, 0.0  ;;  %v723_v54 = vmax.f32 %v683_v48, 0.0 }
 0x135   : > { %867 = vst.msk [vmem:[%s1385_s18 + $0x30] sm:$0xf] %vm854_vm1, %v1106_v51  ;;  %883 = vst.msk [vmem:[%s1385_s18 + $0x70] sm:$0xf] %vm854_vm1, %v1122_v52  ;;  %v1107_v55 = vpack.c.bf16 %v707_v53, %v707_v53  ;;  %v1123_v56 = vpack.c.bf16 %v723_v54, %v723_v54 }
 0x136   : > { %v623_v57 = vpop.f32.mrb[28].mxu0  ;;  %v687_v58 = vpop.f32.mrb[28].mxu1 }
 0x137   : > { %868 = vst.msk [vmem:[%s1385_s18 + $0x34] sm:$0xf] %vm854_vm1, %v1107_v55  ;;  %884 = vst.msk [vmem:[%s1385_s18 + $0x74] sm:$0xf] %vm854_vm1, %v1123_v56  ;;  %v624_v59 = vadd.f32 %v1375_v42, %v623_v57  ;;  %v688_v60 = vadd.f32 %v1375_v42, %v687_v58  ;;  %v625_v61 = vpop.f32.mrb[29].mxu0  ;;  %v689_v62 = vpop.f32.mrb[29].mxu1 }
 0x138   : > { %v626_v63 = vpop.f32.mrb[30].mxu0  ;;  %v690_v0 = vpop.f32.mrb[30].mxu1 }
 0x139   : > { %v708_v1 = vmax.f32 %v624_v59, 0.0  ;;  %v724_v2 = vmax.f32 %v688_v60, 0.0  ;;  %v627_v3 = vadd.f32 %v1375_v42, %v626_v63  ;;  %v691_v4 = vadd.f32 %v1375_v42, %v690_v0  ;;  %v628_v5 = vpop.f32.mrb[31].mxu0  ;;  %v692_v6 = vpop.f32.mrb[31].mxu1 }
 0x13b   : > { %v1108_v7 = vpack.c.bf16 %v708_v1, %v708_v1  ;;  %v1124_v8 = vpack.c.bf16 %v724_v2, %v724_v2  ;;  %v709_v9 = vmax.f32 %v627_v3, 0.0  ;;  %v725_v10 = vmax.f32 %v691_v4, 0.0 }
 0x13d   : > { %869 = vst.msk [vmem:[%s1385_s18 + $0x38] sm:$0xf] %vm854_vm1, %v1108_v7  ;;  %885 = vst.msk [vmem:[%s1385_s18 + $0x78] sm:$0xf] %vm854_vm1, %v1124_v8  ;;  %v1109_v11 = vpack.c.bf16 %v709_v9, %v709_v9  ;;  %v1125_v12 = vpack.c.bf16 %v725_v10, %v725_v10 }
 0x13f   : > { %870 = vst.msk [vmem:[%s1385_s18 + $0x3c] sm:$0xf] %vm854_vm1, %v1109_v11  ;;  %886 = vst.msk [vmem:[%s1385_s18 + $0x7c] sm:$0xf] %vm854_vm1, %v1125_v12 }
 0x140 PF: > { %s13_s14 = sadd.s32 1, %s1248_s14   ;;  %s1492_s12 = smov %s1244_s13 }
 0x141   : > { %p10_p5 = scmp.ge.s32.totalorder %s13_s14, 4   ;;  %s1493_s13 = smov %s1495_s15 }
 0x143   :  { %12 = sbr.rel (!%p10_p5) target bundleno = 2 (0x2), region = 68 }

// kernel: unet_forward.15
= control target key start
LH: loop header
LB: loop body
LE: loop exit
PB: predicated region body
PF: predicated region fallthrough
CT: control target
= control target key end

     0   :  { %v523_v0 = vmov 0   ;;  %vm182_vm0 = vcmask 130048   ;;  %vm384_vm1 = vcmask 257024   ;;  %s712_s1 = inlined_call_operand.vmem [shape: bf16[144,32], index: 1, kind: input, shape index: {}]   ;;  %s713_s0 = inlined_call_operand.vmem [shape: bf16[128,144], index: 0, kind: input, shape index: {}]   ;;  %s714_s2 = inlined_call_operand.vmem [shape: f32[1,32], index: 2, kind: input, shape index: {}]   ;;  %s715_s3 = inlined_call_operand.vmem [shape: bf16[128,32], index: 3, kind: output, shape index: {}]  }
   0x1   :  { %207 = vmatprep.subr.bf16.mxu0 %v523_v0  ;;  %471 = vmatprep.subr.bf16.mxu1 %v523_v0  ;;  %v490_v1 = vld [vmem:[%s712_s1] sm:$0xff]   ;;  %v491_v2 = vld [vmem:[%s712_s1 + $0x8] sm:$0xff]   ;;  %v492_v3 = vld [vmem:[%s712_s1 + $0x10] sm:$0xff]  }
   0x2   :  { %208 = vmatpush1.bf16.msra.mxu0 %v490_v1  ;;  %480 = vmatpush1.bf16.msra.mxu1 %v490_v1  ;;  %v493_v4 = vld [vmem:[%s712_s1 + $0x18] sm:$0xff]   ;;  %v501_v5 = vld [vmem:[%s713_s0 + $0x4] ss:$8 sps:$4 sm:$0xff]   ;;  %v496_v9 = vld [vmem:[%s712_s1 + $0x30] sm:$0xff]  }
   0x3   :  { %209 = vmatprep.subr.bf16.mxu0 %v523_v0  ;;  %472 = vmatprep.subr.bf16.mxu1 %v523_v0  ;;  %v504_v6 = vld [vmem:[%s713_s0 + $0x44] ss:$8 sps:$4 sm:$0xff]   ;;  %v497_v10 = vld [vmem:[%s712_s1 + $0x38] sm:$0xff]   ;;  %v499_v12 = vld [vmem:[%s713_s0] ss:$8 sps:$4 sm:$0xff]  }
   0x4   :  { %431 = vmatprep.mubr.msk.bf16.mxu0 %vm182_vm0, %v501_v5  ;;  %435 = vmatprep.mubr.msk.bf16.mxu1 %vm182_vm0, %v504_v6  ;;  %v494_v7 = vld [vmem:[%s712_s1 + $0x20] sm:$0xff]   ;;  %v495_v8 = vld [vmem:[%s712_s1 + $0x28] sm:$0xff]   ;;  %v505_v14 = vld [vmem:[%s713_s0 + $0x14] ss:$8 sps:$4 sm:$0xff]  }
   0x5   :  { %v498_v11 = vld [vmem:[%s712_s1 + $0x40] sm:$0xff]   ;;  %v507_v15 = vld [vmem:[%s713_s0 + $0x54] ss:$8 sps:$4 sm:$0xff]   ;;  %v509_v16 = vld [vmem:[%s713_s0 + $0x10] ss:$8 sps:$4 sm:$0xff]  }
   0x6   :  { %210 = vmatpush1.bf16.msra.mxu0 %v491_v2  ;;  %481 = vmatpush1.bf16.msra.mxu1 %v491_v2  ;;  %v502_v13 = vld [vmem:[%s713_s0 + $0x40] ss:$8 sps:$4 sm:$0xff]   ;;  %v510_v17 = vld [vmem:[%s713_s0 + $0x50] ss:$8 sps:$4 sm:$0xff]   ;;  %v511_v18 = vld [vmem:[%s713_s0 + $0x24] ss:$8 sps:$4 sm:$0xff]  }
   0x7   :  { %211 = vmatprep.subr.bf16.mxu0 %v523_v0  ;;  %473 = vmatprep.subr.bf16.mxu1 %v523_v0  ;;  %v513_v19 = vld [vmem:[%s713_s0 + $0x64] ss:$8 sps:$4 sm:$0xff]   ;;  %v515_v20 = vld [vmem:[%s713_s0 + $0x20] ss:$8 sps:$4 sm:$0xff]   ;;  %v517_v22 = vld [vmem:[%s713_s0 + $0x34] ss:$8 sps:$4 sm:$0xff]  }
   0x8   :  { %v516_v21 = vld [vmem:[%s713_s0 + $0x60] ss:$8 sps:$4 sm:$0xff]   ;;  %v519_v23 = vld [vmem:[%s713_s0 + $0x74] ss:$8 sps:$4 sm:$0xff]   ;;  %v521_v24 = vld [vmem:[%s713_s0 + $0x30] ss:$8 sps:$4 sm:$0xff]  }
   0x9   :  { %v522_v25 = vld [vmem:[%s713_s0 + $0x70] ss:$8 sps:$4 sm:$0xff]   ;;  %v630_v26 = vld [vmem:[%s714_s2] ss:$0 sm:$0xff] }
   0xa   :  { %212 = vmatpush1.bf16.msra.mxu0 %v492_v3  ;;  %482 = vmatpush1.bf16.msra.mxu1 %v492_v3 }
   0xb   :  { %213 = vmatprep.subr.bf16.mxu0 %v523_v0  ;;  %474 = vmatprep.subr.bf16.mxu1 %v523_v0 }
   0xe   :  { %214 = vmatpush1.bf16.msra.mxu0 %v493_v4  ;;  %483 = vmatpush1.bf16.msra.mxu1 %v493_v4 }
   0xf   :  { %215 = vmatprep.subr.bf16.mxu0 %v523_v0  ;;  %475 = vmatprep.subr.bf16.mxu1 %v523_v0 }
  0x12   :  { %216 = vmatpush1.bf16.msra.mxu0 %v494_v7  ;;  %484 = vmatpush1.bf16.msra.mxu1 %v494_v7 }
  0x13   :  { %217 = vmatprep.subr.bf16.mxu0 %v523_v0  ;;  %476 = vmatprep.subr.bf16.mxu1 %v523_v0 }
  0x16   :  { %218 = vmatpush1.bf16.msra.mxu0 %v495_v8  ;;  %485 = vmatpush1.bf16.msra.mxu1 %v495_v8 }
  0x17   :  { %219 = vmatprep.subr.bf16.mxu0 %v523_v0  ;;  %477 = vmatprep.subr.bf16.mxu1 %v523_v0 }
  0x1a   :  { %220 = vmatpush1.bf16.msra.mxu0 %v496_v9  ;;  %486 = vmatpush1.bf16.msra.mxu1 %v496_v9 }
  0x1b   :  { %221 = vmatprep.subr.bf16.mxu0 %v523_v0  ;;  %478 = vmatprep.subr.bf16.mxu1 %v523_v0 }
  0x1e   :  { %222 = vmatpush1.bf16.msra.mxu0 %v497_v10  ;;  %487 = vmatpush1.bf16.msra.mxu1 %v497_v10 }
  0x1f   :  { %223 = vmatprep.subr.bf16.mxu0 %v523_v0  ;;  %479 = vmatprep.subr.bf16.mxu1 %v523_v0 }
  0x22   :  { %224 = vmatpush1.bf16.msra.mxu0 %v498_v11  ;;  %488 = vmatpush1.bf16.msra.mxu1 %v498_v11 }
  0x25   :  { %240 = vmatmul.mubr.bf16.vlgmr.msra.gmra.mrb[0].mxu0 %v499_v12  ;;  %272 = vmatmul.mubr.bf16.vlgmr.msra.gmra.mrb[0].mxu1 %v502_v13 }
  0x26   :  { %432 = vmatprep.mubr.msk.bf16.mxu0 %vm182_vm0, %v505_v14  ;;  %436 = vmatprep.mubr.msk.bf16.mxu1 %vm182_vm0, %v507_v15 }
  0x2d   :  { %248 = vmatmul.mubr.bf16.gmra.mrb[4].mxu0 %v509_v16  ;;  %280 = vmatmul.mubr.bf16.gmra.mrb[4].mxu1 %v510_v17 }
  0x2e   :  { %433 = vmatprep.mubr.msk.bf16.mxu0 %vm182_vm0, %v511_v18  ;;  %437 = vmatprep.mubr.msk.bf16.mxu1 %vm182_vm0, %v513_v19 }
  0x35   :  { %256 = vmatmul.mubr.bf16.gmra.mrb[8].mxu0 %v515_v20  ;;  %288 = vmatmul.mubr.bf16.gmra.mrb[8].mxu1 %v516_v21 }
  0x36   :  { %434 = vmatprep.mubr.msk.bf16.mxu0 %vm182_vm0, %v517_v22  ;;  %438 = vmatprep.mubr.msk.bf16.mxu1 %vm182_vm0, %v519_v23 }
  0x3d   :  { %264 = vmatmul.mubr.bf16.gmra.mrb[12].mxu0 %v521_v24  ;;  %296 = vmatmul.mubr.bf16.gmra.mrb[12].mxu1 %v522_v25 }
  0xf8   :  { %v241_v27 = vpop.f32.mrb[0].mxu0  ;;  %v273_v28 = vpop.f32.mrb[0].mxu1 }
  0xf9   :  { %v242_v29 = vadd.f32 %v630_v26, %v241_v27  ;;  %v274_v30 = vadd.f32 %v630_v26, %v273_v28  ;;  %v243_v31 = vpop.f32.mrb[1].mxu0  ;;  %v275_v32 = vpop.f32.mrb[1].mxu1 }
  0xfa   :  { %v244_v33 = vpop.f32.mrb[2].mxu0  ;;  %v276_v34 = vpop.f32.mrb[2].mxu1 }
  0xfb   :  { %v304_v35 = vmax.f32 %v242_v29, 0.0  ;;  %v312_v36 = vmax.f32 %v274_v30, 0.0  ;;  %v245_v37 = vadd.f32 %v630_v26, %v244_v33  ;;  %v277_v38 = vadd.f32 %v630_v26, %v276_v34  ;;  %v246_v39 = vpop.f32.mrb[3].mxu0  ;;  %v278_v40 = vpop.f32.mrb[3].mxu1 }
  0xfd   :  { %v455_v41 = vpack.c.bf16 %v304_v35, %v304_v35  ;;  %v463_v42 = vpack.c.bf16 %v312_v36, %v312_v36  ;;  %v305_v43 = vmax.f32 %v245_v37, 0.0  ;;  %v313_v44 = vmax.f32 %v277_v38, 0.0 }
  0xff   :  { %385 = vst.msk [vmem:[%s715_s3] sm:$0xf] %vm384_vm1, %v455_v41  ;;  %393 = vst.msk [vmem:[%s715_s3 + $0x20] sm:$0xf] %vm384_vm1, %v463_v42  ;;  %v456_v45 = vpack.c.bf16 %v305_v43, %v305_v43  ;;  %v464_v46 = vpack.c.bf16 %v313_v44, %v313_v44 }
 0x100   :  { %v249_v47 = vpop.f32.mrb[4].mxu0  ;;  %v281_v48 = vpop.f32.mrb[4].mxu1 }
 0x101   :  { %386 = vst.msk [vmem:[%s715_s3 + $0x4] sm:$0xf] %vm384_vm1, %v456_v45  ;;  %394 = vst.msk [vmem:[%s715_s3 + $0x24] sm:$0xf] %vm384_vm1, %v464_v46  ;;  %v250_v49 = vadd.f32 %v630_v26, %v249_v47  ;;  %v282_v50 = vadd.f32 %v630_v26, %v281_v48  ;;  %v251_v51 = vpop.f32.mrb[5].mxu0  ;;  %v283_v52 = vpop.f32.mrb[5].mxu1 }
 0x102   :  { %v252_v53 = vpop.f32.mrb[6].mxu0  ;;  %v284_v54 = vpop.f32.mrb[6].mxu1 }
 0x103   :  { %v306_v55 = vmax.f32 %v250_v49, 0.0  ;;  %v314_v56 = vmax.f32 %v282_v50, 0.0  ;;  %v253_v57 = vadd.f32 %v630_v26, %v252_v53  ;;  %v285_v58 = vadd.f32 %v630_v26, %v284_v54  ;;  %v254_v59 = vpop.f32.mrb[7].mxu0  ;;  %v286_v60 = vpop.f32.mrb[7].mxu1 }
 0x105   :  { %v457_v61 = vpack.c.bf16 %v306_v55, %v306_v55  ;;  %v465_v62 = vpack.c.bf16 %v314_v56, %v314_v56  ;;  %v307_v63 = vmax.f32 %v253_v57, 0.0  ;;  %v315_v0 = vmax.f32 %v285_v58, 0.0 }
 0x107   :  { %387 = vst.msk [vmem:[%s715_s3 + $0x8] sm:$0xf] %vm384_vm1, %v457_v61  ;;  %395 = vst.msk [vmem:[%s715_s3 + $0x28] sm:$0xf] %vm384_vm1, %v465_v62  ;;  %v458_v1 = vpack.c.bf16 %v307_v63, %v307_v63  ;;  %v466_v2 = vpack.c.bf16 %v315_v0, %v315_v0 }
 0x108   :  { %v257_v3 = vpop.f32.mrb[8].mxu0  ;;  %v289_v4 = vpop.f32.mrb[8].mxu1 }
 0x109   :  { %388 = vst.msk [vmem:[%s715_s3 + $0xc] sm:$0xf] %vm384_vm1, %v458_v1  ;;  %396 = vst.msk [vmem:[%s715_s3 + $0x2c] sm:$0xf] %vm384_vm1, %v466_v2  ;;  %v258_v5 = vadd.f32 %v630_v26, %v257_v3  ;;  %v290_v6 = vadd.f32 %v630_v26, %v289_v4  ;;  %v259_v7 = vpop.f32.mrb[9].mxu0  ;;  %v291_v8 = vpop.f32.mrb[9].mxu1 }
 0x10a   :  { %v260_v9 = vpop.f32.mrb[10].mxu0  ;;  %v292_v10 = vpop.f32.mrb[10].mxu1 }
 0x10b   :  { %v308_v11 = vmax.f32 %v258_v5, 0.0  ;;  %v316_v12 = vmax.f32 %v290_v6, 0.0  ;;  %v261_v13 = vadd.f32 %v630_v26, %v260_v9  ;;  %v293_v14 = vadd.f32 %v630_v26, %v292_v10  ;;  %v262_v15 = vpop.f32.mrb[11].mxu0  ;;  %v294_v16 = vpop.f32.mrb[11].mxu1 }
 0x10d   :  { %v459_v17 = vpack.c.bf16 %v308_v11, %v308_v11  ;;  %v467_v18 = vpack.c.bf16 %v316_v12, %v316_v12  ;;  %v309_v19 = vmax.f32 %v261_v13, 0.0  ;;  %v317_v20 = vmax.f32 %v293_v14, 0.0 }
 0x10f   :  { %389 = vst.msk [vmem:[%s715_s3 + $0x10] sm:$0xf] %vm384_vm1, %v459_v17  ;;  %397 = vst.msk [vmem:[%s715_s3 + $0x30] sm:$0xf] %vm384_vm1, %v467_v18  ;;  %v460_v21 = vpack.c.bf16 %v309_v19, %v309_v19  ;;  %v468_v22 = vpack.c.bf16 %v317_v20, %v317_v20 }
 0x110   :  { %v265_v23 = vpop.f32.mrb[12].mxu0  ;;  %v297_v24 = vpop.f32.mrb[12].mxu1 }
 0x111   :  { %390 = vst.msk [vmem:[%s715_s3 + $0x14] sm:$0xf] %vm384_vm1, %v460_v21  ;;  %398 = vst.msk [vmem:[%s715_s3 + $0x34] sm:$0xf] %vm384_vm1, %v468_v22  ;;  %v266_v25 = vadd.f32 %v630_v26, %v265_v23  ;;  %v298_v27 = vadd.f32 %v630_v26, %v297_v24  ;;  %v267_v28 = vpop.f32.mrb[13].mxu0  ;;  %v299_v29 = vpop.f32.mrb[13].mxu1 }
 0x112   :  { %v268_v30 = vpop.f32.mrb[14].mxu0  ;;  %v300_v31 = vpop.f32.mrb[14].mxu1 }
 0x113   :  { %v310_v32 = vmax.f32 %v266_v25, 0.0  ;;  %v318_v33 = vmax.f32 %v298_v27, 0.0  ;;  %v269_v34 = vadd.f32 %v630_v26, %v268_v30  ;;  %v301_v35 = vadd.f32 %v630_v26, %v300_v31  ;;  %v270_v36 = vpop.f32.mrb[15].mxu0  ;;  %v302_v37 = vpop.f32.mrb[15].mxu1 }
 0x115   :  { %v461_v38 = vpack.c.bf16 %v310_v32, %v310_v32  ;;  %v469_v39 = vpack.c.bf16 %v318_v33, %v318_v33  ;;  %v311_v40 = vmax.f32 %v269_v34, 0.0  ;;  %v319_v41 = vmax.f32 %v301_v35, 0.0 }
 0x117   :  { %391 = vst.msk [vmem:[%s715_s3 + $0x18] sm:$0xf] %vm384_vm1, %v461_v38  ;;  %399 = vst.msk [vmem:[%s715_s3 + $0x38] sm:$0xf] %vm384_vm1, %v469_v39  ;;  %v462_v42 = vpack.c.bf16 %v311_v40, %v311_v40  ;;  %v470_v43 = vpack.c.bf16 %v319_v41, %v319_v41 }
 0x119   :  { %392 = vst.msk [vmem:[%s715_s3 + $0x1c] sm:$0xf] %vm384_vm1, %v462_v42  ;;  %400 = vst.msk [vmem:[%s715_s3 + $0x3c] sm:$0xf] %vm384_vm1, %v470_v43 }

// kernel: unet_forward.16
= control target key start
LH: loop header
LB: loop body
LE: loop exit
PB: predicated region body
PF: predicated region fallthrough
CT: control target
= control target key end

     0   :  { %vm318_vm0 = vcmask 261120   ;;  %vm617_vm1 = vcmask 257024   ;;  %s1132_s1 = inlined_call_operand.vmem [shape: bf16[288,32], index: 1, kind: input, shape index: {}]   ;;  %s1133_s0 = inlined_call_operand.vmem [shape: bf16[128,288], index: 0, kind: input, shape index: {}]   ;;  %s1134_s2 = inlined_call_operand.vmem [shape: f32[1,32], index: 2, kind: input, shape index: {}]   ;;  %s1135_s3 = inlined_call_operand.vmem [shape: bf16[128,32], index: 3, kind: output, shape index: {}]  }
   0x1   :  { %v831_v0 = vld [vmem:[%s1132_s1 + $0x40] sm:$0xff]   ;;  %v833_v2 = vld [vmem:[%s1132_s1 + $0x48] sm:$0xff]   ;;  %v835_v4 = vld [vmem:[%s1132_s1 + $0x50] sm:$0xff]  }
   0x2   :  { %v832_v1 = vld [vmem:[%s1132_s1] sm:$0xff]   ;;  %721 = vmatprep.subr.bf16.mxu0 %v831_v0  ;;  %815 = vmatprep.subr.bf16.mxu1 %v831_v0  ;;  %v834_v3 = vld [vmem:[%s1132_s1 + $0x8] sm:$0xff]   ;;  %v836_v5 = vld [vmem:[%s1132_s1 + $0x10] sm:$0xff]  }
   0x3   :  { %722 = vmatpush3.bf16.msra.mxu0 %v832_v1  ;;  %823 = vmatpush3.bf16.msra.mxu1 %v832_v1  ;;  %v837_v6 = vld [vmem:[%s1132_s1 + $0x58] sm:$0xff]   ;;  %v839_v8 = vld [vmem:[%s1132_s1 + $0x60] sm:$0xff]   ;;  %v841_v10 = vld [vmem:[%s1132_s1 + $0x68] sm:$0xff]  }
   0x4   :  { %723 = vmatprep.subr.bf16.mxu0 %v833_v2  ;;  %816 = vmatprep.subr.bf16.mxu1 %v833_v2  ;;  %v838_v7 = vld [vmem:[%s1132_s1 + $0x18] sm:$0xff]   ;;  %v840_v9 = vld [vmem:[%s1132_s1 + $0x20] sm:$0xff]   ;;  %v842_v13 = vld [vmem:[%s1132_s1 + $0x28] sm:$0xff]  }
   0x5   :  { %v849_v11 = vld [vmem:[%s1133_s0 + $0x4] ss:$12 sps:$4 sm:$0xff]   ;;  %v852_v12 = vld [vmem:[%s1133_s0 + $0x94] ss:$12 sps:$4 sm:$0xff]   ;;  %v845_v16 = vld [vmem:[%s1132_s1 + $0x78] sm:$0xff]  }
   0x6   :  { %v843_v14 = vld [vmem:[%s1132_s1 + $0x70] sm:$0xff]   ;;  %375 = vmatprep.mubr.bf16.mxu0 %v849_v11  ;;  %423 = vmatprep.mubr.bf16.mxu1 %v852_v12  ;;  %v846_v17 = vld [vmem:[%s1132_s1 + $0x38] sm:$0xff]   ;;  %v847_v18 = vld [vmem:[%s1133_s0] ss:$12 sps:$4 sm:$0xff]  }
   0x7   :  { %724 = vmatpush3.bf16.msra.mxu0 %v834_v3  ;;  %824 = vmatpush3.bf16.msra.mxu1 %v834_v3  ;;  %v844_v15 = vld [vmem:[%s1132_s1 + $0x30] sm:$0xff]   ;;  %v853_v19 = vld [vmem:[%s1132_s1 + $0x80] sm:$0xff]   ;;  %v854_v21 = vld [vmem:[%s1133_s0 + $0x1c] ss:$12 sps:$4 sm:$0xff]  }
   0x8   :  { %725 = vmatprep.subr.bf16.mxu0 %v835_v4  ;;  %817 = vmatprep.subr.bf16.mxu1 %v835_v4  ;;  %v850_v20 = vld [vmem:[%s1133_s0 + $0x90] ss:$12 sps:$4 sm:$0xff]   ;;  %v856_v22 = vld [vmem:[%s1133_s0 + $0xac] ss:$12 sps:$4 sm:$0xff]   ;;  %v859_v25 = vld [vmem:[%s1133_s0 + $0xa8] ss:$12 sps:$4 sm:$0xff]  }
   0x9   :  { %v860_v23 = vld [vmem:[%s1132_s1 + $0x88] sm:$0xff]   ;;  %v858_v24 = vld [vmem:[%s1133_s0 + $0x18] ss:$12 sps:$4 sm:$0xff]   ;;  %v861_v26 = vld [vmem:[%s1133_s0 + $0x34] ss:$12 sps:$4 sm:$0xff]  }
   0xa   :  { %v863_v27 = vld [vmem:[%s1133_s0 + $0x8] ss:$12 sps:$4 sm:$0xff]   ;;  %v864_v28 = vld [vmem:[%s1133_s0 + $0x30] ss:$12 sps:$4 sm:$0xff]   ;;  %v865_v29 = vld [vmem:[%s1133_s0 + $0x20] ss:$12 sps:$4 sm:$0xff]  }
   0xb   :  { %726 = vmatpush3.bf16.msra.mxu0 %v836_v5  ;;  %825 = vmatpush3.bf16.msra.mxu1 %v836_v5  ;;  %v866_v30 = vld [vmem:[%s1133_s0 + $0x4c] ss:$12 sps:$4 sm:$0xff]   ;;  %v869_v32 = vld [vmem:[%s1133_s0 + $0x48] ss:$12 sps:$4 sm:$0xff]   ;;  %v870_v33 = vld [vmem:[%s1133_s0 + $0x50] ss:$12 sps:$4 sm:$0xff]  }
   0xc   :  { %727 = vmatprep.subr.bf16.mxu0 %v837_v6  ;;  %818 = vmatprep.subr.bf16.mxu1 %v837_v6  ;;  %v868_v31 = vld [vmem:[%s1133_s0 + $0x38] ss:$12 sps:$4 sm:$0xff]   ;;  %v873_v35 = vld [vmem:[%s1133_s0 + $0x68] ss:$12 sps:$4 sm:$0xff]   ;;  %v874_v36 = vld [vmem:[%s1133_s0 + $0x60] ss:$12 sps:$4 sm:$0xff]  }
   0xd   :  { %v871_v34 = vld [vmem:[%s1133_s0 + $0x64] ss:$12 sps:$4 sm:$0xff]   ;;  %v875_v37 = vld [vmem:[%s1133_s0 + $0x80] ss:$12 sps:$4 sm:$0xff]   ;;  %v876_v38 = vld [vmem:[%s1133_s0 + $0x7c] ss:$12 sps:$4 sm:$0xff]  }
   0xe   :  { %v878_v39 = vld [vmem:[%s1133_s0 + $0x98] ss:$12 sps:$4 sm:$0xff]   ;;  %v880_v41 = vld [vmem:[%s1133_s0 + $0xb0] ss:$12 sps:$4 sm:$0xff]   ;;  %v1046_v2 = vld [vmem:[%s1134_s2] ss:$0 sm:$0xff] }
   0xf   :  { %728 = vmatpush3.bf16.msra.mxu0 %v838_v7  ;;  %826 = vmatpush3.bf16.msra.mxu1 %v838_v7  ;;  %v879_v40 = vld [vmem:[%s1133_s0 + $0x78] ss:$12 sps:$4 sm:$0xff]  }
  0x10   :  { %729 = vmatprep.subr.bf16.mxu0 %v839_v8  ;;  %819 = vmatprep.subr.bf16.mxu1 %v839_v8 }
  0x13   :  { %730 = vmatpush3.bf16.msra.mxu0 %v840_v9  ;;  %827 = vmatpush3.bf16.msra.mxu1 %v840_v9 }
  0x14   :  { %731 = vmatprep.subr.bf16.mxu0 %v841_v10  ;;  %820 = vmatprep.subr.bf16.mxu1 %v841_v10 }
  0x17   :  { %732 = vmatpush3.bf16.msra.mxu0 %v842_v13  ;;  %828 = vmatpush3.bf16.msra.mxu1 %v842_v13 }
  0x18   :  { %733 = vmatprep.subr.bf16.mxu0 %v843_v14  ;;  %821 = vmatprep.subr.bf16.mxu1 %v843_v14 }
  0x1b   :  { %734 = vmatpush3.bf16.msra.mxu0 %v844_v15  ;;  %829 = vmatpush3.bf16.msra.mxu1 %v844_v15 }
  0x1c   :  { %735 = vmatprep.subr.bf16.mxu0 %v845_v16  ;;  %822 = vmatprep.subr.bf16.mxu1 %v845_v16 }
  0x1f   :  { %736 = vmatpush3.bf16.msra.mxu0 %v846_v17  ;;  %830 = vmatpush3.bf16.msra.mxu1 %v846_v17 }
  0x20   :  { %795 = vmatprep.subr.bf16.mxu1 %v853_v19 }
  0x22   :  { %376 = vmatmul.mubr.bf16.vlgmr.msra.gmra.mrb[0].mxu0 %v847_v18  ;;  %424 = vmatmul.mubr.bf16.vlgmr.msra.gmra.mrb[0].mxu1 %v850_v20 }
  0x23   :  { %796 = vmatpush3.bf16.msra.mxu1 %v853_v19  ;;  %383 = vmatprep.mubr.bf16.mxu0 %v854_v21 }
  0x24   :  { %431 = vmatprep.mubr.bf16.mxu1 %v856_v22  ;;  %797 = vmatprep.subr.bf16.mxu1 %v860_v23 }
  0x27   :  { %798 = vmatpush3.bf16.msra.mxu1 %v860_v23 }
  0x2a   :  { %384 = vmatmul.mubr.bf16.gmra.mrb[4].mxu0 %v858_v24  ;;  %432 = vmatmul.mubr.bf16.gmra.mrb[4].mxu1 %v859_v25 }
  0x2b   :  { %391 = vmatprep.mubr.bf16.mxu0 %v861_v26  ;;  %799 = vmatprep.mubr.msk.bf16.mxu1 %vm318_vm0, %v863_v27 }
  0x32   :  { %392 = vmatmul.mubr.bf16.gmra.mrb[8].mxu0 %v864_v28  ;;  %800 = vmatmul.mubr.msk.bf16.vlgmr.msra.gmra.mrb[8].mxu1 %vm318_vm0, %v865_v29 }
  0x33   :  { %399 = vmatprep.mubr.bf16.mxu0 %v866_v30  ;;  %803 = vmatprep.mubr.msk.bf16.mxu1 %vm318_vm0, %v868_v31 }
  0x3a   :  { %400 = vmatmul.mubr.bf16.gmra.mrb[12].mxu0 %v869_v32  ;;  %804 = vmatmul.mubr.msk.bf16.gmra.mrb[12].mxu1 %vm318_vm0, %v870_v33 }
  0x3b   :  { %407 = vmatprep.mubr.bf16.mxu0 %v871_v34  ;;  %807 = vmatprep.mubr.msk.bf16.mxu1 %vm318_vm0, %v873_v35 }
  0x42   :  { %408 = vmatmul.mubr.bf16.gmra.mrb[16].mxu0 %v874_v36  ;;  %808 = vmatmul.mubr.msk.bf16.gmra.mrb[16].mxu1 %vm318_vm0, %v875_v37 }
  0x43   :  { %415 = vmatprep.mubr.bf16.mxu0 %v876_v38  ;;  %811 = vmatprep.mubr.msk.bf16.mxu1 %vm318_vm0, %v878_v39 }
  0x4a   :  { %416 = vmatmul.mubr.bf16.gmra.mrb[20].mxu0 %v879_v40  ;;  %812 = vmatmul.mubr.msk.bf16.gmra.mrb[20].mxu1 %vm318_vm0, %v880_v41 }
  0xf5   :  { %v737_v42 = vpop.f32.mrb[0].mxu0  ;;  %v773_v43 = vpop.f32.mrb[0].mxu1 }
  0xf6   :  { %v738_v44 = vpop.f32.mrb[1].mxu0  ;;  %v774_v45 = vpop.f32.mrb[1].mxu1 }
  0xf7   :  { %v739_v46 = vadd.f32 %v738_v44, %v737_v42  ;;  %v740_v47 = vpop.f32.mrb[2].mxu0  ;;  %v1035_v48 = vadd.f32 %v774_v45, %v773_v43  ;;  %v776_v49 = vpop.f32.mrb[2].mxu1 }
  0xf8   :  { %v741_v50 = vpop.f32.mrb[3].mxu0  ;;  %v777_v51 = vpop.f32.mrb[3].mxu1 }
  0xf9   :  { %v742_v52 = vadd.f32 %v741_v50, %v740_v47  ;;  %v1037_v53 = vadd.f32 %v777_v51, %v776_v49  ;;  %v378_v6 = vadd.f32 %v739_v46, %v1046_v2 }
  0xfb   :  { %v381_v15 = vadd.f32 %v742_v52, %v1046_v2 }
  0xfd   :  { %v743_v54 = vpop.f32.mrb[4].mxu0  ;;  %v779_v55 = vpop.f32.mrb[4].mxu1 }
  0xfe   :  { %v744_v56 = vpop.f32.mrb[5].mxu0  ;;  %v780_v57 = vpop.f32.mrb[5].mxu1 }
  0xff   :  { %v745_v58 = vadd.f32 %v744_v56, %v743_v54  ;;  %v746_v59 = vpop.f32.mrb[6].mxu0  ;;  %v1039_v60 = vadd.f32 %v780_v57, %v779_v55  ;;  %v782_v61 = vpop.f32.mrb[6].mxu1 }
 0x100   :  { %v747_v62 = vpop.f32.mrb[7].mxu0  ;;  %v783_v63 = vpop.f32.mrb[7].mxu1 }
 0x101   :  { %v748_v0 = vadd.f32 %v747_v62, %v746_v59  ;;  %v1041_v1 = vadd.f32 %v783_v63, %v782_v61  ;;  %v386_v3 = vadd.f32 %v745_v58, %v1046_v2 }
 0x103   :  { %v389_v10 = vadd.f32 %v748_v0, %v1046_v2 }
 0x105   :  { %v749_v4 = vpop.f32.mrb[8].mxu0  ;;  %v801_v5 = vpop.f32.mrb[8].mxu1 }
 0x106   :  { %v483_v7 = vadd.f32 %v801_v5, %v386_v3  ;;  %v750_v8 = vpop.f32.mrb[9].mxu0  ;;  %v474_v9 = vpop.f32.mrb[9].mxu1 }
 0x107   :  { %v751_v11 = vadd.f32 %v750_v8, %v749_v4  ;;  %v475_v12 = vadd.f32 %v474_v9, %v378_v6  ;;  %v752_v13 = vpop.f32.mrb[10].mxu0  ;;  %v802_v14 = vpop.f32.mrb[10].mxu1  ;;  %v434_v9 = vadd.f32 %v1039_v60, %v1046_v2 }
 0x108   :  { %v539_v16 = vmax.f32 %v483_v7, 0.0  ;;  %v486_v17 = vadd.f32 %v802_v14, %v389_v10  ;;  %v753_v18 = vpop.f32.mrb[11].mxu0  ;;  %v477_v19 = vpop.f32.mrb[11].mxu1  ;;  %v426_v14 = vadd.f32 %v1035_v48, %v1046_v2 }
 0x109   :  { %v537_v20 = vmax.f32 %v475_v12, 0.0  ;;  %v754_v21 = vadd.f32 %v753_v18, %v752_v13  ;;  %v478_v22 = vadd.f32 %v477_v19, %v381_v15  ;;  %v394_v31 = vadd.f32 %v751_v11, %v1046_v2 }
 0x10a   :  { %v707_v23 = vpack.c.bf16 %v539_v16, %v539_v16  ;;  %v540_v24 = vmax.f32 %v486_v17, 0.0  ;;  %v437_v18 = vadd.f32 %v1041_v1, %v1046_v2 }
 0x10b   :  { %v705_v25 = vpack.c.bf16 %v537_v20, %v537_v20  ;;  %v538_v26 = vmax.f32 %v478_v22, 0.0  ;;  %v397_v38 = vadd.f32 %v754_v21, %v1046_v2 }
 0x10c   :  { %620 = vst.msk [vmem:[%s1135_s3 + $0x8] sm:$0xf] %vm617_vm1, %v707_v23  ;;  %v708_v27 = vpack.c.bf16 %v540_v24, %v540_v24 }
 0x10d   :  { %618 = vst.msk [vmem:[%s1135_s3] sm:$0xf] %vm617_vm1, %v705_v25  ;;  %v706_v28 = vpack.c.bf16 %v538_v26, %v538_v26  ;;  %v755_v29 = vpop.f32.mrb[12].mxu0  ;;  %v805_v30 = vpop.f32.mrb[12].mxu1 }
 0x10e   :  { %621 = vst.msk [vmem:[%s1135_s3 + $0xc] sm:$0xf] %vm617_vm1, %v708_v27  ;;  %v756_v32 = vpop.f32.mrb[13].mxu0  ;;  %v490_v33 = vpop.f32.mrb[13].mxu1  ;;  %v429_v27 = vadd.f32 %v1037_v53, %v1046_v2 }
 0x10f   :  { %619 = vst.msk [vmem:[%s1135_s3 + $0x4] sm:$0xf] %vm617_vm1, %v706_v28  ;;  %v757_v34 = vadd.f32 %v756_v32, %v755_v29  ;;  %v491_v35 = vadd.f32 %v490_v33, %v394_v31  ;;  %v758_v36 = vpop.f32.mrb[14].mxu0  ;;  %v806_v37 = vpop.f32.mrb[14].mxu1 }
 0x110   :  { %v759_v39 = vpop.f32.mrb[15].mxu0  ;;  %v493_v40 = vpop.f32.mrb[15].mxu1 }
 0x111   :  { %v402_v41 = vadd.f32 %v757_v34, %v1046_v2  ;;  %v541_v42 = vmax.f32 %v491_v35, 0.0  ;;  %v760_v43 = vadd.f32 %v759_v39, %v758_v36  ;;  %v494_v44 = vadd.f32 %v493_v40, %v397_v38 }
 0x113   :  { %v499_v45 = vadd.f32 %v805_v30, %v402_v41  ;;  %v709_v46 = vpack.c.bf16 %v541_v42, %v541_v42  ;;  %v405_v47 = vadd.f32 %v760_v43, %v1046_v2  ;;  %v542_v49 = vmax.f32 %v494_v44, 0.0 }
 0x115   :  { %v543_v50 = vmax.f32 %v499_v45, 0.0  ;;  %622 = vst.msk [vmem:[%s1135_s3 + $0x10] sm:$0xf] %vm617_vm1, %v709_v46  ;;  %v502_v51 = vadd.f32 %v806_v37, %v405_v47  ;;  %v710_v52 = vpack.c.bf16 %v542_v49, %v542_v49  ;;  %v761_v54 = vpop.f32.mrb[16].mxu0  ;;  %v809_v55 = vpop.f32.mrb[16].mxu1 }
 0x116   :  { %v762_v56 = vpop.f32.mrb[17].mxu0  ;;  %v506_v57 = vpop.f32.mrb[17].mxu1 }
 0x117   :  { %v711_v58 = vpack.c.bf16 %v543_v50, %v543_v50  ;;  %v544_v59 = vmax.f32 %v502_v51, 0.0  ;;  %623 = vst.msk [vmem:[%s1135_s3 + $0x14] sm:$0xf] %vm617_vm1, %v710_v52  ;;  %v763_v61 = vadd.f32 %v762_v56, %v761_v54  ;;  %v764_v62 = vpop.f32.mrb[18].mxu0  ;;  %v810_v63 = vpop.f32.mrb[18].mxu1 }
 0x118   :  { %v765_v0 = vpop.f32.mrb[19].mxu0  ;;  %v509_v3 = vpop.f32.mrb[19].mxu1 }
 0x119   :  { %624 = vst.msk [vmem:[%s1135_s3 + $0x18] sm:$0xf] %vm617_vm1, %v711_v58  ;;  %v712_v4 = vpack.c.bf16 %v544_v59, %v544_v59  ;;  %v410_v5 = vadd.f32 %v763_v61, %v1046_v2  ;;  %v766_v6 = vadd.f32 %v765_v0, %v764_v62 }
 0x11b   :  { %625 = vst.msk [vmem:[%s1135_s3 + $0x1c] sm:$0xf] %vm617_vm1, %v712_v4  ;;  %v507_v7 = vadd.f32 %v506_v57, %v410_v5  ;;  %v413_v8 = vadd.f32 %v766_v6, %v1046_v2 }
 0x11d   :  { %v545_v10 = vmax.f32 %v507_v7, 0.0  ;;  %v510_v11 = vadd.f32 %v509_v3, %v413_v8  ;;  %v767_v12 = vpop.f32.mrb[20].mxu0  ;;  %v813_v13 = vpop.f32.mrb[20].mxu1 }
 0x11e   :  { %v531_v15 = vadd.f32 %v813_v13, %v434_v9  ;;  %v768_v16 = vpop.f32.mrb[21].mxu0  ;;  %v522_v17 = vpop.f32.mrb[21].mxu1 }
 0x11f   :  { %v713_v19 = vpack.c.bf16 %v545_v10, %v545_v10  ;;  %v546_v20 = vmax.f32 %v510_v11, 0.0  ;;  %v769_v21 = vadd.f32 %v768_v16, %v767_v12  ;;  %v523_v22 = vadd.f32 %v522_v17, %v426_v14  ;;  %v770_v23 = vpop.f32.mrb[22].mxu0  ;;  %v814_v24 = vpop.f32.mrb[22].mxu1 }
 0x120   :  { %v551_v60 = vmax.f32 %v531_v15, 0.0  ;;  %v534_v25 = vadd.f32 %v814_v24, %v437_v18  ;;  %v771_v26 = vpop.f32.mrb[23].mxu0  ;;  %v525_v28 = vpop.f32.mrb[23].mxu1 }
 0x121   :  { %626 = vst.msk [vmem:[%s1135_s3 + $0x20] sm:$0xf] %vm617_vm1, %v713_v19  ;;  %v714_v48 = vpack.c.bf16 %v546_v20, %v546_v20  ;;  %v418_v1 = vadd.f32 %v769_v21, %v1046_v2  ;;  %v549_v29 = vmax.f32 %v523_v22, 0.0  ;;  %v772_v30 = vadd.f32 %v771_v26, %v770_v23 }
 0x122   :  { %v719_v31 = vpack.c.bf16 %v551_v60, %v551_v60  ;;  %v552_v32 = vmax.f32 %v534_v25, 0.0  ;;  %v526_v33 = vadd.f32 %v525_v28, %v429_v27 }
 0x123   :  { %627 = vst.msk [vmem:[%s1135_s3 + $0x24] sm:$0xf] %vm617_vm1, %v714_v48  ;;  %v515_v53 = vadd.f32 %v809_v55, %v418_v1  ;;  %v717_v34 = vpack.c.bf16 %v549_v29, %v549_v29  ;;  %v421_v35 = vadd.f32 %v772_v30, %v1046_v2 }
 0x124   :  { %632 = vst.msk [vmem:[%s1135_s3 + $0x38] sm:$0xf] %vm617_vm1, %v719_v31  ;;  %v720_v36 = vpack.c.bf16 %v552_v32, %v552_v32  ;;  %v550_v37 = vmax.f32 %v526_v33, 0.0 }
 0x125   :  { %v547_v38 = vmax.f32 %v515_v53, 0.0  ;;  %630 = vst.msk [vmem:[%s1135_s3 + $0x30] sm:$0xf] %vm617_vm1, %v717_v34  ;;  %v518_v39 = vadd.f32 %v810_v63, %v421_v35 }
 0x126   :  { %633 = vst.msk [vmem:[%s1135_s3 + $0x3c] sm:$0xf] %vm617_vm1, %v720_v36  ;;  %v718_v2 = vpack.c.bf16 %v550_v37, %v550_v37 }
 0x127   :  { %v715_v40 = vpack.c.bf16 %v547_v38, %v547_v38  ;;  %v548_v41 = vmax.f32 %v518_v39, 0.0 }
 0x128   :  { %631 = vst.msk [vmem:[%s1135_s3 + $0x34] sm:$0xf] %vm617_vm1, %v718_v2 }
 0x129   :  { %628 = vst.msk [vmem:[%s1135_s3 + $0x28] sm:$0xf] %vm617_vm1, %v715_v40  ;;  %v716_v42 = vpack.c.bf16 %v548_v41, %v548_v41 }
 0x12b   :  { %629 = vst.msk [vmem:[%s1135_s3 + $0x2c] sm:$0xf] %vm617_vm1, %v716_v42 }

// kernel: unet_forward.17
= control target key start
LH: loop header
LB: loop body
LE: loop exit
PB: predicated region body
PF: predicated region fallthrough
CT: control target
= control target key end

     0   :  { %vm204_vm0 = vcmask 261120   ;;  %vm329_vm1 = vcmask 519168   ;;  %s550_s1 = inlined_call_operand.vmem [shape: bf16[288,64], index: 1, kind: input, shape index: {}]   ;;  %s551_s0 = inlined_call_operand.vmem [shape: bf16[32,288], index: 0, kind: input, shape index: {}]   ;;  %s552_s2 = inlined_call_operand.vmem [shape: f32[1,64], index: 2, kind: input, shape index: {}]   ;;  %s553_s3 = inlined_call_operand.vmem [shape: bf16[32,64], index: 3, kind: output, shape index: {}]  }
   0x1   :  { %v413_v0 = vld [vmem:[%s550_s1 + $0x40] sm:$0xff]   ;;  %v415_v2 = vld [vmem:[%s550_s1 + $0x48] sm:$0xff]   ;;  %v417_v4 = vld [vmem:[%s550_s1 + $0x50] sm:$0xff]  }
   0x2   :  { %v414_v1 = vld [vmem:[%s550_s1] sm:$0xff]   ;;  %373 = vmatprep.subr.bf16.mxu0 %v413_v0  ;;  %v416_v3 = vld [vmem:[%s550_s1 + $0x8] sm:$0xff]   ;;  %v418_v5 = vld [vmem:[%s550_s1 + $0x10] sm:$0xff]  }
   0x3   :  { %374 = vmatpush3.bf16.msra.mxu0 %v414_v1  ;;  %v419_v6 = vld [vmem:[%s550_s1 + $0x58] sm:$0xff]   ;;  %v421_v8 = vld [vmem:[%s550_s1 + $0x60] sm:$0xff]   ;;  %v423_v11 = vld [vmem:[%s550_s1 + $0x68] sm:$0xff]  }
   0x4   :  { %375 = vmatprep.subr.bf16.mxu0 %v415_v2  ;;  %v420_v7 = vld [vmem:[%s550_s1 + $0x18] sm:$0xff]   ;;  %v422_v9 = vld [vmem:[%s550_s1 + $0x20] sm:$0xff]   ;;  %v424_v12 = vld [vmem:[%s550_s1 + $0x28] sm:$0xff]  }
   0x5   :  { %v428_v10 = vld [vmem:[%s550_s1 + $0x80] sm:$0xff]   ;;  %v425_v13 = vld [vmem:[%s550_s1 + $0x70] sm:$0xff]   ;;  %v433_v15 = vld [vmem:[%s550_s1 + $0x88] sm:$0xff]  }
   0x6   :  { %405 = vmatprep.subr.bf16.mxu1 %v428_v10  ;;  %v432_v14 = vld [vmem:[%s551_s0 + $0x4] ss:$12 sps:$4 sm:$0xff]   ;;  %v434_v16 = vld [vmem:[%s551_s0 + $0x8] ss:$12 sps:$4 sm:$0xff]   ;;  %v435_v17 = vld [vmem:[%s551_s0 + $0x20] ss:$12 sps:$4 sm:$0xff]  }
   0x7   :  { %376 = vmatpush3.bf16.msra.mxu0 %v416_v3  ;;  %406 = vmatpush3.bf16.msra.mxu1 %v428_v10  ;;  %v426_v18 = vld [vmem:[%s550_s1 + $0x30] sm:$0xff]   ;;  %v427_v19 = vld [vmem:[%s550_s1 + $0x78] sm:$0xff]   ;;  %v430_v21 = vld [vmem:[%s551_s0] ss:$12 sps:$4 sm:$0xff]  }
   0x8   :  { %377 = vmatprep.subr.bf16.mxu0 %v417_v4  ;;  %243 = vmatprep.mubr.bf16.mxu0 %v432_v14  ;;  %v429_v20 = vld [vmem:[%s550_s1 + $0x38] sm:$0xff]   ;;  %v338_v30 = vld [vmem:[%s552_s2] ss:$0 sm:$0xff] }
   0x9   :  { %407 = vmatprep.subr.bf16.mxu1 %v433_v15  ;;  %409 = vmatprep.mubr.msk.bf16.mxu1 %vm204_vm0, %v434_v16  ;;  %v436_v22 = vld [vmem:[%s551_s0 + $0x1c] ss:$12 sps:$4 sm:$0xff]   ;;  %v438_v23 = vld [vmem:[%s551_s0 + $0x18] ss:$12 sps:$4 sm:$0xff]  }
   0xb   :  { %378 = vmatpush3.bf16.msra.mxu0 %v418_v5  ;;  %408 = vmatpush3.bf16.msra.mxu1 %v433_v15 }
   0xc   :  { %379 = vmatprep.subr.bf16.mxu0 %v419_v6 }
   0xe   :  { %410 = vmatmul.mubr.msk.bf16.vlgmr.msra.gmra.mrb[0].mxu1 %vm204_vm0, %v435_v17 }
   0xf   :  { %380 = vmatpush3.bf16.msra.mxu0 %v420_v7 }
  0x10   :  { %381 = vmatprep.subr.bf16.mxu0 %v421_v8 }
  0x13   :  { %382 = vmatpush3.bf16.msra.mxu0 %v422_v9 }
  0x14   :  { %383 = vmatprep.subr.bf16.mxu0 %v423_v11 }
  0x17   :  { %384 = vmatpush3.bf16.msra.mxu0 %v424_v12 }
  0x18   :  { %385 = vmatprep.subr.bf16.mxu0 %v425_v13 }
  0x1b   :  { %386 = vmatpush3.bf16.msra.mxu0 %v426_v18 }
  0x1c   :  { %387 = vmatprep.subr.bf16.mxu0 %v427_v19 }
  0x1f   :  { %388 = vmatpush3.bf16.msra.mxu0 %v429_v20 }
  0x22   :  { %244 = vmatmul.mubr.bf16.vlgmr.msra.gmra.mrb[0].mxu0 %v430_v21 }
  0x23   :  { %251 = vmatprep.mubr.bf16.mxu0 %v436_v22 }
  0x2a   :  { %252 = vmatmul.mubr.bf16.gmra.mrb[4].mxu0 %v438_v23 }
  0xe1   :  { %v411_v24 = vpop.f32.mrb[0].mxu1 }
  0xe2   :  { %v294_v25 = vpop.f32.mrb[1].mxu1 }
  0xe3   :  { %v412_v26 = vpop.f32.mrb[2].mxu1 }
  0xe4   :  { %v297_v27 = vpop.f32.mrb[3].mxu1 }
  0xf5   :  { %v389_v28 = vpop.f32.mrb[0].mxu0 }
  0xf6   :  { %v390_v29 = vpop.f32.mrb[1].mxu0 }
  0xf7   :  { %v391_v31 = vadd.f32 %v390_v29, %v389_v28  ;;  %v392_v32 = vpop.f32.mrb[2].mxu0 }
  0xf8   :  { %v393_v33 = vpop.f32.mrb[3].mxu0 }
  0xf9   :  { %v394_v34 = vadd.f32 %v393_v33, %v392_v32  ;;  %v246_v35 = vadd.f32 %v391_v31, %v338_v30 }
  0xfb   :  { %v295_v36 = vadd.f32 %v294_v25, %v246_v35  ;;  %v249_v37 = vadd.f32 %v394_v34, %v338_v30 }
  0xfd   :  { %v309_v38 = vmax.f32 %v295_v36, 0.0  ;;  %v298_v39 = vadd.f32 %v297_v27, %v249_v37  ;;  %v395_v40 = vpop.f32.mrb[4].mxu0 }
  0xfe   :  { %v396_v41 = vpop.f32.mrb[5].mxu0 }
  0xff   :  { %v369_v42 = vpack.c.bf16 %v309_v38, %v309_v38  ;;  %v310_v43 = vmax.f32 %v298_v39, 0.0  ;;  %v397_v44 = vadd.f32 %v396_v41, %v395_v40  ;;  %v398_v45 = vpop.f32.mrb[6].mxu0 }
 0x100   :  { %v399_v46 = vpop.f32.mrb[7].mxu0 }
 0x101   :  { %330 = vst.msk [vmem:[%s553_s3] sm:$0xf] %vm329_vm1, %v369_v42  ;;  %v370_v47 = vpack.c.bf16 %v310_v43, %v310_v43  ;;  %v254_v48 = vadd.f32 %v397_v44, %v338_v30  ;;  %v400_v49 = vadd.f32 %v399_v46, %v398_v45 }
 0x103   :  { %331 = vst.msk [vmem:[%s553_s3 + $0x4] sm:$0xf] %vm329_vm1, %v370_v47  ;;  %v303_v50 = vadd.f32 %v411_v24, %v254_v48  ;;  %v257_v51 = vadd.f32 %v400_v49, %v338_v30 }
 0x105   :  { %v311_v52 = vmax.f32 %v303_v50, 0.0  ;;  %v306_v53 = vadd.f32 %v412_v26, %v257_v51 }
 0x107   :  { %v371_v54 = vpack.c.bf16 %v311_v52, %v311_v52  ;;  %v312_v55 = vmax.f32 %v306_v53, 0.0 }
 0x109   :  { %332 = vst.msk [vmem:[%s553_s3 + $0x8] sm:$0xf] %vm329_vm1, %v371_v54  ;;  %v372_v56 = vpack.c.bf16 %v312_v55, %v312_v55 }
 0x10b   :  { %333 = vst.msk [vmem:[%s553_s3 + $0xc] sm:$0xf] %vm329_vm1, %v372_v56 }

// kernel: unet_forward.19
= control target key start
LH: loop header
LB: loop body
LE: loop exit
PB: predicated region body
PF: predicated region fallthrough
CT: control target
= control target key end

     0   :  { %vm68_vm0 = vcmask 523264   ;;  %s247_s1 = inlined_call_operand.vmem [shape: bf16[64,128], index: 1, kind: input, shape index: {}]   ;;  %s248_s0 = inlined_call_operand.vmem [shape: bf16[32,64], index: 0, kind: input, shape index: {}]   ;;  %s249_s2 = inlined_call_operand.vmem [shape: f32[1,128], index: 2, kind: input, shape index: {}]   ;;  %s250_s3 = inlined_call_operand.vmem [shape: bf16[32,128], index: 3, kind: output, shape index: {}]  }
   0x1   :  { %v194_v0 = vld [vmem:[%s247_s1] sm:$0xff]   ;;  %v195_v1 = vld [vmem:[%s247_s1 + $0x8] sm:$0xff]   ;;  %v196_v2 = vld [vmem:[%s247_s1 + $0x10] sm:$0xff]  }
   0x2   :  { %182 = vmatprep.subr.bf16.mxu0 %v194_v0  ;;  %v198_v3 = vld [vmem:[%s248_s0] sm:$0xff]   ;;  %v197_v4 = vld [vmem:[%s247_s1 + $0x18] sm:$0xff]   ;;  %v199_v5 = vld [vmem:[%s248_s0 + $0x8] sm:$0xff]  }
   0x3   :  { %183 = vmatpush3.bf16.msra.mxu0 %v194_v0  ;;  %190 = vmatprep.mubr.msk.bf16.mxu0 %vm68_vm0, %v198_v3  ;;  %v148_v7 = vld [vmem:[%s249_s2] ss:$0 sm:$0xff] }
   0x4   :  { %184 = vmatprep.subr.bf16.mxu0 %v195_v1 }
   0x7   :  { %185 = vmatpush3.bf16.msra.mxu0 %v195_v1 }
   0x8   :  { %186 = vmatprep.subr.bf16.mxu0 %v196_v2 }
   0xb   :  { %187 = vmatpush3.bf16.msra.mxu0 %v196_v2 }
   0xc   :  { %188 = vmatprep.subr.bf16.mxu0 %v197_v4 }
   0xf   :  { %189 = vmatpush3.bf16.msra.mxu0 %v197_v4 }
  0x12   :  { %191 = vmatmul.mubr.msk.bf16.vlgmr.msra.gmra.mrb[0].mxu0 %vm68_vm0, %v199_v5 }
  0xe5   :  { %v192_v6 = vpop.f32.mrb[0].mxu0 }
  0xe6   :  { %v109_v8 = vpop.f32.mrb[1].mxu0  ;;  %v118_v10 = vadd.f32 %v192_v6, %v148_v7 }
  0xe7   :  { %v193_v9 = vpop.f32.mrb[2].mxu0  ;;  %v110_v13 = vadd.f32 %v148_v7, %v109_v8 }
  0xe8   :  { %v121_v11 = vadd.f32 %v193_v9, %v148_v7  ;;  %v112_v12 = vpop.f32.mrb[3].mxu0 }
  0xe9   :  { %v113_v14 = vadd.f32 %v148_v7, %v112_v12 }
  0xea   :  { %v173_v15 = vpack.c.bf16 %v121_v11, %v118_v10 }
  0xeb   :  { %v168_v16 = vpack.c.bf16 %v113_v14, %v110_v13 }
  0xec   :  { %175 = vst [vmem:[%s250_s3 + $0x8] sm:$0xff] %v173_v15  }
  0xed   :  { %169 = vst [vmem:[%s250_s3] sm:$0xff] %v168_v16  }

// kernel: unet_forward.18
= control target key start
LH: loop header
LB: loop body
LE: loop exit
PB: predicated region body
PF: predicated region fallthrough
CT: control target
= control target key end

     0   :  { %vm372_vm0 = vcmask 523264   ;;  %vm546_vm1 = vcmask 519168   ;;  %s909_s1 = inlined_call_operand.vmem [shape: bf16[576,64], index: 1, kind: input, shape index: {}]   ;;  %s910_s0 = inlined_call_operand.vmem [shape: bf16[32,576], index: 0, kind: input, shape index: {}]   ;;  %s911_s2 = inlined_call_operand.vmem [shape: f32[1,64], index: 2, kind: input, shape index: {}]   ;;  %s912_s3 = inlined_call_operand.vmem [shape: bf16[32,64], index: 3, kind: output, shape index: {}]  }
   0x1   :  { %v686_v0 = vld [vmem:[%s909_s1 + $0x40] sm:$0xff]   ;;  %v690_v4 = vld [vmem:[%s909_s1 + $0x48] sm:$0xff]   ;;  %v694_v8 = vld [vmem:[%s909_s1 + $0x50] sm:$0xff]  }
   0x2   :  { %v687_v1 = vld [vmem:[%s909_s1] sm:$0xff]   ;;  %612 = vmatprep.subr.bf16.mxu0 %v686_v0  ;;  %v691_v5 = vld [vmem:[%s909_s1 + $0x8] sm:$0xff]   ;;  %v695_v9 = vld [vmem:[%s909_s1 + $0x10] sm:$0xff]  }
   0x3   :  { %v688_v2 = vld [vmem:[%s909_s1 + $0xc0] sm:$0xff]   ;;  %613 = vmatpush3.bf16.msra.mxu0 %v687_v1  ;;  %v692_v6 = vld [vmem:[%s909_s1 + $0xc8] sm:$0xff]   ;;  %v696_v10 = vld [vmem:[%s909_s1 + $0xd0] sm:$0xff]  }
   0x4   :  { %v689_v3 = vld [vmem:[%s909_s1 + $0x80] sm:$0xff]   ;;  %640 = vmatprep.subr.bf16.mxu1 %v688_v2  ;;  %614 = vmatprep.subr.bf16.mxu0 %v690_v4  ;;  %v693_v7 = vld [vmem:[%s909_s1 + $0x88] sm:$0xff]   ;;  %v697_v11 = vld [vmem:[%s909_s1 + $0x90] sm:$0xff]  }
   0x5   :  { %641 = vmatpush3.bf16.msra.mxu1 %v689_v3  ;;  %v698_v12 = vld [vmem:[%s909_s1 + $0x58] sm:$0xff]   ;;  %v702_v16 = vld [vmem:[%s909_s1 + $0x60] sm:$0xff]   ;;  %v706_v20 = vld [vmem:[%s909_s1 + $0x68] sm:$0xff]  }
   0x6   :  { %642 = vmatprep.subr.bf16.mxu1 %v692_v6  ;;  %v699_v13 = vld [vmem:[%s909_s1 + $0x18] sm:$0xff]   ;;  %v703_v17 = vld [vmem:[%s909_s1 + $0x20] sm:$0xff]   ;;  %v707_v21 = vld [vmem:[%s909_s1 + $0x28] sm:$0xff]  }
   0x7   :  { %615 = vmatpush3.bf16.msra.mxu0 %v691_v5  ;;  %v700_v14 = vld [vmem:[%s909_s1 + $0xd8] sm:$0xff]   ;;  %v704_v18 = vld [vmem:[%s909_s1 + $0xe0] sm:$0xff]   ;;  %v708_v22 = vld [vmem:[%s909_s1 + $0xe8] sm:$0xff]  }
   0x8   :  { %616 = vmatprep.subr.bf16.mxu0 %v694_v8  ;;  %v701_v15 = vld [vmem:[%s909_s1 + $0x98] sm:$0xff]   ;;  %v705_v19 = vld [vmem:[%s909_s1 + $0xa0] sm:$0xff]   ;;  %v709_v23 = vld [vmem:[%s909_s1 + $0xa8] sm:$0xff]  }
   0x9   :  { %643 = vmatpush3.bf16.msra.mxu1 %v693_v7  ;;  %v710_v24 = vld [vmem:[%s909_s1 + $0x70] sm:$0xff]   ;;  %v714_v28 = vld [vmem:[%s909_s1 + $0x78] sm:$0xff]   ;;  %v721_v34 = vld [vmem:[%s909_s1 + $0x100] sm:$0xff]  }
   0xa   :  { %644 = vmatprep.subr.bf16.mxu1 %v696_v10  ;;  %v711_v25 = vld [vmem:[%s909_s1 + $0x30] sm:$0xff]   ;;  %v715_v29 = vld [vmem:[%s909_s1 + $0x38] sm:$0xff]   ;;  %v724_v36 = vld [vmem:[%s910_s0 + $0xc] ss:$20 sps:$4 sm:$0xff]  }
   0xb   :  { %617 = vmatpush3.bf16.msra.mxu0 %v695_v9  ;;  %v712_v26 = vld [vmem:[%s909_s1 + $0xf0] sm:$0xff]   ;;  %v716_v30 = vld [vmem:[%s909_s1 + $0xf8] sm:$0xff]   ;;  %v725_v37 = vld [vmem:[%s909_s1 + $0x108] sm:$0xff]   ;;  %460 = vmatprep.mubr.bf16.mxu1 %v724_v36 }
   0xc   :  { %618 = vmatprep.subr.bf16.mxu0 %v698_v12  ;;  %v713_v27 = vld [vmem:[%s909_s1 + $0xb0] sm:$0xff]   ;;  %v719_v32 = vld [vmem:[%s910_s0 + $0x4] ss:$20 sps:$4 sm:$0xff]   ;;  %v722_v35 = vld [vmem:[%s910_s0 + $0x8] ss:$20 sps:$4 sm:$0xff]  }
   0xd   :  { %645 = vmatpush3.bf16.msra.mxu1 %v697_v11  ;;  %v717_v31 = vld [vmem:[%s910_s0] ss:$20 sps:$4 sm:$0xff]   ;;  %v720_v33 = vld [vmem:[%s909_s1 + $0xb8] sm:$0xff]   ;;  %411 = vmatprep.mubr.bf16.mxu0 %v719_v32  ;;  %v732_v42 = vld [vmem:[%s910_s0 + $0x30] ss:$20 sps:$4 sm:$0xff]  }
   0xe   :  { %646 = vmatprep.subr.bf16.mxu1 %v700_v14  ;;  %v726_v38 = vld [vmem:[%s910_s0 + $0x2c] ss:$20 sps:$4 sm:$0xff]   ;;  %v728_v39 = vld [vmem:[%s910_s0 + $0x28] ss:$20 sps:$4 sm:$0xff]   ;;  %v729_v40 = vld [vmem:[%s909_s1 + $0x110] sm:$0xff]  }
   0xf   :  { %619 = vmatpush3.bf16.msra.mxu0 %v699_v13  ;;  %v730_v41 = vld [vmem:[%s910_s0 + $0x34] ss:$20 sps:$4 sm:$0xff]   ;;  %v733_v43 = vld [vmem:[%s909_s1 + $0x118] sm:$0xff]   ;;  %v734_v44 = vld [vmem:[%s910_s0 + $0x10] ss:$20 sps:$4 sm:$0xff]  }
  0x10   :  { %620 = vmatprep.subr.bf16.mxu0 %v702_v16  ;;  %v735_v45 = vld [vmem:[%s910_s0 + $0x38] ss:$20 sps:$4 sm:$0xff]   ;;  %v555_v47 = vld [vmem:[%s911_s2] ss:$0 sm:$0xff] }
  0x11   :  { %647 = vmatpush3.bf16.msra.mxu1 %v701_v15 }
  0x12   :  { %648 = vmatprep.subr.bf16.mxu1 %v704_v18 }
  0x13   :  { %621 = vmatpush3.bf16.msra.mxu0 %v703_v17 }
  0x14   :  { %622 = vmatprep.subr.bf16.mxu0 %v706_v20 }
  0x15   :  { %649 = vmatpush3.bf16.msra.mxu1 %v705_v19 }
  0x16   :  { %650 = vmatprep.subr.bf16.mxu1 %v708_v22 }
  0x17   :  { %623 = vmatpush3.bf16.msra.mxu0 %v707_v21 }
  0x18   :  { %624 = vmatprep.subr.bf16.mxu0 %v710_v24 }
  0x19   :  { %651 = vmatpush3.bf16.msra.mxu1 %v709_v23 }
  0x1a   :  { %652 = vmatprep.subr.bf16.mxu1 %v712_v26 }
  0x1b   :  { %625 = vmatpush3.bf16.msra.mxu0 %v711_v25 }
  0x1c   :  { %626 = vmatprep.subr.bf16.mxu0 %v714_v28 }
  0x1d   :  { %653 = vmatpush3.bf16.msra.mxu1 %v713_v27 }
  0x1e   :  { %654 = vmatprep.subr.bf16.mxu1 %v716_v30 }
  0x1f   :  { %627 = vmatpush3.bf16.msra.mxu0 %v715_v29 }
  0x20   :  { %674 = vmatprep.subr.bf16.mxu0 %v721_v34 }
  0x21   :  { %655 = vmatpush3.bf16.msra.mxu1 %v720_v33 }
  0x22   :  { %412 = vmatmul.mubr.bf16.vlgmr.msra.gmra.mrb[0].mxu0 %v717_v31 }
  0x23   :  { %675 = vmatpush3.bf16.msra.mxu0 %v721_v34  ;;  %419 = vmatprep.mubr.bf16.mxu0 %v726_v38 }
  0x24   :  { %461 = vmatmul.mubr.bf16.vlgmr.msra.gmra.mrb[0].mxu1 %v722_v35  ;;  %676 = vmatprep.subr.bf16.mxu0 %v725_v37 }
  0x25   :  { %468 = vmatprep.mubr.bf16.mxu1 %v730_v41 }
  0x27   :  { %677 = vmatpush3.bf16.msra.mxu0 %v725_v37 }
  0x28   :  { %678 = vmatprep.subr.bf16.mxu0 %v729_v40 }
  0x2a   :  { %420 = vmatmul.mubr.bf16.gmra.mrb[4].mxu0 %v728_v39 }
  0x2b   :  { %682 = vmatprep.mubr.msk.bf16.mxu0 %vm372_vm0, %v734_v44  ;;  %679 = vmatpush3.bf16.msra.mxu0 %v729_v40 }
  0x2c   :  { %469 = vmatmul.mubr.bf16.gmra.mrb[4].mxu1 %v732_v42  ;;  %680 = vmatprep.subr.bf16.mxu0 %v733_v43 }
  0x2f   :  { %681 = vmatpush3.bf16.msra.mxu0 %v733_v43 }
  0x32   :  { %683 = vmatmul.mubr.msk.bf16.vlgmr.msra.gmra.mrb[8].mxu0 %vm372_vm0, %v735_v45 }
  0xf5   :  { %v628_v46 = vpop.f32.mrb[0].mxu0 }
  0xf6   :  { %v629_v48 = vpop.f32.mrb[1].mxu0 }
  0xf7   :  { %v630_v49 = vadd.f32 %v629_v48, %v628_v46  ;;  %v631_v50 = vpop.f32.mrb[2].mxu0  ;;  %v656_v51 = vpop.f32.mrb[0].mxu1 }
  0xf8   :  { %v632_v52 = vpop.f32.mrb[3].mxu0  ;;  %v657_v55 = vpop.f32.mrb[1].mxu1 }
  0xf9   :  { %v414_v53 = vadd.f32 %v630_v49, %v555_v47  ;;  %v633_v54 = vadd.f32 %v632_v52, %v631_v50  ;;  %v658_v56 = vadd.f32 %v657_v55, %v656_v51  ;;  %v659_v57 = vpop.f32.mrb[2].mxu1 }
  0xfa   :  { %v660_v59 = vpop.f32.mrb[3].mxu1 }
  0xfb   :  { %v417_v58 = vadd.f32 %v633_v54, %v555_v47  ;;  %v661_v60 = vadd.f32 %v660_v59, %v659_v57  ;;  %v463_v61 = vadd.f32 %v658_v56, %v414_v53 }
  0xfd   :  { %v634_v62 = vpop.f32.mrb[4].mxu0  ;;  %v466_v0 = vadd.f32 %v661_v60, %v417_v58 }
  0xfe   :  { %v635_v63 = vpop.f32.mrb[5].mxu0 }
  0xff   :  { %v636_v1 = vadd.f32 %v635_v63, %v634_v62  ;;  %v637_v2 = vpop.f32.mrb[6].mxu0  ;;  %v662_v3 = vpop.f32.mrb[4].mxu1 }
 0x100   :  { %v638_v4 = vpop.f32.mrb[7].mxu0  ;;  %v663_v7 = vpop.f32.mrb[5].mxu1 }
 0x101   :  { %v422_v5 = vadd.f32 %v636_v1, %v555_v47  ;;  %v639_v6 = vadd.f32 %v638_v4, %v637_v2  ;;  %v664_v8 = vadd.f32 %v663_v7, %v662_v3  ;;  %v665_v9 = vpop.f32.mrb[6].mxu1 }
 0x102   :  { %v666_v11 = vpop.f32.mrb[7].mxu1 }
 0x103   :  { %v425_v10 = vadd.f32 %v639_v6, %v555_v47  ;;  %v667_v12 = vadd.f32 %v666_v11, %v665_v9  ;;  %v471_v13 = vadd.f32 %v664_v8, %v422_v5 }
 0x105   :  { %v684_v14 = vpop.f32.mrb[8].mxu0  ;;  %v474_v15 = vadd.f32 %v667_v12, %v425_v10 }
 0x106   :  { %v520_v16 = vadd.f32 %v684_v14, %v471_v13  ;;  %v511_v17 = vpop.f32.mrb[9].mxu0 }
 0x107   :  { %v512_v18 = vadd.f32 %v511_v17, %v463_v61  ;;  %v685_v19 = vpop.f32.mrb[10].mxu0 }
 0x108   :  { %v528_v20 = vmax.f32 %v520_v16, 0.0  ;;  %v523_v21 = vadd.f32 %v685_v19, %v474_v15  ;;  %v514_v22 = vpop.f32.mrb[11].mxu0 }
 0x109   :  { %v526_v23 = vmax.f32 %v512_v18, 0.0  ;;  %v515_v24 = vadd.f32 %v514_v22, %v466_v0 }
 0x10a   :  { %v610_v25 = vpack.c.bf16 %v528_v20, %v528_v20  ;;  %v529_v26 = vmax.f32 %v523_v21, 0.0 }
 0x10b   :  { %v608_v27 = vpack.c.bf16 %v526_v23, %v526_v23  ;;  %v527_v28 = vmax.f32 %v515_v24, 0.0 }
 0x10c   :  { %549 = vst.msk [vmem:[%s912_s3 + $0x8] sm:$0xf] %vm546_vm1, %v610_v25  ;;  %v611_v29 = vpack.c.bf16 %v529_v26, %v529_v26 }
 0x10d   :  { %547 = vst.msk [vmem:[%s912_s3] sm:$0xf] %vm546_vm1, %v608_v27  ;;  %v609_v30 = vpack.c.bf16 %v527_v28, %v527_v28 }
 0x10e   :  { %550 = vst.msk [vmem:[%s912_s3 + $0xc] sm:$0xf] %vm546_vm1, %v611_v29 }
 0x10f   :  { %548 = vst.msk [vmem:[%s912_s3 + $0x4] sm:$0xf] %vm546_vm1, %v609_v30 }

// kernel: unet_forward.22
= control target key start
LH: loop header
LB: loop body
LE: loop exit
PB: predicated region body
PF: predicated region fallthrough
CT: control target
= control target key end

     0   :  { %vm94_vm0 = vcmask 261120   ;;  %vm280_vm1 = vcmask 519168   ;;  %s521_s1 = inlined_call_operand.vmem [shape: bf16[32,64], index: 1, kind: input, shape index: {}]   ;;  %s522_s0 = inlined_call_operand.vmem [shape: bf16[128,32], index: 0, kind: input, shape index: {}]   ;;  %s523_s2 = inlined_call_operand.vmem [shape: f32[1,64], index: 2, kind: input, shape index: {}]   ;;  %s524_s3 = inlined_call_operand.vmem [shape: bf16[128,64], index: 3, kind: output, shape index: {}]  }
   0x1   :  { %v386_v0 = vld [vmem:[%s521_s1] sm:$0xff]   ;;  %v387_v1 = vld [vmem:[%s521_s1 + $0x8] sm:$0xff]   ;;  %v392_v6 = vld [vmem:[%s522_s0 + $0x10] sm:$0xff]  }
   0x2   :  { %362 = vmatprep.subr.bf16.mxu0 %v386_v0  ;;  %382 = vmatprep.subr.bf16.mxu1 %v386_v0  ;;  %v388_v2 = vld [vmem:[%s522_s0] sm:$0xff]   ;;  %v390_v4 = vld [vmem:[%s522_s0 + $0x8] sm:$0xff]   ;;  %v393_v7 = vld [vmem:[%s522_s0 + $0x30] sm:$0xff]  }
   0x3   :  { %363 = vmatpush3.bf16.msra.mxu0 %v386_v0  ;;  %384 = vmatpush3.bf16.msra.mxu1 %v386_v0  ;;  %v389_v3 = vld [vmem:[%s522_s0 + $0x20] sm:$0xff]   ;;  %v391_v5 = vld [vmem:[%s522_s0 + $0x28] sm:$0xff]   ;;  %v394_v8 = vld [vmem:[%s522_s0 + $0x18] sm:$0xff]  }
   0x4   :  { %364 = vmatprep.subr.bf16.mxu0 %v387_v1  ;;  %383 = vmatprep.subr.bf16.mxu1 %v387_v1  ;;  %v395_v9 = vld [vmem:[%s522_s0 + $0x38] sm:$0xff]   ;;  %v301_v10 = vld [vmem:[%s523_s2] ss:$0 sm:$0xff] }
   0x5   :  { %366 = vmatprep.mubr.msk.bf16.mxu0 %vm94_vm0, %v388_v2  ;;  %374 = vmatprep.mubr.msk.bf16.mxu1 %vm94_vm0, %v389_v3 }
   0x7   :  { %365 = vmatpush3.bf16.msra.mxu0 %v387_v1  ;;  %385 = vmatpush3.bf16.msra.mxu1 %v387_v1 }
   0xa   :  { %367 = vmatmul.mubr.msk.bf16.vlgmr.msra.gmra.mrb[0].mxu0 %vm94_vm0, %v390_v4  ;;  %375 = vmatmul.mubr.msk.bf16.vlgmr.msra.gmra.mrb[0].mxu1 %vm94_vm0, %v391_v5 }
   0xb   :  { %370 = vmatprep.mubr.msk.bf16.mxu0 %vm94_vm0, %v392_v6  ;;  %378 = vmatprep.mubr.msk.bf16.mxu1 %vm94_vm0, %v393_v7 }
  0x12   :  { %371 = vmatmul.mubr.msk.bf16.gmra.mrb[4].mxu0 %vm94_vm0, %v394_v8  ;;  %379 = vmatmul.mubr.msk.bf16.gmra.mrb[4].mxu1 %vm94_vm0, %v395_v9 }
  0xdd   :  { %v368_v11 = vpop.f32.mrb[0].mxu0  ;;  %v376_v12 = vpop.f32.mrb[0].mxu1 }
  0xde   :  { %v162_v13 = vadd.f32 %v368_v11, %v301_v10  ;;  %v194_v14 = vadd.f32 %v376_v12, %v301_v10  ;;  %v153_v15 = vpop.f32.mrb[1].mxu0  ;;  %v185_v16 = vpop.f32.mrb[1].mxu1 }
  0xdf   :  { %v154_v17 = vadd.f32 %v301_v10, %v153_v15  ;;  %v186_v18 = vadd.f32 %v301_v10, %v185_v16  ;;  %v369_v19 = vpop.f32.mrb[2].mxu0  ;;  %v377_v20 = vpop.f32.mrb[2].mxu1 }
  0xe0   :  { %v338_v21 = vpack.c.bf16 %v162_v13, %v162_v13  ;;  %v346_v22 = vpack.c.bf16 %v194_v14, %v194_v14  ;;  %v165_v23 = vadd.f32 %v369_v19, %v301_v10  ;;  %v197_v24 = vadd.f32 %v377_v20, %v301_v10  ;;  %v156_v25 = vpop.f32.mrb[3].mxu0  ;;  %v188_v26 = vpop.f32.mrb[3].mxu1 }
  0xe1   :  { %v336_v27 = vpack.c.bf16 %v154_v17, %v154_v17  ;;  %v344_v28 = vpack.c.bf16 %v186_v18, %v186_v18  ;;  %v157_v29 = vadd.f32 %v301_v10, %v156_v25  ;;  %v189_v30 = vadd.f32 %v301_v10, %v188_v26 }
  0xe2   :  { %283 = vst.msk [vmem:[%s524_s3 + $0x8] sm:$0xf] %vm280_vm1, %v338_v21  ;;  %291 = vst.msk [vmem:[%s524_s3 + $0x28] sm:$0xf] %vm280_vm1, %v346_v22  ;;  %v339_v31 = vpack.c.bf16 %v165_v23, %v165_v23  ;;  %v347_v32 = vpack.c.bf16 %v197_v24, %v197_v24 }
  0xe3   :  { %281 = vst.msk [vmem:[%s524_s3] sm:$0xf] %vm280_vm1, %v336_v27  ;;  %289 = vst.msk [vmem:[%s524_s3 + $0x20] sm:$0xf] %vm280_vm1, %v344_v28  ;;  %v337_v33 = vpack.c.bf16 %v157_v29, %v157_v29  ;;  %v345_v34 = vpack.c.bf16 %v189_v30, %v189_v30 }
  0xe4   :  { %284 = vst.msk [vmem:[%s524_s3 + $0xc] sm:$0xf] %vm280_vm1, %v339_v31  ;;  %292 = vst.msk [vmem:[%s524_s3 + $0x2c] sm:$0xf] %vm280_vm1, %v347_v32 }
  0xe5   :  { %282 = vst.msk [vmem:[%s524_s3 + $0x4] sm:$0xf] %vm280_vm1, %v337_v33  ;;  %290 = vst.msk [vmem:[%s524_s3 + $0x24] sm:$0xf] %vm280_vm1, %v345_v34  ;;  %v372_v35 = vpop.f32.mrb[4].mxu0  ;;  %v380_v36 = vpop.f32.mrb[4].mxu1 }
  0xe6   :  { %v178_v37 = vadd.f32 %v372_v35, %v301_v10  ;;  %v210_v38 = vadd.f32 %v380_v36, %v301_v10  ;;  %v169_v39 = vpop.f32.mrb[5].mxu0  ;;  %v201_v40 = vpop.f32.mrb[5].mxu1 }
  0xe7   :  { %v170_v41 = vadd.f32 %v301_v10, %v169_v39  ;;  %v202_v42 = vadd.f32 %v301_v10, %v201_v40  ;;  %v373_v43 = vpop.f32.mrb[6].mxu0  ;;  %v381_v44 = vpop.f32.mrb[6].mxu1 }
  0xe8   :  { %v342_v45 = vpack.c.bf16 %v178_v37, %v178_v37  ;;  %v350_v46 = vpack.c.bf16 %v210_v38, %v210_v38  ;;  %v181_v47 = vadd.f32 %v373_v43, %v301_v10  ;;  %v213_v48 = vadd.f32 %v381_v44, %v301_v10  ;;  %v172_v49 = vpop.f32.mrb[7].mxu0  ;;  %v204_v50 = vpop.f32.mrb[7].mxu1 }
  0xe9   :  { %v340_v51 = vpack.c.bf16 %v170_v41, %v170_v41  ;;  %v348_v52 = vpack.c.bf16 %v202_v42, %v202_v42  ;;  %v173_v53 = vadd.f32 %v301_v10, %v172_v49  ;;  %v205_v54 = vadd.f32 %v301_v10, %v204_v50 }
  0xea   :  { %287 = vst.msk [vmem:[%s524_s3 + $0x18] sm:$0xf] %vm280_vm1, %v342_v45  ;;  %295 = vst.msk [vmem:[%s524_s3 + $0x38] sm:$0xf] %vm280_vm1, %v350_v46  ;;  %v343_v55 = vpack.c.bf16 %v181_v47, %v181_v47  ;;  %v351_v56 = vpack.c.bf16 %v213_v48, %v213_v48 }
  0xeb   :  { %285 = vst.msk [vmem:[%s524_s3 + $0x10] sm:$0xf] %vm280_vm1, %v340_v51  ;;  %293 = vst.msk [vmem:[%s524_s3 + $0x30] sm:$0xf] %vm280_vm1, %v348_v52  ;;  %v341_v57 = vpack.c.bf16 %v173_v53, %v173_v53  ;;  %v349_v58 = vpack.c.bf16 %v205_v54, %v205_v54 }
  0xec   :  { %288 = vst.msk [vmem:[%s524_s3 + $0x1c] sm:$0xf] %vm280_vm1, %v343_v55  ;;  %296 = vst.msk [vmem:[%s524_s3 + $0x3c] sm:$0xf] %vm280_vm1, %v351_v56 }
  0xed   :  { %286 = vst.msk [vmem:[%s524_s3 + $0x14] sm:$0xf] %vm280_vm1, %v341_v57  ;;  %294 = vst.msk [vmem:[%s524_s3 + $0x34] sm:$0xf] %vm280_vm1, %v349_v58 }

// kernel: unet_forward.20
= control target key start
LH: loop header
LB: loop body
LE: loop exit
PB: predicated region body
PF: predicated region fallthrough
CT: control target
= control target key end

     0   :  { %vm385_vm0 = vcmask 261120   ;;  %vm1153_vm1 = vcmask 257024   ;;  %s2108_s3 = inlined_call_operand.vmem [shape: bf16[288,32], index: 3, kind: input, shape index: {}]   ;;  %s2109_s2 = inlined_call_operand.vmem [shape: bf16[128,288], index: 2, kind: input, shape index: {}]   ;;  %s2110_s1 = inlined_call_operand.vmem [shape: bf16[288,32], index: 1, kind: input, shape index: {}]   ;;  %s2111_s0 = inlined_call_operand.vmem [shape: bf16[128,288], index: 0, kind: input, shape index: {}]   ;;  %s2112_s4 = inlined_call_operand.vmem [shape: f32[1,32], index: 4, kind: input, shape index: {}]   ;;  %s2113_s5 = inlined_call_operand.vmem [shape: bf16[128,32], index: 5, kind: output, shape index: {}]  }
   0x1   :  { %v1559_v0 = vld [vmem:[%s2108_s3 + $0x40] sm:$0xff]   ;;  %v1562_v3 = vld [vmem:[%s2108_s3 + $0x48] sm:$0xff]   ;;  %v1566_v7 = vld [vmem:[%s2108_s3 + $0x50] sm:$0xff]  }
   0x2   :  { %v1560_v1 = vld [vmem:[%s2108_s3 + $0x80] sm:$0xff]   ;;  %1307 = vmatprep.subr.bf16.mxu0 %v1559_v0  ;;  %v1563_v4 = vld [vmem:[%s2108_s3 + $0x88] sm:$0xff]   ;;  %v1569_v10 = vld [vmem:[%s2108_s3 + $0x10] sm:$0xff]  }
   0x3   :  { %v1561_v2 = vld [vmem:[%s2108_s3] sm:$0xff]   ;;  %1455 = vmatprep.subr.bf16.mxu1 %v1560_v1  ;;  %v1564_v5 = vld [vmem:[%s2108_s3 + $0x8] sm:$0xff]   ;;  %v1571_v12 = vld [vmem:[%s2108_s3 + $0x58] sm:$0xff]  }
   0x4   :  { %1308 = vmatpush3.bf16.msra.mxu0 %v1561_v2  ;;  %1456 = vmatpush3.bf16.msra.mxu1 %v1560_v1  ;;  %v1565_v6 = vld [vmem:[%s2109_s2 + $0x8] ss:$12 sps:$4 sm:$0xff]   ;;  %v1567_v8 = vld [vmem:[%s2109_s2 + $0x20] ss:$12 sps:$4 sm:$0xff]   ;;  %v1573_v14 = vld [vmem:[%s2108_s3 + $0x18] sm:$0xff]  }
   0x5   :  { %1309 = vmatprep.subr.bf16.mxu0 %v1562_v3  ;;  %1457 = vmatprep.subr.bf16.mxu1 %v1563_v4  ;;  %v1568_v9 = vld [vmem:[%s2110_s1 + $0x40] sm:$0xff]   ;;  %v1572_v13 = vld [vmem:[%s2110_s1 + $0x48] sm:$0xff]   ;;  %v1577_v18 = vld [vmem:[%s2109_s2 + $0x50] ss:$12 sps:$4 sm:$0xff]  }
   0x6   :  { %1459 = vmatprep.mubr.msk.bf16.mxu1 %vm385_vm0, %v1565_v6  ;;  %v1570_v11 = vld [vmem:[%s2110_s1] sm:$0xff]   ;;  %v1739_v15 = vld [vmem:[%s2110_s1 + $0x8] sm:$0xff]   ;;  %v1578_v19 = vld [vmem:[%s2110_s1 + $0x50] sm:$0xff]  }
   0x7   :  { %v1575_v16 = vld [vmem:[%s2109_s2 + $0x38] ss:$12 sps:$4 sm:$0xff]   ;;  %v1762_v21 = vld [vmem:[%s2110_s1 + $0x10] sm:$0xff]   ;;  %v1581_v22 = vld [vmem:[%s2108_s3 + $0x68] sm:$0xff]  }
   0x8   :  { %1310 = vmatpush3.bf16.msra.mxu0 %v1564_v5  ;;  %1458 = vmatpush3.bf16.msra.mxu1 %v1563_v4  ;;  %v1576_v17 = vld [vmem:[%s2108_s3 + $0x60] sm:$0xff]   ;;  %v1582_v23 = vld [vmem:[%s2110_s1 + $0x58] sm:$0xff]   ;;  %v1583_v24 = vld [vmem:[%s2108_s3 + $0x28] sm:$0xff]  }
   0x9   :  { %1311 = vmatprep.subr.bf16.mxu0 %v1566_v7  ;;  %1495 = vmatprep.subr.bf16.mxu1 %v1568_v9  ;;  %v1579_v20 = vld [vmem:[%s2108_s3 + $0x20] sm:$0xff]   ;;  %v1777_v25 = vld [vmem:[%s2110_s1 + $0x18] sm:$0xff]   ;;  %v1585_v26 = vld [vmem:[%s2109_s2 + $0x68] ss:$12 sps:$4 sm:$0xff]  }
   0xa   :  { %v1586_v27 = vld [vmem:[%s2108_s3 + $0x70] sm:$0xff]   ;;  %v1587_v28 = vld [vmem:[%s2109_s2 + $0x80] ss:$12 sps:$4 sm:$0xff]   ;;  %v1591_v32 = vld [vmem:[%s2108_s3 + $0x78] sm:$0xff]  }
   0xb   :  { %1460 = vmatmul.mubr.msk.bf16.vlgmr.msra.gmra.mrb[0].mxu1 %vm385_vm0, %v1567_v8  ;;  %v1588_v29 = vld [vmem:[%s2110_s1 + $0x60] sm:$0xff]   ;;  %v1589_v30 = vld [vmem:[%s2108_s3 + $0x30] sm:$0xff]   ;;  %v1592_v33 = vld [vmem:[%s2110_s1 + $0x68] sm:$0xff]  }
   0xc   :  { %1312 = vmatpush3.bf16.msra.mxu0 %v1569_v10  ;;  %1503 = vmatpush3.bf16.msra.mxu1 %v1570_v11  ;;  %v1590_v31 = vld [vmem:[%s2110_s1 + $0x20] sm:$0xff]   ;;  %v1593_v34 = vld [vmem:[%s2108_s3 + $0x38] sm:$0xff]   ;;  %v1594_v35 = vld [vmem:[%s2110_s1 + $0x28] sm:$0xff]  }
   0xd   :  { %1313 = vmatprep.subr.bf16.mxu0 %v1571_v12  ;;  %1496 = vmatprep.subr.bf16.mxu1 %v1572_v13  ;;  %v1595_v36 = vld [vmem:[%s2109_s2] ss:$12 sps:$4 sm:$0xff]   ;;  %v1597_v37 = vld [vmem:[%s2109_s2 + $0x4] ss:$12 sps:$4 sm:$0xff]   ;;  %v1602_v42 = vld [vmem:[%s2110_s1 + $0x78] sm:$0xff]  }
   0xe   :  { %1463 = vmatprep.mubr.msk.bf16.mxu1 %vm385_vm0, %v1575_v16  ;;  %v1598_v38 = vld [vmem:[%s2109_s2 + $0x98] ss:$12 sps:$4 sm:$0xff]   ;;  %442 = vmatprep.mubr.bf16.mxu0 %v1597_v37  ;;  %v1599_v39 = vld [vmem:[%s2109_s2 + $0xb0] ss:$12 sps:$4 sm:$0xff]   ;;  %v1608_v46 = vld [vmem:[%s2111_s0 + $0x34] ss:$12 sps:$4 sm:$0xff]  }
   0xf   :  { %v1600_v40 = vld [vmem:[%s2110_s1 + $0x70] sm:$0xff]   ;;  %v1603_v43 = vld [vmem:[%s2110_s1 + $0x38] sm:$0xff]   ;;  %v1610_v48 = vld [vmem:[%s2110_s1 + $0x80] sm:$0xff]  }
  0x10   :  { %1314 = vmatpush3.bf16.msra.mxu0 %v1573_v14  ;;  %1504 = vmatpush3.bf16.msra.mxu1 %v1739_v15  ;;  %v1601_v41 = vld [vmem:[%s2110_s1 + $0x30] sm:$0xff]   ;;  %v1604_v44 = vld [vmem:[%s2109_s2 + $0x1c] ss:$12 sps:$4 sm:$0xff]   ;;  %v1609_v47 = vld [vmem:[%s2109_s2 + $0x18] ss:$12 sps:$4 sm:$0xff]  }
  0x11   :  { %1315 = vmatprep.subr.bf16.mxu0 %v1576_v17  ;;  %1497 = vmatprep.subr.bf16.mxu1 %v1578_v19  ;;  %v1606_v45 = vld [vmem:[%s2111_s0 + $0x30] ss:$12 sps:$4 sm:$0xff]   ;;  %v1611_v49 = vld [vmem:[%s2109_s2 + $0x34] ss:$12 sps:$4 sm:$0xff]   ;;  %v1613_v50 = vld [vmem:[%s2111_s0 + $0x4c] ss:$12 sps:$4 sm:$0xff]  }
  0x12   :  { %v1615_v51 = vld [vmem:[%s2109_s2 + $0x30] ss:$12 sps:$4 sm:$0xff]   ;;  %v1617_v52 = vld [vmem:[%s2109_s2 + $0x4c] ss:$12 sps:$4 sm:$0xff]   ;;  %v1616_v53 = vld [vmem:[%s2111_s0 + $0x48] ss:$12 sps:$4 sm:$0xff]  }
  0x13   :  { %1464 = vmatmul.mubr.msk.bf16.gmra.mrb[4].mxu1 %vm385_vm0, %v1577_v18  ;;  %v1619_v54 = vld [vmem:[%s2111_s0 + $0x64] ss:$12 sps:$4 sm:$0xff]   ;;  %v1629_v55 = vld [vmem:[%s2110_s1 + $0x88] sm:$0xff]   ;;  %v1632_v63 = vld [vmem:[%s2111_s0 + $0x94] ss:$12 sps:$4 sm:$0xff]  }
  0x14   :  { %1316 = vmatpush3.bf16.msra.mxu0 %v1579_v20  ;;  %1505 = vmatpush3.bf16.msra.mxu1 %v1762_v21  ;;  %v1621_v56 = vld [vmem:[%s2109_s2 + $0x48] ss:$12 sps:$4 sm:$0xff]   ;;  %v1623_v57 = vld [vmem:[%s2109_s2 + $0x64] ss:$12 sps:$4 sm:$0xff]   ;;  %v1622_v58 = vld [vmem:[%s2111_s0 + $0x60] ss:$12 sps:$4 sm:$0xff]  }
  0x15   :  { %1317 = vmatprep.subr.bf16.mxu0 %v1581_v22  ;;  %1498 = vmatprep.subr.bf16.mxu1 %v1582_v23  ;;  %v1625_v59 = vld [vmem:[%s2111_s0 + $0x7c] ss:$12 sps:$4 sm:$0xff]   ;;  %v1627_v60 = vld [vmem:[%s2109_s2 + $0x60] ss:$12 sps:$4 sm:$0xff]   ;;  %v1628_v62 = vld [vmem:[%s2111_s0 + $0x78] ss:$12 sps:$4 sm:$0xff]  }
  0x16   :  { %1467 = vmatprep.mubr.msk.bf16.mxu1 %vm385_vm0, %v1585_v26  ;;  %v1630_v61 = vld [vmem:[%s2109_s2 + $0x7c] ss:$12 sps:$4 sm:$0xff]   ;;  %v1634_v0 = vld [vmem:[%s2109_s2 + $0x78] ss:$12 sps:$4 sm:$0xff]   ;;  %v1636_v1 = vld [vmem:[%s2109_s2 + $0x94] ss:$12 sps:$4 sm:$0xff]  }
  0x17   :  { %v1635_v2 = vld [vmem:[%s2111_s0 + $0x90] ss:$12 sps:$4 sm:$0xff]   ;;  %v1638_v3 = vld [vmem:[%s2111_s0 + $0xac] ss:$12 sps:$4 sm:$0xff]   ;;  %v1641_v6 = vld [vmem:[%s2111_s0 + $0xa8] ss:$12 sps:$4 sm:$0xff]  }
  0x18   :  { %1318 = vmatpush3.bf16.msra.mxu0 %v1583_v24  ;;  %1506 = vmatpush3.bf16.msra.mxu1 %v1777_v25  ;;  %v1640_v4 = vld [vmem:[%s2109_s2 + $0x90] ss:$12 sps:$4 sm:$0xff]   ;;  %v1642_v5 = vld [vmem:[%s2109_s2 + $0xac] ss:$12 sps:$4 sm:$0xff]   ;;  %v1644_v7 = vld [vmem:[%s2111_s0 + $0x8] ss:$12 sps:$4 sm:$0xff]  }
  0x19   :  { %1319 = vmatprep.subr.bf16.mxu0 %v1586_v27  ;;  %1499 = vmatprep.subr.bf16.mxu1 %v1588_v29  ;;  %v1645_v8 = vld [vmem:[%s2109_s2 + $0xa8] ss:$12 sps:$4 sm:$0xff]   ;;  %v1646_v10 = vld [vmem:[%s2111_s0 + $0x20] ss:$12 sps:$4 sm:$0xff]   ;;  %v1651_v14 = vld [vmem:[%s2111_s0 + $0x50] ss:$12 sps:$4 sm:$0xff]  }
  0x1a   :  { %v1647_v12 = vld [vmem:[%s2111_s0] ss:$12 sps:$4 sm:$0xff]   ;;  %v1655_v16 = vld [vmem:[%s2111_s0 + $0x18] ss:$12 sps:$4 sm:$0xff]  }
  0x1b   :  { %1468 = vmatmul.mubr.msk.bf16.gmra.mrb[8].mxu1 %vm385_vm0, %v1587_v28  ;;  %v1656_v17 = vld [vmem:[%s2111_s0 + $0x80] ss:$12 sps:$4 sm:$0xff]   ;;  %v1657_v18 = vld [vmem:[%s2111_s0 + $0x98] ss:$12 sps:$4 sm:$0xff]  }
  0x1c   :  { %1320 = vmatpush3.bf16.msra.mxu0 %v1589_v30  ;;  %1507 = vmatpush3.bf16.msra.mxu1 %v1590_v31 }
  0x1d   :  { %1321 = vmatprep.subr.bf16.mxu0 %v1591_v32  ;;  %1500 = vmatprep.subr.bf16.mxu1 %v1592_v33 }
  0x1e   :  { %1471 = vmatprep.mubr.msk.bf16.mxu1 %vm385_vm0, %v1598_v38 }
  0x20   :  { %1322 = vmatpush3.bf16.msra.mxu0 %v1593_v34  ;;  %1508 = vmatpush3.bf16.msra.mxu1 %v1594_v35 }
  0x21   :  { %1381 = vmatprep.subr.bf16.mxu0 %v1568_v9  ;;  %1501 = vmatprep.subr.bf16.mxu1 %v1600_v40  ;;  %v1649_v9 = vld [vmem:[%s2111_s0 + $0x4] ss:$12 sps:$4 sm:$0xff]  }
  0x23   :  { %443 = vmatmul.mubr.bf16.vlgmr.msra.gmra.mrb[0].mxu0 %v1595_v36  ;;  %1472 = vmatmul.mubr.msk.bf16.gmra.mrb[12].mxu1 %vm385_vm0, %v1599_v39 }
  0x24   :  { %1382 = vmatpush3.bf16.msra.mxu0 %v1570_v11  ;;  %1509 = vmatpush3.bf16.msra.mxu1 %v1601_v41  ;;  %v1650_v11 = vld [vmem:[%s2111_s0 + $0x38] ss:$12 sps:$4 sm:$0xff]  }
  0x25   :  { %1383 = vmatprep.subr.bf16.mxu0 %v1572_v13  ;;  %1502 = vmatprep.subr.bf16.mxu1 %v1602_v42  ;;  %v1652_v13 = vld [vmem:[%s2111_s0 + $0x1c] ss:$12 sps:$4 sm:$0xff]  }
  0x26   :  { %450 = vmatprep.mubr.bf16.mxu0 %v1604_v44  ;;  %904 = vmatprep.mubr.bf16.mxu1 %v1608_v46 }
  0x28   :  { %1384 = vmatpush3.bf16.msra.mxu0 %v1739_v15  ;;  %1510 = vmatpush3.bf16.msra.mxu1 %v1603_v43  ;;  %v1654_v15 = vld [vmem:[%s2111_s0 + $0x68] ss:$12 sps:$4 sm:$0xff]  }
  0x29   :  { %1385 = vmatprep.subr.bf16.mxu0 %v1578_v19  ;;  %1475 = vmatprep.subr.bf16.mxu1 %v1610_v48  ;;  %v1658_v19 = vld [vmem:[%s2111_s0 + $0xb0] ss:$12 sps:$4 sm:$0xff]  }
  0x2b   :  { %451 = vmatmul.mubr.bf16.gmra.mrb[4].mxu0 %v1609_v47  ;;  %905 = vmatmul.mubr.bf16.vlgmr.msra.gmra.mrb[16].mxu1 %v1606_v45 }
  0x2c   :  { %458 = vmatprep.mubr.bf16.mxu0 %v1611_v49  ;;  %1386 = vmatpush3.bf16.msra.mxu0 %v1762_v21 }
  0x2d   :  { %1387 = vmatprep.subr.bf16.mxu0 %v1582_v23  ;;  %1476 = vmatpush3.bf16.msra.mxu1 %v1610_v48 }
  0x2e   :  { %912 = vmatprep.mubr.bf16.mxu1 %v1613_v50  ;;  %1477 = vmatprep.subr.bf16.mxu1 %v1629_v55 }
  0x30   :  { %1388 = vmatpush3.bf16.msra.mxu0 %v1777_v25 }
  0x31   :  { %1389 = vmatprep.subr.bf16.mxu0 %v1588_v29  ;;  %1478 = vmatpush3.bf16.msra.mxu1 %v1629_v55 }
  0x33   :  { %459 = vmatmul.mubr.bf16.gmra.mrb[8].mxu0 %v1615_v51  ;;  %913 = vmatmul.mubr.bf16.gmra.mrb[20].mxu1 %v1616_v53 }
  0x34   :  { %466 = vmatprep.mubr.bf16.mxu0 %v1617_v52  ;;  %1390 = vmatpush3.bf16.msra.mxu0 %v1590_v31 }
  0x35   :  { %920 = vmatprep.mubr.bf16.mxu1 %v1619_v54  ;;  %1391 = vmatprep.subr.bf16.mxu0 %v1592_v33 }
  0x38   :  { %1392 = vmatpush3.bf16.msra.mxu0 %v1594_v35 }
  0x39   :  { %1393 = vmatprep.subr.bf16.mxu0 %v1600_v40 }
  0x3b   :  { %467 = vmatmul.mubr.bf16.gmra.mrb[12].mxu0 %v1621_v56  ;;  %921 = vmatmul.mubr.bf16.gmra.mrb[24].mxu1 %v1622_v58 }
  0x3c   :  { %474 = vmatprep.mubr.bf16.mxu0 %v1623_v57  ;;  %1394 = vmatpush3.bf16.msra.mxu0 %v1601_v41 }
  0x3d   :  { %928 = vmatprep.mubr.bf16.mxu1 %v1625_v59  ;;  %1395 = vmatprep.subr.bf16.mxu0 %v1602_v42 }
  0x40   :  { %1396 = vmatpush3.bf16.msra.mxu0 %v1603_v43 }
  0x43   :  { %475 = vmatmul.mubr.bf16.gmra.mrb[16].mxu0 %v1627_v60  ;;  %929 = vmatmul.mubr.bf16.gmra.mrb[28].mxu1 %v1628_v62 }
  0x44   :  { %482 = vmatprep.mubr.bf16.mxu0 %v1630_v61  ;;  %936 = vmatprep.mubr.bf16.mxu1 %v1632_v63 }
  0x4b   :  { %483 = vmatmul.mubr.bf16.gmra.mrb[20].mxu0 %v1634_v0  ;;  %937 = vmatmul.mubr.bf16.gmra.mrb[32].mxu1 %v1635_v2 }
  0x4c   :  { %490 = vmatprep.mubr.bf16.mxu0 %v1636_v1  ;;  %944 = vmatprep.mubr.bf16.mxu1 %v1638_v3 }
  0x53   :  { %491 = vmatmul.mubr.bf16.gmra.mrb[24].mxu0 %v1640_v4  ;;  %945 = vmatmul.mubr.bf16.gmra.mrb[36].mxu1 %v1641_v6 }
  0x54   :  { %498 = vmatprep.mubr.bf16.mxu0 %v1642_v5  ;;  %1479 = vmatprep.mubr.msk.bf16.mxu1 %vm385_vm0, %v1644_v7 }
  0x5b   :  { %499 = vmatmul.mubr.bf16.gmra.mrb[28].mxu0 %v1645_v8  ;;  %1480 = vmatmul.mubr.msk.bf16.vlgmr.msra.gmra.mrb[0].mxu1 %vm385_vm0, %v1646_v10 }
  0x5c   :  { %888 = vmatprep.mubr.bf16.mxu0 %v1649_v9  ;;  %1483 = vmatprep.mubr.msk.bf16.mxu1 %vm385_vm0, %v1650_v11 }
  0x63   :  { %889 = vmatmul.mubr.bf16.vlgmr.msra.gmra.mrb[32].mxu0 %v1647_v12  ;;  %1484 = vmatmul.mubr.msk.bf16.gmra.mrb[4].mxu1 %vm385_vm0, %v1651_v14 }
  0x64   :  { %896 = vmatprep.mubr.bf16.mxu0 %v1652_v13  ;;  %1487 = vmatprep.mubr.msk.bf16.mxu1 %vm385_vm0, %v1654_v15 }
  0x6b   :  { %897 = vmatmul.mubr.bf16.gmra.mrb[36].mxu0 %v1655_v16  ;;  %1488 = vmatmul.mubr.msk.bf16.gmra.mrb[8].mxu1 %vm385_vm0, %v1656_v17 }
  0x6c   :  { %1491 = vmatprep.mubr.msk.bf16.mxu1 %vm385_vm0, %v1657_v18 }
  0x73   :  { %1492 = vmatmul.mubr.msk.bf16.gmra.mrb[12].mxu1 %vm385_vm0, %v1658_v19 }
  0xf6   :  { %v1323_v20 = vpop.f32.mrb[0].mxu0 }
  0xf7   :  { %v1324_v21 = vpop.f32.mrb[1].mxu0 }
  0xf8   :  { %v1969_v22 = vadd.f32 %v1324_v21, %v1323_v20  ;;  %v1326_v23 = vpop.f32.mrb[2].mxu0 }
  0xf9   :  { %v1327_v24 = vpop.f32.mrb[3].mxu0 }
  0xfa   :  { %v1971_v25 = vadd.f32 %v1327_v24, %v1326_v23 }
  0xfe   :  { %v1329_v26 = vpop.f32.mrb[4].mxu0  ;;  %v1409_v28 = vpop.f32.mrb[16].mxu1 }
  0xff   :  { %v1330_v27 = vpop.f32.mrb[5].mxu0  ;;  %v1410_v31 = vpop.f32.mrb[17].mxu1 }
 0x100   :  { %v1973_v29 = vadd.f32 %v1330_v27, %v1329_v26  ;;  %v1332_v30 = vpop.f32.mrb[6].mxu0  ;;  %v1411_v33 = vadd.f32 %v1410_v31, %v1409_v28  ;;  %v1412_v34 = vpop.f32.mrb[18].mxu1 }
 0x101   :  { %v1333_v32 = vpop.f32.mrb[7].mxu0  ;;  %v1413_v36 = vpop.f32.mrb[19].mxu1 }
 0x102   :  { %v1975_v35 = vadd.f32 %v1333_v32, %v1332_v30  ;;  %v1414_v37 = vadd.f32 %v1413_v36, %v1412_v34 }
 0x106   :  { %v1335_v38 = vpop.f32.mrb[8].mxu0  ;;  %v1415_v40 = vpop.f32.mrb[20].mxu1 }
 0x107   :  { %v1336_v39 = vpop.f32.mrb[9].mxu0  ;;  %v1416_v43 = vpop.f32.mrb[21].mxu1 }
 0x108   :  { %v1337_v41 = vadd.f32 %v1336_v39, %v1335_v38  ;;  %v1338_v42 = vpop.f32.mrb[10].mxu0  ;;  %v1417_v45 = vadd.f32 %v1416_v43, %v1415_v40  ;;  %v1418_v46 = vpop.f32.mrb[22].mxu1 }
 0x109   :  { %v1339_v44 = vpop.f32.mrb[11].mxu0  ;;  %v1419_v49 = vpop.f32.mrb[23].mxu1 }
 0x10a   :  { %v1340_v47 = vadd.f32 %v1339_v44, %v1338_v42  ;;  %v1977_v48 = vadd.f32 %v1411_v33, %v1337_v41  ;;  %v1420_v50 = vadd.f32 %v1419_v49, %v1418_v46 }
 0x10c   :  { %v1979_v51 = vadd.f32 %v1414_v37, %v1340_v47 }
 0x10e   :  { %v1341_v52 = vpop.f32.mrb[12].mxu0  ;;  %v1421_v54 = vpop.f32.mrb[24].mxu1 }
 0x10f   :  { %v1342_v53 = vpop.f32.mrb[13].mxu0  ;;  %v1422_v57 = vpop.f32.mrb[25].mxu1 }
 0x110   :  { %v1343_v55 = vadd.f32 %v1342_v53, %v1341_v52  ;;  %v1344_v56 = vpop.f32.mrb[14].mxu0  ;;  %v1423_v59 = vadd.f32 %v1422_v57, %v1421_v54  ;;  %v1424_v60 = vpop.f32.mrb[26].mxu1 }
 0x111   :  { %v1345_v58 = vpop.f32.mrb[15].mxu0  ;;  %v1425_v63 = vpop.f32.mrb[27].mxu1 }
 0x112   :  { %v1346_v61 = vadd.f32 %v1345_v58, %v1344_v56  ;;  %v1981_v62 = vadd.f32 %v1417_v45, %v1343_v55  ;;  %v1426_v0 = vadd.f32 %v1425_v63, %v1424_v60 }
 0x114   :  { %v1983_v1 = vadd.f32 %v1420_v50, %v1346_v61 }
 0x116   :  { %v1347_v2 = vpop.f32.mrb[16].mxu0  ;;  %v1427_v4 = vpop.f32.mrb[28].mxu1 }
 0x117   :  { %v1348_v3 = vpop.f32.mrb[17].mxu0  ;;  %v1428_v7 = vpop.f32.mrb[29].mxu1 }
 0x118   :  { %v1349_v5 = vadd.f32 %v1348_v3, %v1347_v2  ;;  %v1350_v6 = vpop.f32.mrb[18].mxu0  ;;  %v1429_v9 = vadd.f32 %v1428_v7, %v1427_v4  ;;  %v1430_v10 = vpop.f32.mrb[30].mxu1  ;;  %v2008_v3 = vld [vmem:[%s2112_s4] ss:$0 sm:$0xff] }
 0x119   :  { %v1351_v8 = vpop.f32.mrb[19].mxu0  ;;  %v1431_v13 = vpop.f32.mrb[31].mxu1 }
 0x11a   :  { %v1352_v11 = vadd.f32 %v1351_v8, %v1350_v6  ;;  %v1985_v12 = vadd.f32 %v1423_v59, %v1349_v5  ;;  %v1432_v14 = vadd.f32 %v1431_v13, %v1430_v10 }
 0x11c   :  { %v1987_v15 = vadd.f32 %v1426_v0, %v1352_v11 }
 0x11e   :  { %v1353_v16 = vpop.f32.mrb[20].mxu0  ;;  %v1433_v18 = vpop.f32.mrb[32].mxu1 }
 0x11f   :  { %v1354_v17 = vpop.f32.mrb[21].mxu0  ;;  %v1434_v21 = vpop.f32.mrb[33].mxu1 }
 0x120   :  { %v1355_v19 = vadd.f32 %v1354_v17, %v1353_v16  ;;  %v1356_v20 = vpop.f32.mrb[22].mxu0  ;;  %v1435_v24 = vadd.f32 %v1434_v21, %v1433_v18  ;;  %v1436_v26 = vpop.f32.mrb[34].mxu1 }
 0x121   :  { %v1357_v23 = vpop.f32.mrb[23].mxu0  ;;  %v1437_v30 = vpop.f32.mrb[35].mxu1 }
 0x122   :  { %v1358_v27 = vadd.f32 %v1357_v23, %v1356_v20  ;;  %v1989_v28 = vadd.f32 %v1429_v9, %v1355_v19  ;;  %v1438_v31 = vadd.f32 %v1437_v30, %v1436_v26 }
 0x124   :  { %v1991_v32 = vadd.f32 %v1432_v14, %v1358_v27 }
 0x126   :  { %v1359_v33 = vpop.f32.mrb[24].mxu0  ;;  %v1439_v36 = vpop.f32.mrb[36].mxu1 }
 0x127   :  { %v1360_v34 = vpop.f32.mrb[25].mxu0  ;;  %v1440_v39 = vpop.f32.mrb[37].mxu1 }
 0x128   :  { %v1361_v37 = vadd.f32 %v1360_v34, %v1359_v33  ;;  %v1362_v38 = vpop.f32.mrb[26].mxu0  ;;  %v1441_v41 = vadd.f32 %v1440_v39, %v1439_v36  ;;  %v1442_v42 = vpop.f32.mrb[38].mxu1 }
 0x129   :  { %v1363_v40 = vpop.f32.mrb[27].mxu0  ;;  %v1443_v45 = vpop.f32.mrb[39].mxu1 }
 0x12a   :  { %v1364_v43 = vadd.f32 %v1363_v40, %v1362_v38  ;;  %v1993_v44 = vadd.f32 %v1435_v24, %v1361_v37  ;;  %v1444_v46 = vadd.f32 %v1443_v45, %v1442_v42 }
 0x12c   :  { %v1995_v47 = vadd.f32 %v1438_v31, %v1364_v43 }
 0x12e   :  { %v1365_v49 = vpop.f32.mrb[28].mxu0  ;;  %v1997_v52 = vpop.f32.mrb[0].mxu1 }
 0x12f   :  { %v1366_v50 = vpop.f32.mrb[29].mxu0  ;;  %v987_v55 = vpop.f32.mrb[1].mxu1 }
 0x130   :  { %v1367_v53 = vadd.f32 %v1366_v50, %v1365_v49  ;;  %v1368_v54 = vpop.f32.mrb[30].mxu0  ;;  %v1999_v57 = vpop.f32.mrb[2].mxu1 }
 0x131   :  { %v1369_v56 = vpop.f32.mrb[31].mxu0  ;;  %v990_v60 = vpop.f32.mrb[3].mxu1 }
 0x132   :  { %v1370_v58 = vadd.f32 %v1369_v56, %v1368_v54  ;;  %v2001_v59 = vadd.f32 %v1441_v41, %v1367_v53 }
 0x134   :  { %v2003_v61 = vadd.f32 %v1444_v46, %v1370_v58 }
 0x136   :  { %v1397_v63 = vpop.f32.mrb[32].mxu0  ;;  %v1485_v2 = vpop.f32.mrb[4].mxu1 }
 0x137   :  { %v1398_v0 = vpop.f32.mrb[33].mxu0  ;;  %v1520_v6 = vadd.f32 %v1981_v62, %v1485_v2  ;;  %v1003_v7 = vpop.f32.mrb[5].mxu1 }
 0x138   :  { %v1399_v4 = vadd.f32 %v1398_v0, %v1397_v63  ;;  %v1400_v5 = vpop.f32.mrb[34].mxu0  ;;  %v1522_v10 = vadd.f32 %v1977_v48, %v1003_v7  ;;  %v1486_v11 = vpop.f32.mrb[6].mxu1 }
 0x139   :  { %v1401_v8 = vpop.f32.mrb[35].mxu0  ;;  %v1063_v14 = vadd.f32 %v1520_v6, %v2008_v3  ;;  %v1524_v16 = vadd.f32 %v1983_v1, %v1486_v11  ;;  %v1006_v17 = vpop.f32.mrb[7].mxu1 }
 0x13a   :  { %v1513_v9 = vadd.f32 %v1399_v4, %v1969_v22  ;;  %v1402_v13 = vadd.f32 %v1401_v8, %v1400_v5  ;;  %v1061_v19 = vadd.f32 %v1522_v10, %v2008_v3  ;;  %v1526_v62 = vadd.f32 %v1979_v51, %v1006_v17 }
 0x13b   :  { %v1079_v21 = vmax.f32 %v1063_v14, 0.0  ;;  %v1064_v22 = vadd.f32 %v1524_v16, %v2008_v3 }
 0x13c   :  { %v1514_v18 = vadd.f32 %v1513_v9, %v987_v55  ;;  %v1517_v20 = vadd.f32 %v1402_v13, %v1971_v25  ;;  %v1077_v23 = vmax.f32 %v1061_v19, 0.0  ;;  %v1062_v26 = vadd.f32 %v1526_v62, %v2008_v3 }
 0x13d   :  { %v1297_v1 = vpack.c.bf16 %v1079_v21, %v1079_v21  ;;  %v1080_v30 = vmax.f32 %v1064_v22, 0.0 }
 0x13e   :  { %v1057_v48 = vadd.f32 %v1514_v18, %v2008_v3  ;;  %v1518_v24 = vadd.f32 %v1517_v20, %v990_v60  ;;  %v1403_v27 = vpop.f32.mrb[36].mxu0  ;;  %v1295_v34 = vpack.c.bf16 %v1077_v23, %v1077_v23  ;;  %v1078_v36 = vmax.f32 %v1062_v26, 0.0  ;;  %v1489_v51 = vpop.f32.mrb[8].mxu1 }
 0x13f   :  { %v1404_v31 = vpop.f32.mrb[37].mxu0  ;;  %1160 = vst.msk [vmem:[%s2113_s5 + $0x18] sm:$0xf] %vm1153_vm1, %v1297_v1  ;;  %v1298_v38 = vpack.c.bf16 %v1080_v30, %v1080_v30  ;;  %v1528_v39 = vadd.f32 %v1989_v28, %v1489_v51  ;;  %v1019_v41 = vpop.f32.mrb[9].mxu1 }
 0x140   :  { %v1073_v33 = vmax.f32 %v1057_v48, 0.0  ;;  %v1058_v25 = vadd.f32 %v1518_v24, %v2008_v3  ;;  %v1406_v37 = vpop.f32.mrb[38].mxu0  ;;  %v1405_v40 = vadd.f32 %v1404_v31, %v1403_v27  ;;  %1158 = vst.msk [vmem:[%s2113_s5 + $0x10] sm:$0xf] %vm1153_vm1, %v1295_v34  ;;  %v1296_v46 = vpack.c.bf16 %v1078_v36, %v1078_v36  ;;  %v1490_v50 = vpop.f32.mrb[10].mxu1 }
 0x141   :  { %v1407_v42 = vpop.f32.mrb[39].mxu0  ;;  %v1530_v49 = vadd.f32 %v1985_v12, %v1019_v41  ;;  %1161 = vst.msk [vmem:[%s2113_s5 + $0x1c] sm:$0xf] %vm1153_vm1, %v1298_v38  ;;  %v1067_v28 = vadd.f32 %v1528_v39, %v2008_v3  ;;  %v1532_v54 = vadd.f32 %v1991_v32, %v1490_v50  ;;  %v1022_v56 = vpop.f32.mrb[11].mxu1 }
 0x142   :  { %v1291_v43 = vpack.c.bf16 %v1073_v33, %v1073_v33  ;;  %v1074_v45 = vmax.f32 %v1058_v25, 0.0  ;;  %v1511_v53 = vadd.f32 %v1405_v40, %v1973_v29  ;;  %v1408_v55 = vadd.f32 %v1407_v42, %v1406_v37  ;;  %1159 = vst.msk [vmem:[%s2113_s5 + $0x14] sm:$0xf] %vm1153_vm1, %v1296_v46 }
 0x143   :  { %v1065_v58 = vadd.f32 %v1530_v49, %v2008_v3  ;;  %v1534_v60 = vadd.f32 %v1987_v15, %v1022_v56  ;;  %v1083_v29 = vmax.f32 %v1067_v28, 0.0  ;;  %v1068_v63 = vadd.f32 %v1532_v54, %v2008_v3 }
 0x144   :  { %1154 = vst.msk [vmem:[%s2113_s5] sm:$0xf] %vm1153_vm1, %v1291_v43  ;;  %v1292_v12 = vpack.c.bf16 %v1074_v45, %v1074_v45  ;;  %v1512_v32 = vadd.f32 %v1511_v53, %v1997_v52  ;;  %v1515_v0 = vadd.f32 %v1408_v55, %v1975_v35 }
 0x145   :  { %v1081_v2 = vmax.f32 %v1065_v58, 0.0  ;;  %v1066_v4 = vadd.f32 %v1534_v60, %v2008_v3  ;;  %v1301_v5 = vpack.c.bf16 %v1083_v29, %v1083_v29  ;;  %v1084_v7 = vmax.f32 %v1068_v63, 0.0 }
 0x146   :  { %1155 = vst.msk [vmem:[%s2113_s5 + $0x4] sm:$0xf] %vm1153_vm1, %v1292_v12  ;;  %v1059_v6 = vadd.f32 %v1512_v32, %v2008_v3  ;;  %v1516_v15 = vadd.f32 %v1515_v0, %v1999_v57  ;;  %v1493_v9 = vpop.f32.mrb[12].mxu1 }
 0x147   :  { %v1299_v8 = vpack.c.bf16 %v1081_v2, %v1081_v2  ;;  %v1082_v52 = vmax.f32 %v1066_v4, 0.0  ;;  %1164 = vst.msk [vmem:[%s2113_s5 + $0x28] sm:$0xf] %vm1153_vm1, %v1301_v5  ;;  %v1302_v10 = vpack.c.bf16 %v1084_v7, %v1084_v7  ;;  %v1536_v13 = vadd.f32 %v2001_v59, %v1493_v9  ;;  %v1035_v14 = vpop.f32.mrb[13].mxu1 }
 0x148   :  { %v1075_v35 = vmax.f32 %v1059_v6, 0.0  ;;  %v1060_v11 = vadd.f32 %v1516_v15, %v2008_v3  ;;  %v1538_v16 = vadd.f32 %v1993_v44, %v1035_v14  ;;  %v1494_v17 = vpop.f32.mrb[14].mxu1 }
 0x149   :  { %1162 = vst.msk [vmem:[%s2113_s5 + $0x20] sm:$0xf] %vm1153_vm1, %v1299_v8  ;;  %v1300_v57 = vpack.c.bf16 %v1082_v52, %v1082_v52  ;;  %1165 = vst.msk [vmem:[%s2113_s5 + $0x2c] sm:$0xf] %vm1153_vm1, %v1302_v10  ;;  %v1071_v20 = vadd.f32 %v1536_v13, %v2008_v3  ;;  %v1540_v59 = vadd.f32 %v2003_v61, %v1494_v17  ;;  %v1038_v62 = vpop.f32.mrb[15].mxu1 }
 0x14a   :  { %v1293_v18 = vpack.c.bf16 %v1075_v35, %v1075_v35  ;;  %v1076_v19 = vmax.f32 %v1060_v11, 0.0  ;;  %v1069_v44 = vadd.f32 %v1538_v16, %v2008_v3  ;;  %v1542_v21 = vadd.f32 %v1995_v47, %v1038_v62 }
 0x14b   :  { %1163 = vst.msk [vmem:[%s2113_s5 + $0x24] sm:$0xf] %vm1153_vm1, %v1300_v57  ;;  %v1087_v48 = vmax.f32 %v1071_v20, 0.0  ;;  %v1072_v23 = vadd.f32 %v1540_v59, %v2008_v3 }
 0x14c   :  { %1156 = vst.msk [vmem:[%s2113_s5 + $0x8] sm:$0xf] %vm1153_vm1, %v1293_v18  ;;  %v1294_v22 = vpack.c.bf16 %v1076_v19, %v1076_v19  ;;  %v1085_v61 = vmax.f32 %v1069_v44, 0.0  ;;  %v1070_v24 = vadd.f32 %v1542_v21, %v2008_v3 }
 0x14d   :  { %v1305_v26 = vpack.c.bf16 %v1087_v48, %v1087_v48  ;;  %v1088_v27 = vmax.f32 %v1072_v23, 0.0 }
 0x14e   :  { %1157 = vst.msk [vmem:[%s2113_s5 + $0xc] sm:$0xf] %vm1153_vm1, %v1294_v22  ;;  %v1303_v47 = vpack.c.bf16 %v1085_v61, %v1085_v61  ;;  %v1086_v1 = vmax.f32 %v1070_v24, 0.0 }
 0x14f   :  { %1168 = vst.msk [vmem:[%s2113_s5 + $0x38] sm:$0xf] %vm1153_vm1, %v1305_v26  ;;  %v1306_v30 = vpack.c.bf16 %v1088_v27, %v1088_v27 }
 0x150   :  { %1166 = vst.msk [vmem:[%s2113_s5 + $0x30] sm:$0xf] %vm1153_vm1, %v1303_v47  ;;  %v1304_v3 = vpack.c.bf16 %v1086_v1, %v1086_v1 }
 0x151   :  { %1169 = vst.msk [vmem:[%s2113_s5 + $0x3c] sm:$0xf] %vm1153_vm1, %v1306_v30 }
 0x152   :  { %1167 = vst.msk [vmem:[%s2113_s5 + $0x34] sm:$0xf] %vm1153_vm1, %v1304_v3 }

// kernel: unet_forward.25
= control target key start
LH: loop header
LB: loop body
LE: loop exit
PB: predicated region body
PF: predicated region fallthrough
CT: control target
= control target key end

     0   :  { %s1208_s14 = smov 0   ;;  %s1210_s15 = smov 0   ;;  %s1406_s0 = inlined_call_operand.vmem [shape: bf16[512,16], index: 0, kind: input, shape index: {}]   ;;  %s1407_s1 = inlined_call_operand.vmem [shape: bf16[16,1], index: 1, kind: input, shape index: {}]   ;;  %s1408_s2 = inlined_call_operand.<no memory space> [shape: f32[1,1], index: 2, kind: input, shape index: {}]   ;;  %s1409_s3 = inlined_call_operand.vmem [shape: f32[512,1], index: 3, kind: output, shape index: {}]  }
   0x1   :  { %v8_v0 = vstv %s1408_s2  ;;  %s1212_s16 = smov 0  }
   0x2   :  { %9 = vst [vmem:[#allocation2] sm:$0x1] %v8_v0 }
   0x3 LB: > { %s27_s2 = sadd.s32 1, %s1179_s15  ;;  %p898_p0 = scmp.ge.s32.totalorder %s1183_s16, 1  ;;  %s1183_s16 = sphi %s1212_s16, %s15_s16   ;;  %s1179_s15 = sphi %s1210_s15, %s1411_s15   ;;  %s1175_s14 = sphi %s1208_s14, %s1410_s14  }
   0x4   : > { %p29_p1 = scmp.ge.s32.totalorder %s27_s2, 2  ;;  %p171_p2 = scmp.lt.s32.totalorder %s1183_s16, 3 }
   0x6   : > { %s1413_s2 = smov (%p29_p1, %s27_s2), 0  ;;  %p172_p3 = pnand %p898_p0, %p171_p2 }
   0x7   : > { %v1016_v1 = vld [vmem:[%s1407_s1] sm:$0xff] (!%p172_p3)   ;;  %s899_s19 = sshll.u32 (!%p172_p3), %s1175_s14, 5  ;;  %vm355_vm0 = vcmask (!%p172_p3), 130048   ;;  %vm757_vm1 = vcmask (!%p172_p3), 7168  }
   0x8   : > { %175 = sbr.rel (%p172_p3) target bundleno = 324 (0x144), region = 32  ;;  %p206_p4 = scmp.lt.s32.totalorder (!%p172_p3), %s899_s19, 63  ;;  %956 = vmatprep.subr.bf16.mxu0 (!%p172_p3), %v1016_v1  ;;  %990 = vmatprep.subr.bf16.mxu1 (!%p172_p3), %v1016_v1 }
   0x9   : > { %957 = vmatpush3.bf16.msra.mxu0 (!%p172_p3), %v1016_v1  ;;  %991 = vmatpush3.bf16.msra.mxu1 (!%p172_p3), %v1016_v1  ;;  %v1269_v18 = vld [vmem:[#allocation2] ss:$0 sm:$0xff] (!%p172_p3) }
   0xf   : > { %s1415_s19 = smov (!%p206_p4, %s899_s19), 63 }
  0x10   : > { %s900_s20 = sshll.u32 %s1415_s19, 2  ;;  %s902_s24 = sshll.u32 %s1415_s19, 3 }
  0x11   : > { %s1235_s23 = scalar_lea.vmem %s1406_s0, %s900_s20  ;;  %s1313_s27 = scalar_lea.vmem %s1409_s3, %s902_s24 }
  0x12   : > { %v1017_v2 = vld [vmem:[%s1235_s23] sm:$0xff]   ;;  %v1019_v4 = vld [vmem:[%s1235_s23 + $0x8] sm:$0xff]   ;;  %v1021_v6 = vld [vmem:[%s1235_s23 + $0x10] sm:$0xff]  }
  0x13   : > { %v1018_v3 = vld [vmem:[%s1235_s23 + $0x40] sm:$0xff]   ;;  %958 = vmatprep.mubr.msk.bf16.mxu0 %vm355_vm0, %v1017_v2  ;;  %v1020_v5 = vld [vmem:[%s1235_s23 + $0x48] sm:$0xff]   ;;  %v1022_v7 = vld [vmem:[%s1235_s23 + $0x50] sm:$0xff]  }
  0x14   : > { %974 = vmatprep.mubr.msk.bf16.mxu1 %vm355_vm0, %v1018_v3  ;;  %959 = vmatmul.mubr.msk.bf16.vlgmr.msra.gmra.mrb[0].mxu0 %vm355_vm0, %v1019_v4  ;;  %v1023_v8 = vld [vmem:[%s1235_s23 + $0x18] sm:$0xff]   ;;  %v1025_v10 = vld [vmem:[%s1235_s23 + $0x20] sm:$0xff]   ;;  %v1027_v12 = vld [vmem:[%s1235_s23 + $0x28] sm:$0xff]  }
  0x15   : > { %975 = vmatmul.mubr.msk.bf16.vlgmr.msra.gmra.mrb[0].mxu1 %vm355_vm0, %v1020_v5  ;;  %962 = vmatprep.mubr.msk.bf16.mxu0 %vm355_vm0, %v1021_v6  ;;  %v1024_v9 = vld [vmem:[%s1235_s23 + $0x58] sm:$0xff]   ;;  %v1026_v11 = vld [vmem:[%s1235_s23 + $0x60] sm:$0xff]   ;;  %v1028_v13 = vld [vmem:[%s1235_s23 + $0x68] sm:$0xff]  }
  0x16   : > { %978 = vmatprep.mubr.msk.bf16.mxu1 %vm355_vm0, %v1022_v7  ;;  %v1029_v14 = vld [vmem:[%s1235_s23 + $0x30] sm:$0xff]   ;;  %v1031_v16 = vld [vmem:[%s1235_s23 + $0x38] sm:$0xff]  }
  0x17   : > { %v1030_v15 = vld [vmem:[%s1235_s23 + $0x70] sm:$0xff]   ;;  %v1032_v17 = vld [vmem:[%s1235_s23 + $0x78] sm:$0xff]  }
  0x1c   : > { %963 = vmatmul.mubr.msk.bf16.gmra.mrb[4].mxu0 %vm355_vm0, %v1023_v8 }
  0x1d   : > { %979 = vmatmul.mubr.msk.bf16.gmra.mrb[4].mxu1 %vm355_vm0, %v1024_v9  ;;  %966 = vmatprep.mubr.msk.bf16.mxu0 %vm355_vm0, %v1025_v10 }
  0x1e   : > { %982 = vmatprep.mubr.msk.bf16.mxu1 %vm355_vm0, %v1026_v11 }
  0x24   : > { %967 = vmatmul.mubr.msk.bf16.gmra.mrb[8].mxu0 %vm355_vm0, %v1027_v12 }
  0x25   : > { %983 = vmatmul.mubr.msk.bf16.gmra.mrb[8].mxu1 %vm355_vm0, %v1028_v13  ;;  %970 = vmatprep.mubr.msk.bf16.mxu0 %vm355_vm0, %v1029_v14 }
  0x26   : > { %986 = vmatprep.mubr.msk.bf16.mxu1 %vm355_vm0, %v1030_v15 }
  0x2c   : > { %971 = vmatmul.mubr.msk.bf16.gmra.mrb[12].mxu0 %vm355_vm0, %v1031_v16 }
  0x2d   : > { %987 = vmatmul.mubr.msk.bf16.gmra.mrb[12].mxu1 %vm355_vm0, %v1032_v17 }
  0xe7   : > { %v960_v19 = vpop.f32.mrb[0].mxu0 }
  0xe8   : > { %v447_v20 = vadd.f32 %v960_v19, %v1269_v18  ;;  %v976_v21 = vpop.f32.mrb[0].mxu1  ;;  %v438_v22 = vpop.f32.mrb[1].mxu0 }
  0xe9   : > { %v511_v23 = vadd.f32 %v976_v21, %v1269_v18  ;;  %v439_v24 = vadd.f32 %v1269_v18, %v438_v22  ;;  %v502_v25 = vpop.f32.mrb[1].mxu1  ;;  %v961_v26 = vpop.f32.mrb[2].mxu0 }
  0xea   : > { %v567_v27 = vsub.f32 0.0, %v447_v20  ;;  %v503_v28 = vadd.f32 %v1269_v18, %v502_v25  ;;  %v450_v29 = vadd.f32 %v961_v26, %v1269_v18  ;;  %v977_v30 = vpop.f32.mrb[2].mxu1  ;;  %v441_v31 = vpop.f32.mrb[3].mxu0 }
  0xeb   : > { %v583_v32 = vsub.f32 0.0, %v511_v23  ;;  %v565_v33 = vsub.f32 0.0, %v439_v24  ;;  %v514_v34 = vadd.f32 %v977_v30, %v1269_v18  ;;  %v442_v35 = vadd.f32 %v1269_v18, %v441_v31  ;;  %v505_v36 = vpop.f32.mrb[3].mxu1 }
  0xec   : > { %v601_v37 = vmul.f32 1.442695, %v567_v27  ;;  %v581_v38 = vsub.f32 0.0, %v503_v28  ;;  %v568_v39 = vsub.f32 0.0, %v450_v29  ;;  %v506_v40 = vadd.f32 %v1269_v18, %v505_v36 }
  0xed   : > { %v633_v41 = vmul.f32 1.442695, %v583_v32  ;;  %v597_v42 = vmul.f32 1.442695, %v565_v33  ;;  %v584_v43 = vsub.f32 0.0, %v514_v34  ;;  %v566_v44 = vsub.f32 0.0, %v442_v35 }
  0xee   : > { %1033 = vpow2.f32 %v601_v37  ;;  %v629_v45 = vmul.f32 1.442695, %v581_v38  ;;  %v603_v46 = vmul.f32 1.442695, %v568_v39  ;;  %v582_v47 = vsub.f32 0.0, %v506_v40 }
  0xef   : > { %1035 = vpow2.f32 %v633_v41  ;;  %v635_v48 = vmul.f32 1.442695, %v584_v43  ;;  %v964_v49 = vpop.f32.mrb[4].mxu0  ;;  %v599_v50 = vmul.f32 1.442695, %v566_v44 }
  0xf0   : > { %1037 = vpow2.f32 %v597_v42  ;;  %v463_v51 = vadd.f32 %v964_v49, %v1269_v18  ;;  %v980_v52 = vpop.f32.mrb[4].mxu1  ;;  %v454_v53 = vpop.f32.mrb[5].mxu0  ;;  %v631_v54 = vmul.f32 1.442695, %v582_v47 }
  0xf1   : > { %1039 = vpow2.f32 %v629_v45  ;;  %v527_v55 = vadd.f32 %v980_v52, %v1269_v18  ;;  %v455_v56 = vadd.f32 %v1269_v18, %v454_v53  ;;  %v518_v57 = vpop.f32.mrb[5].mxu1  ;;  %v965_v58 = vpop.f32.mrb[6].mxu0 }
  0xf2   : > { %1041 = vpow2.f32 %v603_v46  ;;  %v571_v59 = vsub.f32 0.0, %v463_v51  ;;  %v519_v60 = vadd.f32 %v1269_v18, %v518_v57  ;;  %v466_v61 = vadd.f32 %v965_v58, %v1269_v18  ;;  %v981_v62 = vpop.f32.mrb[6].mxu1  ;;  %v457_v63 = vpop.f32.mrb[7].mxu0 }
  0xf3   : > { %1043 = vpow2.f32 %v635_v48  ;;  %v587_v0 = vsub.f32 0.0, %v527_v55  ;;  %v569_v1 = vsub.f32 0.0, %v455_v56  ;;  %v521_v2 = vpop.f32.mrb[7].mxu1  ;;  %v530_v12 = vadd.f32 %v981_v62, %v1269_v18 }
  0xf4   : > { %1045 = vpow2.f32 %v599_v50  ;;  %v609_v3 = vmul.f32 1.442695, %v571_v59  ;;  %v585_v4 = vsub.f32 0.0, %v519_v60  ;;  %v572_v5 = vsub.f32 0.0, %v466_v61 }
  0xf5   : > { %1047 = vpow2.f32 %v631_v54  ;;  %v641_v6 = vmul.f32 1.442695, %v587_v0  ;;  %v605_v7 = vmul.f32 1.442695, %v569_v1  ;;  %v458_v17 = vadd.f32 %v1269_v18, %v457_v63 }
  0xf6   : > { %1049 = vpow2.f32 %v609_v3  ;;  %v637_v8 = vmul.f32 1.442695, %v585_v4  ;;  %v611_v9 = vmul.f32 1.442695, %v572_v5  ;;  %v522_v23 = vadd.f32 %v1269_v18, %v521_v2 }
  0xf7   : > { %1051 = vpow2.f32 %v641_v6  ;;  %v968_v10 = vpop.f32.mrb[8].mxu0  ;;  %v588_v32 = vsub.f32 0.0, %v530_v12  ;;  %v570_v36 = vsub.f32 0.0, %v458_v17 }
  0xf8   : > { %v1034_v11 = vpop.eup %1033  ;;  %1053 = vpow2.f32 %v605_v7  ;;  %v984_v13 = vpop.f32.mrb[8].mxu1  ;;  %v479_v28 = vadd.f32 %v968_v10, %v1269_v18  ;;  %v586_v39 = vsub.f32 0.0, %v522_v23 }
  0xf9   : > { %v470_v14 = vpop.f32.mrb[9].mxu0  ;;  %v1036_v15 = vpop.eup %1035  ;;  %v663_v16 = vadd.f32 1.0, %v1034_v11  ;;  %1055 = vpow2.f32 %v637_v8  ;;  %v543_v33 = vadd.f32 %v984_v13, %v1269_v18  ;;  %v643_v46 = vmul.f32 1.442695, %v588_v32 }
  0xfa   : > { %v534_v19 = vpop.f32.mrb[9].mxu1  ;;  %v969_v20 = vpop.f32.mrb[10].mxu0  ;;  %v679_v22 = vadd.f32 1.0, %v1036_v15  ;;  %1057 = vpow2.f32 %v611_v9  ;;  %v575_v42 = vsub.f32 0.0, %v479_v28  ;;  %v607_v52 = vmul.f32 1.442695, %v570_v36 }
  0xfb   : > { %v1038_v21 = vpop.eup %1037  ;;  %v985_v24 = vpop.f32.mrb[10].mxu1  ;;  %1059 = vrcp.f32 %v663_v16  ;;  %v591_v47 = vsub.f32 0.0, %v543_v33  ;;  %v471_v53 = vadd.f32 %v1269_v18, %v470_v14  ;;  %v639_v58 = vmul.f32 1.442695, %v586_v39 }
  0xfc   : > { %v1287_v25 = vpop.f32.mrb[11].mxu0  ;;  %v1040_v26 = vpop.eup %1039  ;;  %v661_v27 = vadd.f32 1.0, %v1038_v21  ;;  %1061 = vrcp.f32 %v679_v22  ;;  %v535_v59 = vadd.f32 %v1269_v18, %v534_v19  ;;  %v617_v0 = vmul.f32 1.442695, %v575_v42 }
  0xfd   : > { %v1290_v29 = vpop.f32.mrb[11].mxu1  ;;  %v1042_v30 = vpop.eup %1041  ;;  %v677_v31 = vadd.f32 1.0, %v1040_v26  ;;  %v482_v1 = vadd.f32 %v969_v20, %v1269_v18  ;;  %v649_v5 = vmul.f32 1.442695, %v591_v47  ;;  %v546_v6 = vadd.f32 %v985_v24, %v1269_v18 }
  0xfe   : > { %v1044_v34 = vpop.eup %1043  ;;  %1063 = vrcp.f32 %v661_v27  ;;  %v664_v35 = vadd.f32 1.0, %v1042_v30  ;;  %v573_v9 = vsub.f32 0.0, %v471_v53  ;;  %v474_v10 = vadd.f32 %v1269_v18, %v1287_v25 }
  0xff   : > { %v1046_v37 = vpop.eup %1045  ;;  %1065 = vrcp.f32 %v677_v31  ;;  %v680_v38 = vadd.f32 1.0, %v1044_v34  ;;  %v972_v43 = vpop.f32.mrb[12].mxu0  ;;  %v589_v13 = vsub.f32 0.0, %v535_v59  ;;  %v538_v14 = vadd.f32 %v1269_v18, %v1290_v29 }
 0x100   : > { %v1048_v40 = vpop.eup %1047  ;;  %1067 = vrcp.f32 %v664_v35  ;;  %v662_v41 = vadd.f32 1.0, %v1046_v37  ;;  %v988_v48 = vpop.f32.mrb[12].mxu1  ;;  %v576_v17 = vsub.f32 0.0, %v482_v1  ;;  %v495_v19 = vadd.f32 %v972_v43, %v1269_v18 }
 0x101   : > { %v1050_v44 = vpop.eup %1049  ;;  %1069 = vrcp.f32 %v680_v38  ;;  %v678_v45 = vadd.f32 1.0, %v1048_v40  ;;  %v1293_v49 = vpop.f32.mrb[13].mxu0  ;;  %v592_v22 = vsub.f32 0.0, %v546_v6  ;;  %v559_v23 = vadd.f32 %v988_v48, %v1269_v18 }
 0x102   : > { %v1052_v50 = vpop.eup %1051  ;;  %1071 = vrcp.f32 %v662_v41  ;;  %v667_v51 = vadd.f32 1.0, %v1050_v44  ;;  %v1296_v54 = vpop.f32.mrb[13].mxu1  ;;  %v613_v26 = vmul.f32 1.442695, %v573_v9  ;;  %v574_v27 = vsub.f32 0.0, %v474_v10 }
 0x103   : > { %v1298_v55 = vpop.f32.mrb[14].mxu0  ;;  %v1054_v56 = vpop.eup %1053  ;;  %1073 = vrcp.f32 %v678_v45  ;;  %v683_v57 = vadd.f32 1.0, %v1052_v50  ;;  %v645_v30 = vmul.f32 1.442695, %v589_v13  ;;  %v590_v31 = vsub.f32 0.0, %v538_v14 }
 0x104   : > { %v1302_v60 = vpop.f32.mrb[14].mxu1  ;;  %v1304_v61 = vpop.f32.mrb[15].mxu0  ;;  %1075 = vrcp.f32 %v667_v51  ;;  %v665_v63 = vadd.f32 1.0, %v1054_v56  ;;  %v619_v34 = vmul.f32 1.442695, %v576_v17  ;;  %v579_v35 = vsub.f32 0.0, %v495_v19 }
 0x105   : > { %v1056_v62 = vpop.eup %1055  ;;  %v1307_v2 = vpop.f32.mrb[15].mxu1  ;;  %1077 = vrcp.f32 %v683_v57  ;;  %v651_v38 = vmul.f32 1.442695, %v592_v22  ;;  %v595_v39 = vsub.f32 0.0, %v559_v23  ;;  %v615_v42 = vmul.f32 1.442695, %v574_v27 }
 0x106   : > { %v1058_v3 = vpop.eup %1057  ;;  %v681_v4 = vadd.f32 1.0, %v1056_v62  ;;  %1079 = vrcp.f32 %v665_v63  ;;  %v647_v45 = vmul.f32 1.442695, %v590_v31  ;;  %v625_v48 = vmul.f32 1.442695, %v579_v35 }
 0x107   : > { %v1060_v7 = vpop.eup %1059  ;;  %v668_v8 = vadd.f32 1.0, %v1058_v3  ;;  %v487_v6 = vadd.f32 %v1269_v18, %v1293_v49  ;;  %v551_v9 = vadd.f32 %v1269_v18, %v1296_v54  ;;  %v490_v19 = vadd.f32 %v1269_v18, %v1304_v61 }
 0x108   : > { %v1062_v11 = vpop.eup %1061  ;;  %v727_v12 = vmin.f32 %v1060_v7, 1.0  ;;  %1081 = vrcp.f32 %v681_v4 }
 0x109   : > { %v1064_v15 = vpop.eup %1063  ;;  %v743_v16 = vmin.f32 %v1062_v11, 1.0  ;;  %1083 = vrcp.f32 %v668_v8  ;;  %v577_v17 = vsub.f32 0.0, %v487_v6  ;;  %v578_v61 = vsub.f32 0.0, %v490_v19 }
 0x10a   : > { %v1066_v20 = vpop.eup %1065  ;;  %760 = vst.msk [vmem:[%s1313_s27 + $0x10] sm:$0xff] %vm757_vm1, %v727_v12  ;;  %v725_v21 = vmin.f32 %v1064_v15, 1.0  ;;  %1085 = vpow2.f32 %v643_v46  ;;  %v498_v12 = vadd.f32 %v1298_v55, %v1269_v18  ;;  %v562_v15 = vadd.f32 %v1302_v60, %v1269_v18 }
 0x10b   : > { %v1068_v24 = vpop.eup %1067  ;;  %776 = vst.msk [vmem:[%s1313_s27 + $0x90] sm:$0xff] %vm757_vm1, %v743_v16  ;;  %v741_v25 = vmin.f32 %v1066_v20, 1.0  ;;  %1087 = vpow2.f32 %v607_v52  ;;  %v657_v52 = vmul.f32 1.442695, %v595_v39  ;;  %v554_v55 = vadd.f32 %v1269_v18, %v1307_v2 }
 0x10c   : > { %v1070_v28 = vpop.eup %1069  ;;  %758 = vst.msk [vmem:[%s1313_s27] sm:$0xff] %vm757_vm1, %v725_v21  ;;  %v728_v29 = vmin.f32 %v1068_v24, 1.0  ;;  %1089 = vpow2.f32 %v639_v58  ;;  %v593_v21 = vsub.f32 0.0, %v551_v9  ;;  %v580_v24 = vsub.f32 0.0, %v498_v12 }
 0x10d   : > { %v1072_v32 = vpop.eup %1071  ;;  %774 = vst.msk [vmem:[%s1313_s27 + $0x80] sm:$0xff] %vm757_vm1, %v741_v25  ;;  %v744_v33 = vmin.f32 %v1070_v28, 1.0  ;;  %1091 = vpow2.f32 %v617_v0  ;;  %v594_v18 = vsub.f32 0.0, %v554_v55 }
 0x10e   : > { %v1074_v36 = vpop.eup %1073  ;;  %761 = vst.msk [vmem:[%s1313_s27 + $0x18] sm:$0xff] %vm757_vm1, %v728_v29  ;;  %v726_v37 = vmin.f32 %v1072_v32, 1.0  ;;  %1093 = vpow2.f32 %v649_v5  ;;  %v621_v29 = vmul.f32 1.442695, %v577_v17  ;;  %v653_v32 = vmul.f32 1.442695, %v593_v21 }
 0x10f   : > { %v1076_v40 = vpop.eup %1075  ;;  %777 = vst.msk [vmem:[%s1313_s27 + $0x98] sm:$0xff] %vm757_vm1, %v744_v33  ;;  %v742_v41 = vmin.f32 %v1074_v36, 1.0  ;;  %1095 = vpow2.f32 %v613_v26  ;;  %v596_v26 = vsub.f32 0.0, %v562_v15 }
 0x110   : > { %v1078_v43 = vpop.eup %1077  ;;  %759 = vst.msk [vmem:[%s1313_s27 + $0x8] sm:$0xff] %vm757_vm1, %v726_v37  ;;  %v731_v44 = vmin.f32 %v1076_v40, 1.0  ;;  %1097 = vpow2.f32 %v645_v30  ;;  %v623_v40 = vmul.f32 1.442695, %v578_v61 }
 0x111   : > { %v1080_v46 = vpop.eup %1079  ;;  %775 = vst.msk [vmem:[%s1313_s27 + $0x88] sm:$0xff] %vm757_vm1, %v742_v41  ;;  %v747_v47 = vmin.f32 %v1078_v43, 1.0  ;;  %1099 = vpow2.f32 %v619_v34  ;;  %v627_v34 = vmul.f32 1.442695, %v580_v24  ;;  %v659_v37 = vmul.f32 1.442695, %v596_v26 }
 0x112   : > { %v1082_v50 = vpop.eup %1081  ;;  %764 = vst.msk [vmem:[%s1313_s27 + $0x30] sm:$0xff] %vm757_vm1, %v731_v44  ;;  %v729_v51 = vmin.f32 %v1080_v46, 1.0  ;;  %1101 = vpow2.f32 %v651_v38  ;;  %v655_v43 = vmul.f32 1.442695, %v594_v18 }
 0x113   : > { %v1084_v53 = vpop.eup %1083  ;;  %780 = vst.msk [vmem:[%s1313_s27 + $0xb0] sm:$0xff] %vm757_vm1, %v747_v47  ;;  %v745_v56 = vmin.f32 %v1082_v50, 1.0  ;;  %1103 = vpow2.f32 %v615_v42 }
 0x114   : > { %v1086_v57 = vpop.eup %1085  ;;  %762 = vst.msk [vmem:[%s1313_s27 + $0x20] sm:$0xff] %vm757_vm1, %v729_v51  ;;  %v732_v58 = vmin.f32 %v1084_v53, 1.0  ;;  %1105 = vpow2.f32 %v647_v45 }
 0x115   : > { %v1088_v59 = vpop.eup %1087  ;;  %778 = vst.msk [vmem:[%s1313_s27 + $0xa0] sm:$0xff] %vm757_vm1, %v745_v56  ;;  %v684_v62 = vadd.f32 1.0, %v1086_v57  ;;  %1107 = vpow2.f32 %v625_v48 }
 0x116   : > { %v1090_v63 = vpop.eup %1089  ;;  %765 = vst.msk [vmem:[%s1313_s27 + $0x38] sm:$0xff] %vm757_vm1, %v732_v58  ;;  %v666_v0 = vadd.f32 1.0, %v1088_v59  ;;  %1109 = vpow2.f32 %v657_v52 }
 0x117   : > { %v1092_v1 = vpop.eup %1091  ;;  %1111 = vrcp.f32 %v684_v62  ;;  %v682_v3 = vadd.f32 1.0, %v1090_v63 }
 0x118   : > { %v1094_v4 = vpop.eup %1093  ;;  %1113 = vrcp.f32 %v666_v0  ;;  %v671_v5 = vadd.f32 1.0, %v1092_v1 }
 0x119   : > { %v1096_v7 = vpop.eup %1095  ;;  %1115 = vrcp.f32 %v682_v3  ;;  %v687_v8 = vadd.f32 1.0, %v1094_v4 }
 0x11a   : > { %v1098_v10 = vpop.eup %1097  ;;  %1117 = vrcp.f32 %v671_v5  ;;  %v669_v11 = vadd.f32 1.0, %v1096_v7 }
 0x11b   : > { %v1100_v13 = vpop.eup %1099  ;;  %1119 = vrcp.f32 %v687_v8  ;;  %v685_v14 = vadd.f32 1.0, %v1098_v10 }
 0x11c   : > { %v1102_v16 = vpop.eup %1101  ;;  %1121 = vrcp.f32 %v669_v11  ;;  %v672_v49 = vadd.f32 1.0, %v1100_v13 }
 0x11d   : > { %v1104_v54 = vpop.eup %1103  ;;  %1123 = vrcp.f32 %v685_v14  ;;  %v688_v20 = vadd.f32 1.0, %v1102_v16 }
 0x11e   : > { %v1106_v22 = vpop.eup %1105  ;;  %1125 = vrcp.f32 %v672_v49  ;;  %v670_v23 = vadd.f32 1.0, %v1104_v54 }
 0x11f   : > { %v1108_v25 = vpop.eup %1107  ;;  %1127 = vrcp.f32 %v688_v20  ;;  %v686_v60 = vadd.f32 1.0, %v1106_v22 }
 0x120   : > { %v1110_v27 = vpop.eup %1109  ;;  %1129 = vrcp.f32 %v670_v23  ;;  %v675_v28 = vadd.f32 1.0, %v1108_v25 }
 0x121   : > { %v1112_v30 = vpop.eup %1111  ;;  %1131 = vrcp.f32 %v686_v60  ;;  %v691_v31 = vadd.f32 1.0, %v1110_v27 }
 0x122   : > { %v1114_v2 = vpop.eup %1113  ;;  %v748_v33 = vmin.f32 %v1112_v30, 1.0  ;;  %1133 = vrcp.f32 %v675_v28 }
 0x123   : > { %v1116_v35 = vpop.eup %1115  ;;  %v730_v36 = vmin.f32 %v1114_v2, 1.0  ;;  %1135 = vrcp.f32 %v691_v31 }
 0x124   : > { %v1118_v38 = vpop.eup %1117  ;;  %781 = vst.msk [vmem:[%s1313_s27 + $0xb8] sm:$0xff] %vm757_vm1, %v748_v33  ;;  %v746_v39 = vmin.f32 %v1116_v35, 1.0  ;;  %1137 = vpow2.f32 %v621_v29 }
 0x125   : > { %v1120_v41 = vpop.eup %1119  ;;  %763 = vst.msk [vmem:[%s1313_s27 + $0x28] sm:$0xff] %vm757_vm1, %v730_v36  ;;  %v735_v42 = vmin.f32 %v1118_v38, 1.0  ;;  %1139 = vpow2.f32 %v653_v32 }
 0x126   : > { %v1122_v44 = vpop.eup %1121  ;;  %779 = vst.msk [vmem:[%s1313_s27 + $0xa8] sm:$0xff] %vm757_vm1, %v746_v39  ;;  %v751_v45 = vmin.f32 %v1120_v41, 1.0  ;;  %1141 = vpow2.f32 %v627_v34 }
 0x127   : > { %v1124_v46 = vpop.eup %1123  ;;  %768 = vst.msk [vmem:[%s1313_s27 + $0x50] sm:$0xff] %vm757_vm1, %v735_v42  ;;  %v733_v47 = vmin.f32 %v1122_v44, 1.0  ;;  %1143 = vpow2.f32 %v659_v37 }
 0x128   : > { %v1126_v48 = vpop.eup %1125  ;;  %784 = vst.msk [vmem:[%s1313_s27 + $0xd0] sm:$0xff] %vm757_vm1, %v751_v45  ;;  %v749_v50 = vmin.f32 %v1124_v46, 1.0  ;;  %1145 = vpow2.f32 %v623_v40 }
 0x129   : > { %v1128_v51 = vpop.eup %1127  ;;  %766 = vst.msk [vmem:[%s1313_s27 + $0x40] sm:$0xff] %vm757_vm1, %v733_v47  ;;  %v736_v52 = vmin.f32 %v1126_v48, 1.0  ;;  %1147 = vpow2.f32 %v655_v43 }
 0x12a   : > { %v1130_v53 = vpop.eup %1129  ;;  %782 = vst.msk [vmem:[%s1313_s27 + $0xc0] sm:$0xff] %vm757_vm1, %v749_v50  ;;  %v752_v56 = vmin.f32 %v1128_v51, 1.0 }
 0x12b   : > { %v1132_v57 = vpop.eup %1131  ;;  %769 = vst.msk [vmem:[%s1313_s27 + $0x58] sm:$0xff] %vm757_vm1, %v736_v52  ;;  %v734_v58 = vmin.f32 %v1130_v53, 1.0 }
 0x12c   : > { %v1134_v59 = vpop.eup %1133  ;;  %785 = vst.msk [vmem:[%s1313_s27 + $0xd8] sm:$0xff] %vm757_vm1, %v752_v56  ;;  %v750_v62 = vmin.f32 %v1132_v57, 1.0 }
 0x12d   : > { %v1136_v63 = vpop.eup %1135  ;;  %767 = vst.msk [vmem:[%s1313_s27 + $0x48] sm:$0xff] %vm757_vm1, %v734_v58  ;;  %v739_v0 = vmin.f32 %v1134_v59, 1.0 }
 0x12e   : > { %v1138_v1 = vpop.eup %1137  ;;  %783 = vst.msk [vmem:[%s1313_s27 + $0xc8] sm:$0xff] %vm757_vm1, %v750_v62  ;;  %v755_v3 = vmin.f32 %v1136_v63, 1.0 }
 0x12f   : > { %v1140_v4 = vpop.eup %1139  ;;  %772 = vst.msk [vmem:[%s1313_s27 + $0x70] sm:$0xff] %vm757_vm1, %v739_v0  ;;  %v673_v5 = vadd.f32 1.0, %v1138_v1 }
 0x130   : > { %v1142_v6 = vpop.eup %1141  ;;  %788 = vst.msk [vmem:[%s1313_s27 + $0xf0] sm:$0xff] %vm757_vm1, %v755_v3  ;;  %v689_v7 = vadd.f32 1.0, %v1140_v4 }
 0x131   : > { %v1144_v8 = vpop.eup %1143  ;;  %1149 = vrcp.f32 %v673_v5  ;;  %v676_v9 = vadd.f32 1.0, %v1142_v6 }
 0x132   : > { %v1146_v10 = vpop.eup %1145  ;;  %1151 = vrcp.f32 %v689_v7  ;;  %v692_v11 = vadd.f32 1.0, %v1144_v8 }
 0x133   : > { %v1148_v12 = vpop.eup %1147  ;;  %1153 = vrcp.f32 %v676_v9  ;;  %v674_v13 = vadd.f32 1.0, %v1146_v10 }
 0x134   : > { %1155 = vrcp.f32 %v692_v11  ;;  %v690_v14 = vadd.f32 1.0, %v1148_v12 }
 0x135   : > { %1157 = vrcp.f32 %v674_v13 }
 0x136   : > { %1159 = vrcp.f32 %v690_v14 }
 0x13b   : > { %v1150_v15 = vpop.eup %1149 }
 0x13c   : > { %v1152_v16 = vpop.eup %1151  ;;  %v737_v49 = vmin.f32 %v1150_v15, 1.0 }
 0x13d   : > { %v1154_v17 = vpop.eup %1153  ;;  %v753_v19 = vmin.f32 %v1152_v16, 1.0 }
 0x13e   : > { %v1156_v54 = vpop.eup %1155  ;;  %770 = vst.msk [vmem:[%s1313_s27 + $0x60] sm:$0xff] %vm757_vm1, %v737_v49  ;;  %v740_v20 = vmin.f32 %v1154_v17, 1.0 }
 0x13f   : > { %v1158_v21 = vpop.eup %1157  ;;  %786 = vst.msk [vmem:[%s1313_s27 + $0xe0] sm:$0xff] %vm757_vm1, %v753_v19  ;;  %v756_v55 = vmin.f32 %v1156_v54, 1.0 }
 0x140   : > { %v1160_v22 = vpop.eup %1159  ;;  %773 = vst.msk [vmem:[%s1313_s27 + $0x78] sm:$0xff] %vm757_vm1, %v740_v20  ;;  %v738_v23 = vmin.f32 %v1158_v21, 1.0 }
 0x141   : > { %789 = vst.msk [vmem:[%s1313_s27 + $0xf8] sm:$0xff] %vm757_vm1, %v756_v55  ;;  %v754_v24 = vmin.f32 %v1160_v22, 1.0 }
 0x142   : > { %771 = vst.msk [vmem:[%s1313_s27 + $0x68] sm:$0xff] %vm757_vm1, %v738_v23 }
 0x143   : > { %787 = vst.msk [vmem:[%s1313_s27 + $0xe8] sm:$0xff] %vm757_vm1, %v754_v24 }
 0x144 PF: > { %s15_s16 = sadd.s32 1, %s1183_s16   ;;  %s1410_s14 = smov %s1179_s15 }
 0x145   : > { %p12_p5 = scmp.ge.s32.totalorder %s15_s16, 4   ;;  %s1411_s15 = smov %s1413_s2 }
 0x147   :  { %14 = sbr.rel (!%p12_p5) target bundleno = 3 (0x3), region = 68 }

// kernel: unet_forward.23
= control target key start
LH: loop header
LB: loop body
LE: loop exit
PB: predicated region body
PF: predicated region fallthrough
CT: control target
= control target key end

     0   :  { %s1994_s18 = smov 0   ;;  %s1996_s19 = smov 0   ;;  %s2294_s0 = inlined_call_operand.vmem [shape: bf16[512,144], index: 0, kind: input, shape index: {}]   ;;  %s2295_s1 = inlined_call_operand.vmem [shape: bf16[144,16], index: 1, kind: input, shape index: {}]   ;;  %s2296_s2 = inlined_call_operand.vmem [shape: bf16[512,144], index: 2, kind: input, shape index: {}]   ;;  %s2297_s3 = inlined_call_operand.vmem [shape: bf16[144,16], index: 3, kind: input, shape index: {}]   ;;  %s2298_s4 = inlined_call_operand.vmem [shape: f32[1,16], index: 4, kind: input, shape index: {}]   ;;  %s2299_s5 = inlined_call_operand.vmem [shape: bf16[512,16], index: 5, kind: output, shape index: {}]  }
   0x1   :  { %s1998_s20 = smov 0  }
   0x2 LB: > { %s27_s21 = sadd.s32 1, %s1957_s19  ;;  %p1608_p0 = scmp.ge.s32.totalorder %s1961_s20, 1  ;;  %s1961_s20 = sphi %s1998_s20, %s15_s20   ;;  %s1957_s19 = sphi %s1996_s19, %s2301_s19   ;;  %s1953_s18 = sphi %s1994_s18, %s2300_s18  }
   0x3   : > { %p29_p1 = scmp.ge.s32.totalorder %s27_s21, 2  ;;  %p241_p2 = scmp.lt.s32.totalorder %s1961_s20, 3 }
   0x5   : > { %s2303_s21 = smov (%p29_p1, %s27_s21), 0  ;;  %p242_p3 = pnand %p1608_p0, %p241_p2 }
   0x6   : > { %v1825_v0 = vld [vmem:[%s2297_s3] sm:$0xff] (!%p242_p3)   ;;  %v1963_v1 = vmov (!%p242_p3), 0   ;;  %v1827_v3 = vld [vmem:[%s2297_s3 + $0x8] sm:$0xff] (!%p242_p3)   ;;  %s1609_s28 = sshll.u32 (!%p242_p3), %s1953_s18, 5  ;;  %v1829_v5 = vld [vmem:[%s2297_s3 + $0x10] sm:$0xff] (!%p242_p3)   ;;  %vm623_vm0 = vcmask (!%p242_p3), 130048  }
   0x7   : > { %245 = sbr.rel (%p242_p3) target bundleno = 386 (0x182), region = 40  ;;  %672 = vmatprep.subr.bf16.mxu0 (!%p242_p3), %v1963_v1  ;;  %1079 = vmatprep.subr.bf16.mxu1 (!%p242_p3), %v1963_v1  ;;  %v1826_v2 = vld [vmem:[%s2295_s1] sm:$0xff] (!%p242_p3)   ;;  %v1828_v4 = vld [vmem:[%s2295_s1 + $0x8] sm:$0xff] (!%p242_p3)   ;;  %p291_p4 = scmp.lt.s32.totalorder (!%p242_p3), %s1609_s28, 63  ;;  %v1830_v6 = vld [vmem:[%s2295_s1 + $0x10] sm:$0xff] (!%p242_p3)   ;;  %vm1439_vm1 = vcmask (!%p242_p3), 125952  }
   0x8   : > { %673 = vmatpush1.bf16.msra.mxu0 (!%p242_p3), %v1825_v0  ;;  %1080 = vmatpush1.bf16.msra.mxu1 (!%p242_p3), %v1826_v2  ;;  %v1831_v7 = vld [vmem:[%s2297_s3 + $0x18] sm:$0xff] (!%p242_p3)   ;;  %v1833_v9 = vld [vmem:[%s2297_s3 + $0x20] sm:$0xff] (!%p242_p3)   ;;  %v1835_v11 = vld [vmem:[%s2297_s3 + $0x28] sm:$0xff] (!%p242_p3)  }
   0x9   : > { %674 = vmatprep.subr.bf16.mxu0 (!%p242_p3), %v1963_v1  ;;  %1081 = vmatprep.subr.bf16.mxu1 (!%p242_p3), %v1963_v1  ;;  %v1832_v8 = vld [vmem:[%s2295_s1 + $0x18] sm:$0xff] (!%p242_p3)   ;;  %v1834_v10 = vld [vmem:[%s2295_s1 + $0x20] sm:$0xff] (!%p242_p3)   ;;  %v1836_v12 = vld [vmem:[%s2295_s1 + $0x28] sm:$0xff] (!%p242_p3)  }
   0xa   : > { %v1837_v15 = vld [vmem:[%s2297_s3 + $0x30] sm:$0xff] (!%p242_p3)   ;;  %v1839_v17 = vld [vmem:[%s2297_s3 + $0x38] sm:$0xff] (!%p242_p3)   ;;  %v1841_v19 = vld [vmem:[%s2297_s3 + $0x40] sm:$0xff] (!%p242_p3)  }
   0xb   : > { %v1838_v16 = vld [vmem:[%s2295_s1 + $0x30] sm:$0xff] (!%p242_p3)   ;;  %v1840_v18 = vld [vmem:[%s2295_s1 + $0x38] sm:$0xff] (!%p242_p3)   ;;  %v1842_v20 = vld [vmem:[%s2295_s1 + $0x40] sm:$0xff] (!%p242_p3)  }
   0xc   : > { %675 = vmatpush1.bf16.msra.mxu0 (!%p242_p3), %v1827_v3  ;;  %1082 = vmatpush1.bf16.msra.mxu1 (!%p242_p3), %v1828_v4 }
   0xd   : > { %676 = vmatprep.subr.bf16.mxu0 (!%p242_p3), %v1963_v1  ;;  %1083 = vmatprep.subr.bf16.mxu1 (!%p242_p3), %v1963_v1 }
   0xe   : > { %s2305_s28 = smov (!%p291_p4, %s1609_s28), 63 }
   0xf   : > { %s1766_s14 = sshll.u32 %s2305_s28, 3  ;;  %s1616_s26 = sshll.u32 %s2305_s28, 2 }
  0x10   : > { %677 = vmatpush1.bf16.msra.mxu0 %v1829_v5  ;;  %1084 = vmatpush1.bf16.msra.mxu1 %v1830_v6  ;;  %s2051_s24 = scalar_lea.vmem %s2296_s2, %s1766_s14  ;;  %s2059_s30 = scalar_lea.vmem %s2294_s0, %s1766_s14 }
  0x11   : > { %678 = vmatprep.subr.bf16.mxu0 %v1963_v1  ;;  %1085 = vmatprep.subr.bf16.mxu1 %v1963_v1  ;;  %v1845_v13 = vld [vmem:[%s2051_s24 + $0x4] ss:$8 sps:$4 sm:$0xff]   ;;  %v1843_v21 = vld [vmem:[%s2051_s24] ss:$8 sps:$4 sm:$0xff]   ;;  %v1849_v23 = vld [vmem:[%s2051_s24 + $0x14] ss:$8 sps:$4 sm:$0xff]   ;;  %s2189_s29 = scalar_lea.vmem %s2299_s5, %s1616_s26 }
  0x12   : > { %v1848_v14 = vld [vmem:[%s2059_s30 + $0x4] ss:$8 sps:$4 sm:$0xff]   ;;  %1658 = vmatprep.mubr.msk.bf16.mxu0 %vm623_vm0, %v1845_v13  ;;  %v1846_v22 = vld [vmem:[%s2059_s30] ss:$8 sps:$4 sm:$0xff]   ;;  %v1851_v24 = vld [vmem:[%s2059_s30 + $0x14] ss:$8 sps:$4 sm:$0xff]  }
  0x13   : > { %1715 = vmatprep.mubr.msk.bf16.mxu1 %vm623_vm0, %v1848_v14  ;;  %v1853_v25 = vld [vmem:[%s2051_s24 + $0x10] ss:$8 sps:$4 sm:$0xff]   ;;  %v1855_v27 = vld [vmem:[%s2051_s24 + $0x24] ss:$8 sps:$4 sm:$0xff]   ;;  %v1859_v29 = vld [vmem:[%s2051_s24 + $0x20] ss:$8 sps:$4 sm:$0xff]  }
  0x14   : > { %679 = vmatpush1.bf16.msra.mxu0 %v1831_v7  ;;  %1086 = vmatpush1.bf16.msra.mxu1 %v1832_v8  ;;  %v1854_v26 = vld [vmem:[%s2059_s30 + $0x10] ss:$8 sps:$4 sm:$0xff]   ;;  %v1857_v28 = vld [vmem:[%s2059_s30 + $0x24] ss:$8 sps:$4 sm:$0xff]   ;;  %v1860_v30 = vld [vmem:[%s2059_s30 + $0x20] ss:$8 sps:$4 sm:$0xff]  }
  0x15   : > { %680 = vmatprep.subr.bf16.mxu0 %v1963_v1  ;;  %1087 = vmatprep.subr.bf16.mxu1 %v1963_v1  ;;  %v1861_v31 = vld [vmem:[%s2051_s24 + $0x34] ss:$8 sps:$4 sm:$0xff]   ;;  %v1865_v33 = vld [vmem:[%s2051_s24 + $0x30] ss:$8 sps:$4 sm:$0xff]   ;;  %v1867_v35 = vld [vmem:[%s2051_s24 + $0x44] ss:$8 sps:$4 sm:$0xff]  }
  0x16   : > { %v1863_v32 = vld [vmem:[%s2059_s30 + $0x34] ss:$8 sps:$4 sm:$0xff]   ;;  %v1866_v34 = vld [vmem:[%s2059_s30 + $0x30] ss:$8 sps:$4 sm:$0xff]   ;;  %v1869_v36 = vld [vmem:[%s2059_s30 + $0x44] ss:$8 sps:$4 sm:$0xff]  }
  0x17   : > { %v1871_v37 = vld [vmem:[%s2051_s24 + $0x40] ss:$8 sps:$4 sm:$0xff]   ;;  %v1873_v39 = vld [vmem:[%s2051_s24 + $0x54] ss:$8 sps:$4 sm:$0xff]   ;;  %v1877_v41 = vld [vmem:[%s2051_s24 + $0x50] ss:$8 sps:$4 sm:$0xff]  }
  0x18   : > { %681 = vmatpush1.bf16.msra.mxu0 %v1833_v9  ;;  %1088 = vmatpush1.bf16.msra.mxu1 %v1834_v10  ;;  %v1872_v38 = vld [vmem:[%s2059_s30 + $0x40] ss:$8 sps:$4 sm:$0xff]   ;;  %v1875_v40 = vld [vmem:[%s2059_s30 + $0x54] ss:$8 sps:$4 sm:$0xff]   ;;  %v1878_v42 = vld [vmem:[%s2059_s30 + $0x50] ss:$8 sps:$4 sm:$0xff]  }
  0x19   : > { %682 = vmatprep.subr.bf16.mxu0 %v1963_v1  ;;  %1089 = vmatprep.subr.bf16.mxu1 %v1963_v1  ;;  %v1879_v43 = vld [vmem:[%s2051_s24 + $0x64] ss:$8 sps:$4 sm:$0xff]   ;;  %v1883_v45 = vld [vmem:[%s2051_s24 + $0x60] ss:$8 sps:$4 sm:$0xff]   ;;  %v1885_v47 = vld [vmem:[%s2051_s24 + $0x74] ss:$8 sps:$4 sm:$0xff]  }
  0x1a   : > { %v1881_v44 = vld [vmem:[%s2059_s30 + $0x64] ss:$8 sps:$4 sm:$0xff]   ;;  %v1884_v46 = vld [vmem:[%s2059_s30 + $0x60] ss:$8 sps:$4 sm:$0xff]   ;;  %v1887_v48 = vld [vmem:[%s2059_s30 + $0x74] ss:$8 sps:$4 sm:$0xff]  }
  0x1b   : > { %v1889_v49 = vld [vmem:[%s2051_s24 + $0x70] ss:$8 sps:$4 sm:$0xff]   ;;  %v1891_v51 = vld [vmem:[%s2051_s24 + $0x84] ss:$8 sps:$4 sm:$0xff]   ;;  %v1895_v53 = vld [vmem:[%s2051_s24 + $0x80] ss:$8 sps:$4 sm:$0xff]  }
  0x1c   : > { %683 = vmatpush1.bf16.msra.mxu0 %v1835_v11  ;;  %1090 = vmatpush1.bf16.msra.mxu1 %v1836_v12  ;;  %v1890_v50 = vld [vmem:[%s2059_s30 + $0x70] ss:$8 sps:$4 sm:$0xff]   ;;  %v1893_v52 = vld [vmem:[%s2059_s30 + $0x84] ss:$8 sps:$4 sm:$0xff]   ;;  %v1896_v54 = vld [vmem:[%s2059_s30 + $0x80] ss:$8 sps:$4 sm:$0xff]  }
  0x1d   : > { %684 = vmatprep.subr.bf16.mxu0 %v1963_v1  ;;  %1091 = vmatprep.subr.bf16.mxu1 %v1963_v1  ;;  %v1897_v55 = vld [vmem:[%s2051_s24 + $0x94] ss:$8 sps:$4 sm:$0xff]   ;;  %v1901_v57 = vld [vmem:[%s2051_s24 + $0x90] ss:$8 sps:$4 sm:$0xff]   ;;  %v1903_v59 = vld [vmem:[%s2051_s24 + $0xa4] ss:$8 sps:$4 sm:$0xff]  }
  0x1e   : > { %v1899_v56 = vld [vmem:[%s2059_s30 + $0x94] ss:$8 sps:$4 sm:$0xff]   ;;  %v1902_v58 = vld [vmem:[%s2059_s30 + $0x90] ss:$8 sps:$4 sm:$0xff]   ;;  %v1905_v60 = vld [vmem:[%s2059_s30 + $0xa4] ss:$8 sps:$4 sm:$0xff]  }
  0x1f   : > { %v1907_v61 = vld [vmem:[%s2051_s24 + $0xa0] ss:$8 sps:$4 sm:$0xff]   ;;  %v1909_v63 = vld [vmem:[%s2051_s24 + $0xb4] ss:$8 sps:$4 sm:$0xff]   ;;  %v1914_v2 = vld [vmem:[%s2059_s30 + $0xb0] ss:$8 sps:$4 sm:$0xff]  }
  0x20   : > { %685 = vmatpush1.bf16.msra.mxu0 %v1837_v15  ;;  %1092 = vmatpush1.bf16.msra.mxu1 %v1838_v16  ;;  %v1908_v62 = vld [vmem:[%s2059_s30 + $0xa0] ss:$8 sps:$4 sm:$0xff]   ;;  %v1911_v0 = vld [vmem:[%s2059_s30 + $0xb4] ss:$8 sps:$4 sm:$0xff]   ;;  %v1915_v3 = vld [vmem:[%s2051_s24 + $0xc4] ss:$8 sps:$4 sm:$0xff]  }
  0x21   : > { %686 = vmatprep.subr.bf16.mxu0 %v1963_v1  ;;  %1093 = vmatprep.subr.bf16.mxu1 %v1963_v1  ;;  %v1917_v4 = vld [vmem:[%s2059_s30 + $0xc4] ss:$8 sps:$4 sm:$0xff]   ;;  %v1919_v5 = vld [vmem:[%s2051_s24 + $0xc0] ss:$8 sps:$4 sm:$0xff]   ;;  %v1921_v7 = vld [vmem:[%s2051_s24 + $0xd4] ss:$8 sps:$4 sm:$0xff]  }
  0x22   : > { %v1920_v6 = vld [vmem:[%s2059_s30 + $0xc0] ss:$8 sps:$4 sm:$0xff]   ;;  %v1923_v8 = vld [vmem:[%s2059_s30 + $0xd4] ss:$8 sps:$4 sm:$0xff]   ;;  %v1925_v9 = vld [vmem:[%s2051_s24 + $0xd0] ss:$8 sps:$4 sm:$0xff]  }
  0x23   : > { %v1926_v10 = vld [vmem:[%s2059_s30 + $0xd0] ss:$8 sps:$4 sm:$0xff]   ;;  %v1927_v11 = vld [vmem:[%s2051_s24 + $0xe4] ss:$8 sps:$4 sm:$0xff]   ;;  %v1931_v13 = vld [vmem:[%s2051_s24 + $0xe0] ss:$8 sps:$4 sm:$0xff]  }
  0x24   : > { %687 = vmatpush1.bf16.msra.mxu0 %v1839_v17  ;;  %1094 = vmatpush1.bf16.msra.mxu1 %v1840_v18  ;;  %v1929_v12 = vld [vmem:[%s2059_s30 + $0xe4] ss:$8 sps:$4 sm:$0xff]   ;;  %v1932_v14 = vld [vmem:[%s2059_s30 + $0xe0] ss:$8 sps:$4 sm:$0xff]   ;;  %v1933_v15 = vld [vmem:[%s2051_s24 + $0xf4] ss:$8 sps:$4 sm:$0xff]  }
  0x25   : > { %688 = vmatprep.subr.bf16.mxu0 %v1963_v1  ;;  %1095 = vmatprep.subr.bf16.mxu1 %v1963_v1  ;;  %v1913_v1 = vld [vmem:[%s2051_s24 + $0xb0] ss:$8 sps:$4 sm:$0xff]   ;;  %v1935_v16 = vld [vmem:[%s2059_s30 + $0xf4] ss:$8 sps:$4 sm:$0xff]  }
  0x26   : > { %v1937_v17 = vld [vmem:[%s2051_s24 + $0xf0] ss:$8 sps:$4 sm:$0xff]  }
  0x27   : > { %v1938_v18 = vld [vmem:[%s2059_s30 + $0xf0] ss:$8 sps:$4 sm:$0xff]  }
  0x28   : > { %689 = vmatpush1.bf16.msra.mxu0 %v1841_v19  ;;  %1096 = vmatpush1.bf16.msra.mxu1 %v1842_v20 }
  0x2b   : > { %705 = vmatmul.mubr.bf16.vlgmr.msra.gmra.mrb[0].mxu0 %v1843_v21  ;;  %1112 = vmatmul.mubr.bf16.vlgmr.msra.gmra.mrb[0].mxu1 %v1846_v22  ;;  %v2181_v21 = vld [vmem:[%s2298_s4] ss:$0 sm:$0xff] }
  0x2c   : > { %1659 = vmatprep.mubr.msk.bf16.mxu0 %vm623_vm0, %v1849_v23  ;;  %1716 = vmatprep.mubr.msk.bf16.mxu1 %vm623_vm0, %v1851_v24 }
  0x33   : > { %713 = vmatmul.mubr.bf16.gmra.mrb[4].mxu0 %v1853_v25  ;;  %1120 = vmatmul.mubr.bf16.gmra.mrb[4].mxu1 %v1854_v26 }
  0x34   : > { %1660 = vmatprep.mubr.msk.bf16.mxu0 %vm623_vm0, %v1855_v27  ;;  %1717 = vmatprep.mubr.msk.bf16.mxu1 %vm623_vm0, %v1857_v28 }
  0x3b   : > { %721 = vmatmul.mubr.bf16.gmra.mrb[8].mxu0 %v1859_v29  ;;  %1128 = vmatmul.mubr.bf16.gmra.mrb[8].mxu1 %v1860_v30 }
  0x3c   : > { %1661 = vmatprep.mubr.msk.bf16.mxu0 %vm623_vm0, %v1861_v31  ;;  %1718 = vmatprep.mubr.msk.bf16.mxu1 %vm623_vm0, %v1863_v32 }
  0x43   : > { %729 = vmatmul.mubr.bf16.gmra.mrb[12].mxu0 %v1865_v33  ;;  %1136 = vmatmul.mubr.bf16.gmra.mrb[12].mxu1 %v1866_v34 }
  0x44   : > { %1662 = vmatprep.mubr.msk.bf16.mxu0 %vm623_vm0, %v1867_v35  ;;  %1719 = vmatprep.mubr.msk.bf16.mxu1 %vm623_vm0, %v1869_v36 }
  0x4b   : > { %737 = vmatmul.mubr.bf16.gmra.mrb[16].mxu0 %v1871_v37  ;;  %1144 = vmatmul.mubr.bf16.gmra.mrb[16].mxu1 %v1872_v38 }
  0x4c   : > { %1663 = vmatprep.mubr.msk.bf16.mxu0 %vm623_vm0, %v1873_v39  ;;  %1720 = vmatprep.mubr.msk.bf16.mxu1 %vm623_vm0, %v1875_v40 }
  0x53   : > { %745 = vmatmul.mubr.bf16.gmra.mrb[20].mxu0 %v1877_v41  ;;  %1152 = vmatmul.mubr.bf16.gmra.mrb[20].mxu1 %v1878_v42 }
  0x54   : > { %1664 = vmatprep.mubr.msk.bf16.mxu0 %vm623_vm0, %v1879_v43  ;;  %1721 = vmatprep.mubr.msk.bf16.mxu1 %vm623_vm0, %v1881_v44 }
  0x5b   : > { %753 = vmatmul.mubr.bf16.gmra.mrb[24].mxu0 %v1883_v45  ;;  %1160 = vmatmul.mubr.bf16.gmra.mrb[24].mxu1 %v1884_v46 }
  0x5c   : > { %1665 = vmatprep.mubr.msk.bf16.mxu0 %vm623_vm0, %v1885_v47  ;;  %1722 = vmatprep.mubr.msk.bf16.mxu1 %vm623_vm0, %v1887_v48 }
  0x63   : > { %761 = vmatmul.mubr.bf16.gmra.mrb[28].mxu0 %v1889_v49  ;;  %1168 = vmatmul.mubr.bf16.gmra.mrb[28].mxu1 %v1890_v50 }
  0x64   : > { %1666 = vmatprep.mubr.msk.bf16.mxu0 %vm623_vm0, %v1891_v51  ;;  %1723 = vmatprep.mubr.msk.bf16.mxu1 %vm623_vm0, %v1893_v52 }
  0x6b   : > { %769 = vmatmul.mubr.bf16.gmra.mrb[32].mxu0 %v1895_v53  ;;  %1176 = vmatmul.mubr.bf16.gmra.mrb[32].mxu1 %v1896_v54 }
  0x6c   : > { %1667 = vmatprep.mubr.msk.bf16.mxu0 %vm623_vm0, %v1897_v55  ;;  %1724 = vmatprep.mubr.msk.bf16.mxu1 %vm623_vm0, %v1899_v56 }
  0x73   : > { %777 = vmatmul.mubr.bf16.gmra.mrb[36].mxu0 %v1901_v57  ;;  %1184 = vmatmul.mubr.bf16.gmra.mrb[36].mxu1 %v1902_v58 }
  0x74   : > { %1668 = vmatprep.mubr.msk.bf16.mxu0 %vm623_vm0, %v1903_v59  ;;  %1725 = vmatprep.mubr.msk.bf16.mxu1 %vm623_vm0, %v1905_v60 }
  0x7b   : > { %785 = vmatmul.mubr.bf16.gmra.mrb[40].mxu0 %v1907_v61  ;;  %1192 = vmatmul.mubr.bf16.gmra.mrb[40].mxu1 %v1908_v62 }
  0x7c   : > { %1669 = vmatprep.mubr.msk.bf16.mxu0 %vm623_vm0, %v1909_v63  ;;  %1726 = vmatprep.mubr.msk.bf16.mxu1 %vm623_vm0, %v1911_v0 }
  0x83   : > { %793 = vmatmul.mubr.bf16.gmra.mrb[44].mxu0 %v1913_v1  ;;  %1200 = vmatmul.mubr.bf16.gmra.mrb[44].mxu1 %v1914_v2 }
  0x84   : > { %1670 = vmatprep.mubr.msk.bf16.mxu0 %vm623_vm0, %v1915_v3  ;;  %1727 = vmatprep.mubr.msk.bf16.mxu1 %vm623_vm0, %v1917_v4 }
  0x8b   : > { %801 = vmatmul.mubr.bf16.gmra.mrb[48].mxu0 %v1919_v5  ;;  %1208 = vmatmul.mubr.bf16.gmra.mrb[48].mxu1 %v1920_v6 }
  0x8c   : > { %1671 = vmatprep.mubr.msk.bf16.mxu0 %vm623_vm0, %v1921_v7  ;;  %1728 = vmatprep.mubr.msk.bf16.mxu1 %vm623_vm0, %v1923_v8 }
  0x93   : > { %809 = vmatmul.mubr.bf16.gmra.mrb[52].mxu0 %v1925_v9  ;;  %1216 = vmatmul.mubr.bf16.gmra.mrb[52].mxu1 %v1926_v10 }
  0x94   : > { %1672 = vmatprep.mubr.msk.bf16.mxu0 %vm623_vm0, %v1927_v11  ;;  %1729 = vmatprep.mubr.msk.bf16.mxu1 %vm623_vm0, %v1929_v12 }
  0x9b   : > { %817 = vmatmul.mubr.bf16.gmra.mrb[56].mxu0 %v1931_v13  ;;  %1224 = vmatmul.mubr.bf16.gmra.mrb[56].mxu1 %v1932_v14 }
  0x9c   : > { %1673 = vmatprep.mubr.msk.bf16.mxu0 %vm623_vm0, %v1933_v15  ;;  %1730 = vmatprep.mubr.msk.bf16.mxu1 %vm623_vm0, %v1935_v16 }
  0xa3   : > { %825 = vmatmul.mubr.bf16.gmra.mrb[60].mxu0 %v1937_v17  ;;  %1232 = vmatmul.mubr.bf16.gmra.mrb[60].mxu1 %v1938_v18 }
  0xfe   : > { %v706_v19 = vpop.f32.mrb[0].mxu0  ;;  %v1113_v20 = vpop.f32.mrb[0].mxu1 }
  0xff   : > { %v708_v22 = vpop.f32.mrb[1].mxu0  ;;  %v1114_v23 = vadd.f32 %v1113_v20, %v706_v19  ;;  %v1115_v24 = vpop.f32.mrb[1].mxu1 }
 0x100   : > { %v709_v25 = vpop.f32.mrb[2].mxu0  ;;  %v1116_v26 = vpop.f32.mrb[2].mxu1 }
 0x101   : > { %v711_v27 = vpop.f32.mrb[3].mxu0  ;;  %v1247_v28 = vadd.f32 %v2181_v21, %v1114_v23  ;;  %v1117_v29 = vadd.f32 %v1116_v26, %v709_v25  ;;  %v1118_v30 = vpop.f32.mrb[3].mxu1 }
 0x103   : > { %v1279_v31 = vmax.f32 %v1247_v28, 0.0  ;;  %v1248_v32 = vadd.f32 %v2181_v21, %v1117_v29 }
 0x105   : > { %v1768_v33 = vpack.c.bf16 %v1279_v31, %v1279_v31  ;;  %v1280_v34 = vmax.f32 %v1248_v32, 0.0 }
 0x106   : > { %v714_v35 = vpop.f32.mrb[4].mxu0  ;;  %v1121_v36 = vpop.f32.mrb[4].mxu1 }
 0x107   : > { %v716_v37 = vpop.f32.mrb[5].mxu0  ;;  %1440 = vst.msk [vmem:[%s2189_s29] sm:$0xf] %vm1439_vm1, %v1768_v33  ;;  %v1769_v38 = vpack.c.bf16 %v1280_v34, %v1280_v34  ;;  %v1122_v39 = vadd.f32 %v1121_v36, %v714_v35  ;;  %v1123_v40 = vpop.f32.mrb[5].mxu1 }
 0x108   : > { %v717_v41 = vpop.f32.mrb[6].mxu0  ;;  %v1124_v42 = vpop.f32.mrb[6].mxu1 }
 0x109   : > { %v719_v43 = vpop.f32.mrb[7].mxu0  ;;  %1441 = vst.msk [vmem:[%s2189_s29 + $0x4] sm:$0xf] %vm1439_vm1, %v1769_v38  ;;  %v1249_v44 = vadd.f32 %v2181_v21, %v1122_v39  ;;  %v1125_v45 = vadd.f32 %v1124_v42, %v717_v41  ;;  %v1126_v46 = vpop.f32.mrb[7].mxu1 }
 0x10b   : > { %v1281_v47 = vmax.f32 %v1249_v44, 0.0  ;;  %v1250_v48 = vadd.f32 %v2181_v21, %v1125_v45 }
 0x10d   : > { %v1770_v49 = vpack.c.bf16 %v1281_v47, %v1281_v47  ;;  %v1282_v50 = vmax.f32 %v1250_v48, 0.0 }
 0x10e   : > { %v722_v51 = vpop.f32.mrb[8].mxu0  ;;  %v1129_v52 = vpop.f32.mrb[8].mxu1 }
 0x10f   : > { %v724_v53 = vpop.f32.mrb[9].mxu0  ;;  %1442 = vst.msk [vmem:[%s2189_s29 + $0x8] sm:$0xf] %vm1439_vm1, %v1770_v49  ;;  %v1771_v54 = vpack.c.bf16 %v1282_v50, %v1282_v50  ;;  %v1130_v55 = vadd.f32 %v1129_v52, %v722_v51  ;;  %v1131_v56 = vpop.f32.mrb[9].mxu1 }
 0x110   : > { %v725_v57 = vpop.f32.mrb[10].mxu0  ;;  %v1132_v58 = vpop.f32.mrb[10].mxu1 }
 0x111   : > { %v727_v59 = vpop.f32.mrb[11].mxu0  ;;  %1443 = vst.msk [vmem:[%s2189_s29 + $0xc] sm:$0xf] %vm1439_vm1, %v1771_v54  ;;  %v1251_v60 = vadd.f32 %v2181_v21, %v1130_v55  ;;  %v1133_v61 = vadd.f32 %v1132_v58, %v725_v57  ;;  %v1134_v62 = vpop.f32.mrb[11].mxu1 }
 0x113   : > { %v1283_v63 = vmax.f32 %v1251_v60, 0.0  ;;  %v1252_v0 = vadd.f32 %v2181_v21, %v1133_v61 }
 0x115   : > { %v1772_v1 = vpack.c.bf16 %v1283_v63, %v1283_v63  ;;  %v1284_v2 = vmax.f32 %v1252_v0, 0.0 }
 0x116   : > { %v730_v3 = vpop.f32.mrb[12].mxu0  ;;  %v1137_v4 = vpop.f32.mrb[12].mxu1 }
 0x117   : > { %v732_v5 = vpop.f32.mrb[13].mxu0  ;;  %1444 = vst.msk [vmem:[%s2189_s29 + $0x10] sm:$0xf] %vm1439_vm1, %v1772_v1  ;;  %v1773_v6 = vpack.c.bf16 %v1284_v2, %v1284_v2  ;;  %v1138_v7 = vadd.f32 %v1137_v4, %v730_v3  ;;  %v1139_v8 = vpop.f32.mrb[13].mxu1 }
 0x118   : > { %v733_v9 = vpop.f32.mrb[14].mxu0  ;;  %v1140_v10 = vpop.f32.mrb[14].mxu1 }
 0x119   : > { %v735_v11 = vpop.f32.mrb[15].mxu0  ;;  %1445 = vst.msk [vmem:[%s2189_s29 + $0x14] sm:$0xf] %vm1439_vm1, %v1773_v6  ;;  %v1253_v12 = vadd.f32 %v2181_v21, %v1138_v7  ;;  %v1141_v13 = vadd.f32 %v1140_v10, %v733_v9  ;;  %v1142_v14 = vpop.f32.mrb[15].mxu1 }
 0x11b   : > { %v1285_v15 = vmax.f32 %v1253_v12, 0.0  ;;  %v1254_v16 = vadd.f32 %v2181_v21, %v1141_v13 }
 0x11d   : > { %v1774_v17 = vpack.c.bf16 %v1285_v15, %v1285_v15  ;;  %v1286_v18 = vmax.f32 %v1254_v16, 0.0 }
 0x11e   : > { %v738_v19 = vpop.f32.mrb[16].mxu0  ;;  %v1145_v20 = vpop.f32.mrb[16].mxu1 }
 0x11f   : > { %v740_v22 = vpop.f32.mrb[17].mxu0  ;;  %1446 = vst.msk [vmem:[%s2189_s29 + $0x18] sm:$0xf] %vm1439_vm1, %v1774_v17  ;;  %v1775_v23 = vpack.c.bf16 %v1286_v18, %v1286_v18  ;;  %v1146_v24 = vadd.f32 %v1145_v20, %v738_v19  ;;  %v1147_v25 = vpop.f32.mrb[17].mxu1 }
 0x120   : > { %v741_v26 = vpop.f32.mrb[18].mxu0  ;;  %v1148_v27 = vpop.f32.mrb[18].mxu1 }
 0x121   : > { %v743_v28 = vpop.f32.mrb[19].mxu0  ;;  %1447 = vst.msk [vmem:[%s2189_s29 + $0x1c] sm:$0xf] %vm1439_vm1, %v1775_v23  ;;  %v1255_v29 = vadd.f32 %v2181_v21, %v1146_v24  ;;  %v1149_v30 = vadd.f32 %v1148_v27, %v741_v26  ;;  %v1150_v31 = vpop.f32.mrb[19].mxu1 }
 0x123   : > { %v1287_v32 = vmax.f32 %v1255_v29, 0.0  ;;  %v1256_v33 = vadd.f32 %v2181_v21, %v1149_v30 }
 0x125   : > { %v1776_v34 = vpack.c.bf16 %v1287_v32, %v1287_v32  ;;  %v1288_v35 = vmax.f32 %v1256_v33, 0.0 }
 0x126   : > { %v746_v36 = vpop.f32.mrb[20].mxu0  ;;  %v1153_v37 = vpop.f32.mrb[20].mxu1 }
 0x127   : > { %v748_v38 = vpop.f32.mrb[21].mxu0  ;;  %1448 = vst.msk [vmem:[%s2189_s29 + $0x20] sm:$0xf] %vm1439_vm1, %v1776_v34  ;;  %v1777_v39 = vpack.c.bf16 %v1288_v35, %v1288_v35  ;;  %v1154_v40 = vadd.f32 %v1153_v37, %v746_v36  ;;  %v1155_v41 = vpop.f32.mrb[21].mxu1 }
 0x128   : > { %v749_v42 = vpop.f32.mrb[22].mxu0  ;;  %v1156_v43 = vpop.f32.mrb[22].mxu1 }
 0x129   : > { %v751_v44 = vpop.f32.mrb[23].mxu0  ;;  %1449 = vst.msk [vmem:[%s2189_s29 + $0x24] sm:$0xf] %vm1439_vm1, %v1777_v39  ;;  %v1257_v45 = vadd.f32 %v2181_v21, %v1154_v40  ;;  %v1157_v46 = vadd.f32 %v1156_v43, %v749_v42  ;;  %v1158_v47 = vpop.f32.mrb[23].mxu1 }
 0x12b   : > { %v1289_v48 = vmax.f32 %v1257_v45, 0.0  ;;  %v1258_v49 = vadd.f32 %v2181_v21, %v1157_v46 }
 0x12d   : > { %v1778_v50 = vpack.c.bf16 %v1289_v48, %v1289_v48  ;;  %v1290_v51 = vmax.f32 %v1258_v49, 0.0 }
 0x12e   : > { %v754_v52 = vpop.f32.mrb[24].mxu0  ;;  %v1161_v53 = vpop.f32.mrb[24].mxu1 }
 0x12f   : > { %v756_v54 = vpop.f32.mrb[25].mxu0  ;;  %1450 = vst.msk [vmem:[%s2189_s29 + $0x28] sm:$0xf] %vm1439_vm1, %v1778_v50  ;;  %v1779_v55 = vpack.c.bf16 %v1290_v51, %v1290_v51  ;;  %v1162_v56 = vadd.f32 %v1161_v53, %v754_v52  ;;  %v1163_v57 = vpop.f32.mrb[25].mxu1 }
 0x130   : > { %v757_v58 = vpop.f32.mrb[26].mxu0  ;;  %v1164_v59 = vpop.f32.mrb[26].mxu1 }
 0x131   : > { %v759_v60 = vpop.f32.mrb[27].mxu0  ;;  %1451 = vst.msk [vmem:[%s2189_s29 + $0x2c] sm:$0xf] %vm1439_vm1, %v1779_v55  ;;  %v1259_v61 = vadd.f32 %v2181_v21, %v1162_v56  ;;  %v1165_v62 = vadd.f32 %v1164_v59, %v757_v58  ;;  %v1166_v63 = vpop.f32.mrb[27].mxu1 }
 0x133   : > { %v1291_v0 = vmax.f32 %v1259_v61, 0.0  ;;  %v1260_v1 = vadd.f32 %v2181_v21, %v1165_v62 }
 0x135   : > { %v1780_v2 = vpack.c.bf16 %v1291_v0, %v1291_v0  ;;  %v1292_v3 = vmax.f32 %v1260_v1, 0.0 }
 0x136   : > { %v762_v4 = vpop.f32.mrb[28].mxu0  ;;  %v1169_v5 = vpop.f32.mrb[28].mxu1 }
 0x137   : > { %v764_v6 = vpop.f32.mrb[29].mxu0  ;;  %1452 = vst.msk [vmem:[%s2189_s29 + $0x30] sm:$0xf] %vm1439_vm1, %v1780_v2  ;;  %v1781_v7 = vpack.c.bf16 %v1292_v3, %v1292_v3  ;;  %v1170_v8 = vadd.f32 %v1169_v5, %v762_v4  ;;  %v1171_v9 = vpop.f32.mrb[29].mxu1 }
 0x138   : > { %v765_v10 = vpop.f32.mrb[30].mxu0  ;;  %v1172_v11 = vpop.f32.mrb[30].mxu1 }
 0x139   : > { %v767_v12 = vpop.f32.mrb[31].mxu0  ;;  %1453 = vst.msk [vmem:[%s2189_s29 + $0x34] sm:$0xf] %vm1439_vm1, %v1781_v7  ;;  %v1261_v13 = vadd.f32 %v2181_v21, %v1170_v8  ;;  %v1173_v14 = vadd.f32 %v1172_v11, %v765_v10  ;;  %v1174_v15 = vpop.f32.mrb[31].mxu1 }
 0x13b   : > { %v1293_v16 = vmax.f32 %v1261_v13, 0.0  ;;  %v1262_v17 = vadd.f32 %v2181_v21, %v1173_v14 }
 0x13d   : > { %v1782_v18 = vpack.c.bf16 %v1293_v16, %v1293_v16  ;;  %v1294_v19 = vmax.f32 %v1262_v17, 0.0 }
 0x13e   : > { %v770_v20 = vpop.f32.mrb[32].mxu0  ;;  %v1177_v22 = vpop.f32.mrb[32].mxu1 }
 0x13f   : > { %v772_v23 = vpop.f32.mrb[33].mxu0  ;;  %1454 = vst.msk [vmem:[%s2189_s29 + $0x38] sm:$0xf] %vm1439_vm1, %v1782_v18  ;;  %v1783_v24 = vpack.c.bf16 %v1294_v19, %v1294_v19  ;;  %v1178_v25 = vadd.f32 %v1177_v22, %v770_v20  ;;  %v1179_v26 = vpop.f32.mrb[33].mxu1 }
 0x140   : > { %v773_v27 = vpop.f32.mrb[34].mxu0  ;;  %v1180_v28 = vpop.f32.mrb[34].mxu1 }
 0x141   : > { %v775_v29 = vpop.f32.mrb[35].mxu0  ;;  %1455 = vst.msk [vmem:[%s2189_s29 + $0x3c] sm:$0xf] %vm1439_vm1, %v1783_v24  ;;  %v1263_v30 = vadd.f32 %v2181_v21, %v1178_v25  ;;  %v1181_v31 = vadd.f32 %v1180_v28, %v773_v27  ;;  %v1182_v32 = vpop.f32.mrb[35].mxu1 }
 0x143   : > { %v1295_v33 = vmax.f32 %v1263_v30, 0.0  ;;  %v1264_v34 = vadd.f32 %v2181_v21, %v1181_v31 }
 0x145   : > { %v1784_v35 = vpack.c.bf16 %v1295_v33, %v1295_v33  ;;  %v1296_v36 = vmax.f32 %v1264_v34, 0.0 }
 0x146   : > { %v778_v37 = vpop.f32.mrb[36].mxu0  ;;  %v1185_v38 = vpop.f32.mrb[36].mxu1 }
 0x147   : > { %v780_v39 = vpop.f32.mrb[37].mxu0  ;;  %1456 = vst.msk [vmem:[%s2189_s29 + $0x40] sm:$0xf] %vm1439_vm1, %v1784_v35  ;;  %v1785_v40 = vpack.c.bf16 %v1296_v36, %v1296_v36  ;;  %v1186_v41 = vadd.f32 %v1185_v38, %v778_v37  ;;  %v1187_v42 = vpop.f32.mrb[37].mxu1 }
 0x148   : > { %v781_v43 = vpop.f32.mrb[38].mxu0  ;;  %v1188_v44 = vpop.f32.mrb[38].mxu1 }
 0x149   : > { %v783_v45 = vpop.f32.mrb[39].mxu0  ;;  %1457 = vst.msk [vmem:[%s2189_s29 + $0x44] sm:$0xf] %vm1439_vm1, %v1785_v40  ;;  %v1265_v46 = vadd.f32 %v2181_v21, %v1186_v41  ;;  %v1189_v47 = vadd.f32 %v1188_v44, %v781_v43  ;;  %v1190_v48 = vpop.f32.mrb[39].mxu1 }
 0x14b   : > { %v1297_v49 = vmax.f32 %v1265_v46, 0.0  ;;  %v1266_v50 = vadd.f32 %v2181_v21, %v1189_v47 }
 0x14d   : > { %v1786_v51 = vpack.c.bf16 %v1297_v49, %v1297_v49  ;;  %v1298_v52 = vmax.f32 %v1266_v50, 0.0 }
 0x14e   : > { %v786_v53 = vpop.f32.mrb[40].mxu0  ;;  %v1193_v54 = vpop.f32.mrb[40].mxu1 }
 0x14f   : > { %v788_v55 = vpop.f32.mrb[41].mxu0  ;;  %1458 = vst.msk [vmem:[%s2189_s29 + $0x48] sm:$0xf] %vm1439_vm1, %v1786_v51  ;;  %v1787_v56 = vpack.c.bf16 %v1298_v52, %v1298_v52  ;;  %v1194_v57 = vadd.f32 %v1193_v54, %v786_v53  ;;  %v1195_v58 = vpop.f32.mrb[41].mxu1 }
 0x150   : > { %v789_v59 = vpop.f32.mrb[42].mxu0  ;;  %v1196_v60 = vpop.f32.mrb[42].mxu1 }
 0x151   : > { %v791_v61 = vpop.f32.mrb[43].mxu0  ;;  %1459 = vst.msk [vmem:[%s2189_s29 + $0x4c] sm:$0xf] %vm1439_vm1, %v1787_v56  ;;  %v1267_v62 = vadd.f32 %v2181_v21, %v1194_v57  ;;  %v1197_v63 = vadd.f32 %v1196_v60, %v789_v59  ;;  %v1198_v0 = vpop.f32.mrb[43].mxu1 }
 0x153   : > { %v1299_v1 = vmax.f32 %v1267_v62, 0.0  ;;  %v1268_v2 = vadd.f32 %v2181_v21, %v1197_v63 }
 0x155   : > { %v1788_v3 = vpack.c.bf16 %v1299_v1, %v1299_v1  ;;  %v1300_v4 = vmax.f32 %v1268_v2, 0.0 }
 0x156   : > { %v794_v5 = vpop.f32.mrb[44].mxu0  ;;  %v1201_v6 = vpop.f32.mrb[44].mxu1 }
 0x157   : > { %v796_v7 = vpop.f32.mrb[45].mxu0  ;;  %1460 = vst.msk [vmem:[%s2189_s29 + $0x50] sm:$0xf] %vm1439_vm1, %v1788_v3  ;;  %v1789_v8 = vpack.c.bf16 %v1300_v4, %v1300_v4  ;;  %v1202_v9 = vadd.f32 %v1201_v6, %v794_v5  ;;  %v1203_v10 = vpop.f32.mrb[45].mxu1 }
 0x158   : > { %v797_v11 = vpop.f32.mrb[46].mxu0  ;;  %v1204_v12 = vpop.f32.mrb[46].mxu1 }
 0x159   : > { %v799_v13 = vpop.f32.mrb[47].mxu0  ;;  %1461 = vst.msk [vmem:[%s2189_s29 + $0x54] sm:$0xf] %vm1439_vm1, %v1789_v8  ;;  %v1269_v14 = vadd.f32 %v2181_v21, %v1202_v9  ;;  %v1205_v15 = vadd.f32 %v1204_v12, %v797_v11  ;;  %v1206_v16 = vpop.f32.mrb[47].mxu1 }
 0x15b   : > { %v1301_v17 = vmax.f32 %v1269_v14, 0.0  ;;  %v1270_v18 = vadd.f32 %v2181_v21, %v1205_v15 }
 0x15d   : > { %v1790_v19 = vpack.c.bf16 %v1301_v17, %v1301_v17  ;;  %v1302_v20 = vmax.f32 %v1270_v18, 0.0 }
 0x15e   : > { %v802_v22 = vpop.f32.mrb[48].mxu0  ;;  %v1209_v23 = vpop.f32.mrb[48].mxu1 }
 0x15f   : > { %v804_v24 = vpop.f32.mrb[49].mxu0  ;;  %1462 = vst.msk [vmem:[%s2189_s29 + $0x58] sm:$0xf] %vm1439_vm1, %v1790_v19  ;;  %v1791_v25 = vpack.c.bf16 %v1302_v20, %v1302_v20  ;;  %v1210_v26 = vadd.f32 %v1209_v23, %v802_v22  ;;  %v1211_v27 = vpop.f32.mrb[49].mxu1 }
 0x160   : > { %v805_v28 = vpop.f32.mrb[50].mxu0  ;;  %v1212_v29 = vpop.f32.mrb[50].mxu1 }
 0x161   : > { %v807_v30 = vpop.f32.mrb[51].mxu0  ;;  %1463 = vst.msk [vmem:[%s2189_s29 + $0x5c] sm:$0xf] %vm1439_vm1, %v1791_v25  ;;  %v1271_v31 = vadd.f32 %v2181_v21, %v1210_v26  ;;  %v1213_v32 = vadd.f32 %v1212_v29, %v805_v28  ;;  %v1214_v33 = vpop.f32.mrb[51].mxu1 }
 0x163   : > { %v1303_v34 = vmax.f32 %v1271_v31, 0.0  ;;  %v1272_v35 = vadd.f32 %v2181_v21, %v1213_v32 }
 0x165   : > { %v1792_v36 = vpack.c.bf16 %v1303_v34, %v1303_v34  ;;  %v1304_v37 = vmax.f32 %v1272_v35, 0.0 }
 0x166   : > { %v810_v38 = vpop.f32.mrb[52].mxu0  ;;  %v1217_v39 = vpop.f32.mrb[52].mxu1 }
 0x167   : > { %v812_v40 = vpop.f32.mrb[53].mxu0  ;;  %1464 = vst.msk [vmem:[%s2189_s29 + $0x60] sm:$0xf] %vm1439_vm1, %v1792_v36  ;;  %v1793_v41 = vpack.c.bf16 %v1304_v37, %v1304_v37  ;;  %v1218_v42 = vadd.f32 %v1217_v39, %v810_v38  ;;  %v1219_v43 = vpop.f32.mrb[53].mxu1 }
 0x168   : > { %v813_v44 = vpop.f32.mrb[54].mxu0  ;;  %v1220_v45 = vpop.f32.mrb[54].mxu1 }
 0x169   : > { %v815_v46 = vpop.f32.mrb[55].mxu0  ;;  %1465 = vst.msk [vmem:[%s2189_s29 + $0x64] sm:$0xf] %vm1439_vm1, %v1793_v41  ;;  %v1273_v47 = vadd.f32 %v2181_v21, %v1218_v42  ;;  %v1221_v48 = vadd.f32 %v1220_v45, %v813_v44  ;;  %v1222_v49 = vpop.f32.mrb[55].mxu1 }
 0x16b   : > { %v1305_v50 = vmax.f32 %v1273_v47, 0.0  ;;  %v1274_v51 = vadd.f32 %v2181_v21, %v1221_v48 }
 0x16d   : > { %v1794_v52 = vpack.c.bf16 %v1305_v50, %v1305_v50  ;;  %v1306_v53 = vmax.f32 %v1274_v51, 0.0 }
 0x16e   : > { %v818_v54 = vpop.f32.mrb[56].mxu0  ;;  %v1225_v55 = vpop.f32.mrb[56].mxu1 }
 0x16f   : > { %v820_v56 = vpop.f32.mrb[57].mxu0  ;;  %1466 = vst.msk [vmem:[%s2189_s29 + $0x68] sm:$0xf] %vm1439_vm1, %v1794_v52  ;;  %v1795_v57 = vpack.c.bf16 %v1306_v53, %v1306_v53  ;;  %v1226_v58 = vadd.f32 %v1225_v55, %v818_v54  ;;  %v1227_v59 = vpop.f32.mrb[57].mxu1 }
 0x170   : > { %v821_v60 = vpop.f32.mrb[58].mxu0  ;;  %v1228_v61 = vpop.f32.mrb[58].mxu1 }
 0x171   : > { %v823_v62 = vpop.f32.mrb[59].mxu0  ;;  %1467 = vst.msk [vmem:[%s2189_s29 + $0x6c] sm:$0xf] %vm1439_vm1, %v1795_v57  ;;  %v1275_v63 = vadd.f32 %v2181_v21, %v1226_v58  ;;  %v1229_v0 = vadd.f32 %v1228_v61, %v821_v60  ;;  %v1230_v1 = vpop.f32.mrb[59].mxu1 }
 0x173   : > { %v1307_v2 = vmax.f32 %v1275_v63, 0.0  ;;  %v1276_v3 = vadd.f32 %v2181_v21, %v1229_v0 }
 0x175   : > { %v1796_v4 = vpack.c.bf16 %v1307_v2, %v1307_v2  ;;  %v1308_v5 = vmax.f32 %v1276_v3, 0.0 }
 0x176   : > { %v826_v6 = vpop.f32.mrb[60].mxu0  ;;  %v1233_v7 = vpop.f32.mrb[60].mxu1 }
 0x177   : > { %v828_v8 = vpop.f32.mrb[61].mxu0  ;;  %1468 = vst.msk [vmem:[%s2189_s29 + $0x70] sm:$0xf] %vm1439_vm1, %v1796_v4  ;;  %v1797_v9 = vpack.c.bf16 %v1308_v5, %v1308_v5  ;;  %v1234_v10 = vadd.f32 %v1233_v7, %v826_v6  ;;  %v1235_v11 = vpop.f32.mrb[61].mxu1 }
 0x178   : > { %v829_v12 = vpop.f32.mrb[62].mxu0  ;;  %v1236_v13 = vpop.f32.mrb[62].mxu1 }
 0x179   : > { %v831_v14 = vpop.f32.mrb[63].mxu0  ;;  %1469 = vst.msk [vmem:[%s2189_s29 + $0x74] sm:$0xf] %vm1439_vm1, %v1797_v9  ;;  %v1277_v15 = vadd.f32 %v2181_v21, %v1234_v10  ;;  %v1237_v16 = vadd.f32 %v1236_v13, %v829_v12  ;;  %v1238_v17 = vpop.f32.mrb[63].mxu1 }
 0x17b   : > { %v1309_v18 = vmax.f32 %v1277_v15, 0.0  ;;  %v1278_v19 = vadd.f32 %v2181_v21, %v1237_v16 }
 0x17d   : > { %v1798_v20 = vpack.c.bf16 %v1309_v18, %v1309_v18  ;;  %v1310_v22 = vmax.f32 %v1278_v19, 0.0 }
 0x17f   : > { %1470 = vst.msk [vmem:[%s2189_s29 + $0x78] sm:$0xf] %vm1439_vm1, %v1798_v20  ;;  %v1799_v23 = vpack.c.bf16 %v1310_v22, %v1310_v22 }
 0x181   : > { %1471 = vst.msk [vmem:[%s2189_s29 + $0x7c] sm:$0xf] %vm1439_vm1, %v1799_v23 }
 0x182 PF: > { %s15_s20 = sadd.s32 1, %s1961_s20   ;;  %s2300_s18 = smov %s1957_s19 }
 0x183   : > { %p12_p5 = scmp.ge.s32.totalorder %s15_s20, 4   ;;  %s2301_s19 = smov %s2303_s21 }
 0x185   :  { %14 = sbr.rel (!%p12_p5) target bundleno = 2 (0x2), region = 82 }

</bundles_post_ra>
